<compile_context>
chip_gen: v5e
topology: v5e:2x2
jax: 0.10.0
libtpu: 0.0.40
codegen_flags: <defaults>
</compile_context>

<pallas_src>
import functools

import jax
import jax.numpy as jnp
from jax.experimental import pallas as pl
from jax.experimental.pallas import tpu as pltpu


_VMEM_LIMIT = 48 * 1024 * 1024   # safe on v5e/v6e (128 MiB) and v7x (64 MiB)


def _round_up(x, m):
    return (x + m - 1) // m * m


def _choose_tm(m, tm_max=512):
    # Prefer >= 2 grid steps (v7x shards "parallel" axes over 2 TensorCores)
    # while keeping tiles near the measured roofline knee (~512 rows).
    if m <= 64:
        return _round_up(max(m, 8), 8)
    return min(tm_max, _round_up((m + 1) // 2, 8))


# ----------------------------------------------------------------------------
# Pallas kernels
# ----------------------------------------------------------------------------
def _matmul_bias_relu_kernel(x_ref, w_ref, b_ref, o_ref):
    # x: (tm, K) f32 -> bf16 ; w: (K, N) bf16 (BN scale folded) ; b: (1, N) f32
    acc = jnp.dot(x_ref[...].astype(jnp.bfloat16), w_ref[...],
                  preferred_element_type=jnp.float32)
    o_ref[...] = jnp.maximum(acc + b_ref[...], 0.0)


def _conv3x3_bn_relu_kernel(x_ref, w_ref, b_ref, o_ref, *, wpad, l_out):
    # Direct 3x3 / stride-1 / pad-1 conv on a flattened zero-padded image.
    # x_ref: (1, Lsrc, C) f32 ; w_ref: (9, C, Cout) bf16 ; b_ref: (1, Cout) f32
    # o_ref: (1, Lout, Cout) f32 where Lout = H * wpad (width-pad cols = junk,
    # sliced off outside). out_flat[h*wpad + w] = sum_t x_flat[... + di*wpad+dj].
    cout = o_ref.shape[-1]
    acc = jnp.zeros((l_out, cout), jnp.float32)
    for di in range(3):
        for dj in range(3):
            off = di * wpad + dj                      # static shift per tap
            xs = x_ref[0, off:off + l_out, :].astype(jnp.bfloat16)
            acc = acc + jnp.dot(xs, w_ref[di * 3 + dj],
                                preferred_element_type=jnp.float32)
    o_ref[0] = jnp.maximum(acc + b_ref[...], 0.0)


def _residual_out_kernel(x0_ref, x1_ref, x2_ref, xr_ref,
                         w0_ref, w1_ref, w2_ref, b_ref, o_ref):
    # relu(x + x0@W0 + x1@W1 + x2@W2 + b) ; residual scale folded into W*/b.
    # The split matmul implements the 1x1 conv on the (implicit) channel concat.
    acc = jnp.dot(x0_ref[...].astype(jnp.bfloat16), w0_ref[...],
                  preferred_element_type=jnp.float32)
    acc = acc + jnp.dot(x1_ref[...].astype(jnp.bfloat16), w1_ref[...],
                        preferred_element_type=jnp.float32)
    acc = acc + jnp.dot(x2_ref[...].astype(jnp.bfloat16), w2_ref[...],
                        preferred_element_type=jnp.float32)
    o_ref[...] = jnp.maximum(xr_ref[...] + acc + b_ref[...], 0.0)


# ----------------------------------------------------------------------------
# pallas_call wrappers
# ----------------------------------------------------------------------------
def fused_matmul_bias_relu(x, w_bf16, shift):
    M, K = x.shape
    N = w_bf16.shape[1]
    tm = _choose_tm(M)
    Mp = _round_up(M, tm)
    x_p = jnp.pad(x, ((0, Mp - M), (0, 0)))
    out = pl.pallas_call(
        _matmul_bias_relu_kernel,
        out_shape=jax.ShapeDtypeStruct((Mp, N), jnp.float32),
        grid=(Mp // tm,),
        in_specs=[
            pl.BlockSpec((tm, K), lambda i: (i, 0)),
            pl.BlockSpec((K, N), lambda i: (0, 0)),    # grid-invariant weight
            pl.BlockSpec((1, N), lambda i: (0, 0)),    # grid-invariant shift
        ],
        out_specs=pl.BlockSpec((tm, N), lambda i: (i, 0)),
        compiler_params=pltpu.CompilerParams(
            dimension_semantics=("parallel",),
            vmem_limit_bytes=_VMEM_LIMIT),
    )(x_p, w_bf16, shift.reshape(1, N))
    return out[:M]


def conv3x3_bn_relu(x_img, w9_bf16, shift):
    """Direct 3x3 stride-1 pad-1 conv + folded BN + ReLU (NHWC)."""
    N, H, W, C = x_img.shape
    Cout = w9_bf16.shape[-1]
    wpad = _round_up(W + 2, 8)            # sublane-aligned flattened row stride
    # 1 halo row/col of zeros top/left; halo + guard rows/cols bottom/right.
    xp = jnp.pad(x_img, ((0, 0), (1, 2), (1, wpad - W - 1), (0, 0)))
    l_src = (H + 3) * wpad
    l_out = H * wpad
    x_flat = xp.reshape(N, l_src, C)
    kern = functools.partial(_conv3x3_bn_relu_kernel, wpad=wpad, l_out=l_out)
    out = pl.pallas_call(
        kern,
        out_shape=jax.ShapeDtypeStruct((N, l_out, Cout), jnp.float32),
        grid=(N,),
        in_specs=[
            pl.BlockSpec((1, l_src, C), lambda b: (b, 0, 0)),
            pl.BlockSpec((9, C, Cout), lambda b: (0, 0, 0)),   # grid-invariant
            pl.BlockSpec((1, Cout), lambda b: (0, 0)),
        ],
        out_specs=pl.BlockSpec((1, l_out, Cout), lambda b: (b, 0, 0)),
        compiler_params=pltpu.CompilerParams(
            dimension_semantics=("parallel",),
            vmem_limit_bytes=_VMEM_LIMIT),
    )(x_flat, w9_bf16, shift.reshape(1, Cout))
    # Drop the width-padding columns to recover (N, H, W, Cout).
    return out.reshape(N, H, wpad, Cout)[:, :, :W, :]


def fused_residual_out(x0, x1, x2, x_res, w0, w1, w2, bias):
    M = x0.shape[0]
    N = w0.shape[1]
    c0, c1, c2 = x0.shape[1], x1.shape[1], x2.shape[1]
    tm = _choose_tm(M)
    Mp = _round_up(M, tm)
    pad = ((0, Mp - M), (0, 0))
    x0p = jnp.pad(x0, pad)
    x1p = jnp.pad(x1, pad)
    x2p = jnp.pad(x2, pad)
    xrp = jnp.pad(x_res, pad)
    out = pl.pallas_call(
        _residual_out_kernel,
        out_shape=jax.ShapeDtypeStruct((Mp, N), jnp.float32),
        grid=(Mp // tm,),
        in_specs=[
            pl.BlockSpec((tm, c0), lambda i: (i, 0)),
            pl.BlockSpec((tm, c1), lambda i: (i, 0)),
            pl.BlockSpec((tm, c2), lambda i: (i, 0)),
            pl.BlockSpec((tm, N), lambda i: (i, 0)),
            pl.BlockSpec((c0, N), lambda i: (0, 0)),
            pl.BlockSpec((c1, N), lambda i: (0, 0)),
            pl.BlockSpec((c2, N), lambda i: (0, 0)),
            pl.BlockSpec((1, N), lambda i: (0, 0)),
        ],
        out_specs=pl.BlockSpec((tm, N), lambda i: (i, 0)),
        compiler_params=pltpu.CompilerParams(
            dimension_semantics=("parallel",),
            vmem_limit_bytes=_VMEM_LIMIT),
    )(x0p, x1p, x2p, xrp, w0, w1, w2, bias.reshape(1, N))
    return out[:M]


# ----------------------------------------------------------------------------
# Parameters (Conv + folded eval-mode BN), matching the PyTorch module layout
# ----------------------------------------------------------------------------
def _make_conv_bn(key, c_in, c_out, ksize, eps=0.001):
    kw_, kg, kb, km, kv = jax.random.split(key, 5)
    w = jax.random.normal(kw_, (c_out, c_in, ksize, ksize), jnp.float32) * 0.1
    gamma = 1.0 + 0.1 * jax.random.normal(kg, (c_out,), jnp.float32)
    beta = 0.1 * jax.random.normal(kb, (c_out,), jnp.float32)
    mean = 0.1 * jax.random.normal(km, (c_out,), jnp.float32)
    var = jnp.abs(jax.random.normal(kv, (c_out,), jnp.float32)) + 0.5
    scale = gamma / jnp.sqrt(var + eps)
    shift = beta - mean * scale
    if ksize == 1:
        w_mm = w.reshape(c_out, c_in).T * scale[None, :]         # (Cin, Cout)
        return {"w": w_mm.astype(jnp.bfloat16), "shift": shift}
    # (Cout, Cin, 3, 3) -> (3, 3, Cin, Cout) -> (9, Cin, Cout), tap = di*3+dj.
    w9 = jnp.transpose(w, (2, 3, 1, 0)).reshape(9, c_in, c_out)
    w9 = w9 * scale[None, None, :]
    return {"w": w9.astype(jnp.bfloat16), "shift": shift}


def init_inception_resnet_a(key, in_channels, scale=1.0):
    keys = jax.random.split(key, 7)
    b0 = _make_conv_bn(keys[0], in_channels, 32, 1)
    b1_0 = _make_conv_bn(keys[1], in_channels, 32, 1)
    b1_1 = _make_conv_bn(keys[2], 32, 32, 3)
    b2_0 = _make_conv_bn(keys[3], in_channels, 32, 1)
    b2_1 = _make_conv_bn(keys[4], 32, 48, 3)
    b2_2 = _make_conv_bn(keys[5], 48, 64, 3)
    # Final combining conv: 128 -> 320, bias=True, no BN / no ReLU.
    kf_w, kf_b = jax.random.split(keys[6])
    wf = jax.random.normal(kf_w, (320, 128, 1, 1), jnp.float32) * 0.05
    bf = 0.1 * jax.random.normal(kf_b, (320,), jnp.float32)
    wf_mm = wf.reshape(320, 128).T * scale           # fold residual scale
    bf = bf * scale
    # Fuse the three 1x1 stem convs into one matmul (x read once).
    stem_w = jnp.concatenate([b0["w"], b1_0["w"], b2_0["w"]], axis=1)  # (Cin,96)
    stem_shift = jnp.concatenate([b0["shift"], b1_0["shift"], b2_0["shift"]])
    return {
        "stem_w": stem_w, "stem_shift": stem_shift,
        "b1_1": b1_1, "b2_1": b2_1, "b2_2": b2_2,
        "wf0": wf_mm[0:32].astype(jnp.bfloat16),      # multiplies branch_0 out
        "wf1": wf_mm[32:64].astype(jnp.bfloat16),     # multiplies branch_1 out
        "wf2": wf_mm[64:128].astype(jnp.bfloat16),    # multiplies branch_2 out
        "bf": bf,
    }


# ----------------------------------------------------------------------------
# Inception_ResNet_A forward (NCHW in / NCHW out, like the PyTorch module)
# ----------------------------------------------------------------------------
def inception_resnet_a_forward(x_nchw, params):
    N, C, H, W = x_nchw.shape
    x = jnp.transpose(x_nchw, (0, 2, 3, 1))            # NCHW -> NHWC
    x_flat = x.reshape(N * H * W, C)

    # Fused 1x1 stem: branch_0, branch_1[0], branch_2[0] in a single matmul.
    stem = fused_matmul_bias_relu(x_flat, params["stem_w"], params["stem_shift"])
    x0 = stem[:, 0:32]                                  # branch_0 output (flat)
    b1 = stem[:, 32:64].reshape(N, H, W, 32)
    b2 = stem[:, 64:96].reshape(N, H, W, 32)

    # branch_1: 3x3 s1 p1 (direct conv, no im2col materialization)
    x1 = conv3x3_bn_relu(b1, params["b1_1"]["w"], params["b1_1"]["shift"])
    x1 = x1.reshape(N * H * W, 32)

    # branch_2: 3x3 -> 3x3
    t = conv3x3_bn_relu(b2, params["b2_1"]["w"], params["b2_1"]["shift"])
    x2 = conv3x3_bn_relu(t, params["b2_2"]["w"], params["b2_2"]["shift"])
    x2 = x2.reshape(N * H * W, 64)

    # Fused combining 1x1 conv (+bias) over the implicit concat, scaled
    # residual add and final ReLU -- no channel concat is materialized.
    out = fused_residual_out(x0, x1, x2, x_flat,
                             params["wf0"], params["wf1"], params["wf2"],
                             params["bf"])
    out = out.reshape(N, H, W, 320)
    return jnp.transpose(out, (0, 3, 1, 2))             # NHWC -> NCHW


if __name__ == "__main__":
    key = jax.random.PRNGKey(0)
    kx, kp = jax.random.split(key)

    # Inception_ResNet_A requires in_channels == 320 (residual add with the
    # 320-channel combining conv). Keep batch/spatial small for the demo.
    B, C_in, H, W = 2, 320, 8, 8
    x = jax.random.normal(kx, (B, C_in, H, W), jnp.float32)
    params = init_inception_resnet_a(kp, C_in, scale=0.17)

    fwd = jax.jit(functools.partial(inception_resnet_a_forward, params=params))
    out = fwd(x)
    jax.block_until_ready(out)

    assert out.shape == (B, 320, H, W), out.shape
    print("KERNEL_OK")
</pallas_src>

<mosaic_0001>
module attributes {stable_mosaic.version = 11 : i64} {
  func.func @_matmul_bias_relu_kernel(%arg0: i32, %arg1: memref<64x320xf32, #tpu.memory_space<vmem>>, %arg2: memref<320x96xbf16, #tpu.memory_space<vmem>>, %arg3: memref<1x96xf32, #tpu.memory_space<vmem>>, %arg4: memref<64x96xf32, #tpu.memory_space<vmem>>) attributes {dimension_semantics = [#tpu.dimension_semantics<parallel>], iteration_bounds = array<i64: 2>, scalar_prefetch = 0 : i64, scratch_operands = 0 : i64, tpu.core_type = #tpu.core_type<tc>, window_params = [{transform_indices = @transform_0, window_bounds = array<i64: 64, 320>}, {pipeline_mode = #tpu.pipeline_mode<synchronous>, transform_indices = @transform_1, window_bounds = array<i64: 320, 96>}, {pipeline_mode = #tpu.pipeline_mode<synchronous>, transform_indices = @transform_2, window_bounds = array<i64: 1, 96>}, {transform_indices = @transform_3, window_bounds = array<i64: 64, 96>}]} {
    %c0 = arith.constant 0 : index
    %c0_0 = arith.constant 0 : index
    %0 = vector.load %arg1[%c0, %c0_0] : memref<64x320xf32, #tpu.memory_space<vmem>>, vector<64x320xf32>
    %1 = arith.truncf %0 : vector<64x320xf32> to vector<64x320xbf16>
    %c0_1 = arith.constant 0 : index
    %c0_2 = arith.constant 0 : index
    %2 = vector.load %arg2[%c0_1, %c0_2] : memref<320x96xbf16, #tpu.memory_space<vmem>>, vector<320x96xbf16>
    %cst = arith.constant dense<0.000000e+00> : vector<64x96xf32>
    %3 = tpu.matmul %1, %2, %cst {dimension_numbers = #tpu.dot_dimension_numbers<[1], [0], [0], [1], [0, 0, 1, 1], [], []>} : vector<64x320xbf16>, vector<320x96xbf16>, vector<64x96xf32> -> vector<64x96xf32>
    %c0_3 = arith.constant 0 : index
    %c0_4 = arith.constant 0 : index
    %4 = vector.load %arg3[%c0_3, %c0_4] : memref<1x96xf32, #tpu.memory_space<vmem>>, vector<1x96xf32>
    %5 = vector.broadcast %4 : vector<1x96xf32> to vector<64x96xf32>
    %6 = arith.addf %3, %5 : vector<64x96xf32>
    %cst_5 = arith.constant 0.000000e+00 : f32
    %7 = vector.broadcast %cst_5 : f32 to vector<64x96xf32>
    %8 = arith.maximumf %6, %7 : vector<64x96xf32>
    %c0_6 = arith.constant 0 : index
    %c0_7 = arith.constant 0 : index
    %9 = vector.load %arg4[%c0_6, %c0_7] : memref<64x96xf32, #tpu.memory_space<vmem>>, vector<64x96xf32>
    tpu.vector_store %arg4[%c0_6, %c0_7], %8 {strides = array<i32>} : memref<64x96xf32, #tpu.memory_space<vmem>>, vector<64x96xf32>,
    return
  }
  func.func @transform_0(%arg0: i32) -> (i32, i32) {
    %c0_i32 = arith.constant 0 : i32
    %c0_i32_0 = arith.constant 0 : i32
    return %arg0, %c0_i32 : i32, i32
  }
  func.func @transform_1(%arg0: i32) -> (i32, i32) {
    %c0_i32 = arith.constant 0 : i32
    %c0_i32_0 = arith.constant 0 : i32
    %c0_i32_1 = arith.constant 0 : i32
    return %c0_i32, %c0_i32_0 : i32, i32
  }
  func.func @transform_2(%arg0: i32) -> (i32, i32) {
    %c0_i32 = arith.constant 0 : i32
    %c0_i32_0 = arith.constant 0 : i32
    %c0_i32_1 = arith.constant 0 : i32
    return %c0_i32, %c0_i32_0 : i32, i32
  }
  func.func @transform_3(%arg0: i32) -> (i32, i32) {
    %c0_i32 = arith.constant 0 : i32
    %c0_i32_0 = arith.constant 0 : i32
    return %arg0, %c0_i32 : i32, i32
  }
}

module attributes {stable_mosaic.version = 11 : i64} {
  func.func @_conv3x3_bn_relu_kernel(%arg0: i32, %arg1: memref<1x176x32xf32, #tpu.memory_space<vmem>>, %arg2: memref<9x32x32xbf16, #tpu.memory_space<vmem>>, %arg3: memref<1x32xf32, #tpu.memory_space<vmem>>, %arg4: memref<1x128x32xf32, #tpu.memory_space<vmem>>) attributes {dimension_semantics = [#tpu.dimension_semantics<parallel>], iteration_bounds = array<i64: 2>, scalar_prefetch = 0 : i64, scratch_operands = 0 : i64, tpu.core_type = #tpu.core_type<tc>, window_params = [{transform_indices = @transform_0, window_bounds = array<i64: 1, 176, 32>}, {pipeline_mode = #tpu.pipeline_mode<synchronous>, transform_indices = @transform_1, window_bounds = array<i64: 9, 32, 32>}, {pipeline_mode = #tpu.pipeline_mode<synchronous>, transform_indices = @transform_2, window_bounds = array<i64: 1, 32>}, {transform_indices = @transform_3, window_bounds = array<i64: 1, 128, 32>}]} {
    %cst = arith.constant 0.000000e+00 : f32
    %0 = vector.broadcast %cst : f32 to vector<128x32xf32>
    %c0 = arith.constant 0 : index
    %c0_0 = arith.constant 0 : index
    %c0_1 = arith.constant 0 : index
    %1 = vector.load %arg1[%c0, %c0_0, %c0_1] : memref<1x176x32xf32, #tpu.memory_space<vmem>>, vector<1x128x32xf32>
    %2 = vector.shape_cast %1 : vector<1x128x32xf32> to vector<128x32xf32>
    %3 = arith.truncf %2 : vector<128x32xf32> to vector<128x32xbf16>
    %c0_2 = arith.constant 0 : index
    %c0_3 = arith.constant 0 : index
    %c0_4 = arith.constant 0 : index
    %4 = vector.load %arg2[%c0_2, %c0_3, %c0_4] : memref<9x32x32xbf16, #tpu.memory_space<vmem>>, vector<1x32x32xbf16>
    %5 = vector.shape_cast %4 : vector<1x32x32xbf16> to vector<32x32xbf16>
    %cst_5 = arith.constant dense<0.000000e+00> : vector<128x32xf32>
    %6 = tpu.matmul %3, %5, %cst_5 {dimension_numbers = #tpu.dot_dimension_numbers<[1], [0], [0], [1], [0, 0, 1, 1], [], []>} : vector<128x32xbf16>, vector<32x32xbf16>, vector<128x32xf32> -> vector<128x32xf32>
    %7 = arith.addf %0, %6 : vector<128x32xf32>
    %c0_6 = arith.constant 0 : index
    %c1 = arith.constant 1 : index
    %c0_7 = arith.constant 0 : index
    %8 = vector.load %arg1[%c0_6, %c1, %c0_7] : memref<1x176x32xf32, #tpu.memory_space<vmem>>, vector<1x128x32xf32>
    %9 = vector.shape_cast %8 : vector<1x128x32xf32> to vector<128x32xf32>
    %10 = arith.truncf %9 : vector<128x32xf32> to vector<128x32xbf16>
    %c1_8 = arith.constant 1 : index
    %c0_9 = arith.constant 0 : index
    %c0_10 = arith.constant 0 : index
    %11 = vector.load %arg2[%c1_8, %c0_9, %c0_10] : memref<9x32x32xbf16, #tpu.memory_space<vmem>>, vector<1x32x32xbf16>
    %12 = vector.shape_cast %11 : vector<1x32x32xbf16> to vector<32x32xbf16>
    %cst_11 = arith.constant dense<0.000000e+00> : vector<128x32xf32>
    %13 = tpu.matmul %10, %12, %cst_11 {dimension_numbers = #tpu.dot_dimension_numbers<[1], [0], [0], [1], [0, 0, 1, 1], [], []>} : vector<128x32xbf16>, vector<32x32xbf16>, vector<128x32xf32> -> vector<128x32xf32>
    %14 = arith.addf %7, %13 : vector<128x32xf32>
    %c0_12 = arith.constant 0 : index
    %c2 = arith.constant 2 : index
    %c0_13 = arith.constant 0 : index
    %15 = vector.load %arg1[%c0_12, %c2, %c0_13] : memref<1x176x32xf32, #tpu.memory_space<vmem>>, vector<1x128x32xf32>
    %16 = vector.shape_cast %15 : vector<1x128x32xf32> to vector<128x32xf32>
    %17 = arith.truncf %16 : vector<128x32xf32> to vector<128x32xbf16>
    %c2_14 = arith.constant 2 : index
    %c0_15 = arith.constant 0 : index
    %c0_16 = arith.constant 0 : index
    %18 = vector.load %arg2[%c2_14, %c0_15, %c0_16] : memref<9x32x32xbf16, #tpu.memory_space<vmem>>, vector<1x32x32xbf16>
    %19 = vector.shape_cast %18 : vector<1x32x32xbf16> to vector<32x32xbf16>
    %cst_17 = arith.constant dense<0.000000e+00> : vector<128x32xf32>
    %20 = tpu.matmul %17, %19, %cst_17 {dimension_numbers = #tpu.dot_dimension_numbers<[1], [0], [0], [1], [0, 0, 1, 1], [], []>} : vector<128x32xbf16>, vector<32x32xbf16>, vector<128x32xf32> -> vector<128x32xf32>
    %21 = arith.addf %14, %20 : vector<128x32xf32>
    %c0_18 = arith.constant 0 : index
    %c16 = arith.constant 16 : index
    %c0_19 = arith.constant 0 : index
    %22 = vector.load %arg1[%c0_18, %c16, %c0_19] : memref<1x176x32xf32, #tpu.memory_space<vmem>>, vector<1x128x32xf32>
    %23 = vector.shape_cast %22 : vector<1x128x32xf32> to vector<128x32xf32>
    %24 = arith.truncf %23 : vector<128x32xf32> to vector<128x32xbf16>
    %c3 = arith.constant 3 : index
    %c0_20 = arith.constant 0 : index
    %c0_21 = arith.constant 0 : index
    %25 = vector.load %arg2[%c3, %c0_20, %c0_21] : memref<9x32x32xbf16, #tpu.memory_space<vmem>>, vector<1x32x32xbf16>
    %26 = vector.shape_cast %25 : vector<1x32x32xbf16> to vector<32x32xbf16>
    %cst_22 = arith.constant dense<0.000000e+00> : vector<128x32xf32>
    %27 = tpu.matmul %24, %26, %cst_22 {dimension_numbers = #tpu.dot_dimension_numbers<[1], [0], [0], [1], [0, 0, 1, 1], [], []>} : vector<128x32xbf16>, vector<32x32xbf16>, vector<128x32xf32> -> vector<128x32xf32>
    %28 = arith.addf %21, %27 : vector<128x32xf32>
    %c0_23 = arith.constant 0 : index
    %c17 = arith.constant 17 : index
    %c0_24 = arith.constant 0 : index
    %29 = vector.load %arg1[%c0_23, %c17, %c0_24] : memref<1x176x32xf32, #tpu.memory_space<vmem>>, vector<1x128x32xf32>
    %30 = vector.shape_cast %29 : vector<1x128x32xf32> to vector<128x32xf32>
    %31 = arith.truncf %30 : vector<128x32xf32> to vector<128x32xbf16>
    %c4 = arith.constant 4 : index
    %c0_25 = arith.constant 0 : index
    %c0_26 = arith.constant 0 : index
    %32 = vector.load %arg2[%c4, %c0_25, %c0_26] : memref<9x32x32xbf16, #tpu.memory_space<vmem>>, vector<1x32x32xbf16>
    %33 = vector.shape_cast %32 : vector<1x32x32xbf16> to vector<32x32xbf16>
    %cst_27 = arith.constant dense<0.000000e+00> : vector<128x32xf32>
    %34 = tpu.matmul %31, %33, %cst_27 {dimension_numbers = #tpu.dot_dimension_numbers<[1], [0], [0], [1], [0, 0, 1, 1], [], []>} : vector<128x32xbf16>, vector<32x32xbf16>, vector<128x32xf32> -> vector<128x32xf32>
    %35 = arith.addf %28, %34 : vector<128x32xf32>
    %c0_28 = arith.constant 0 : index
    %c18 = arith.constant 18 : index
    %c0_29 = arith.constant 0 : index
    %36 = vector.load %arg1[%c0_28, %c18, %c0_29] : memref<1x176x32xf32, #tpu.memory_space<vmem>>, vector<1x128x32xf32>
    %37 = vector.shape_cast %36 : vector<1x128x32xf32> to vector<128x32xf32>
    %38 = arith.truncf %37 : vector<128x32xf32> to vector<128x32xbf16>
    %c5 = arith.constant 5 : index
    %c0_30 = arith.constant 0 : index
    %c0_31 = arith.constant 0 : index
    %39 = vector.load %arg2[%c5, %c0_30, %c0_31] : memref<9x32x32xbf16, #tpu.memory_space<vmem>>, vector<1x32x32xbf16>
    %40 = vector.shape_cast %39 : vector<1x32x32xbf16> to vector<32x32xbf16>
    %cst_32 = arith.constant dense<0.000000e+00> : vector<128x32xf32>
    %41 = tpu.matmul %38, %40, %cst_32 {dimension_numbers = #tpu.dot_dimension_numbers<[1], [0], [0], [1], [0, 0, 1, 1], [], []>} : vector<128x32xbf16>, vector<32x32xbf16>, vector<128x32xf32> -> vector<128x32xf32>
    %42 = arith.addf %35, %41 : vector<128x32xf32>
    %c0_33 = arith.constant 0 : index
    %c32 = arith.constant 32 : index
    %c0_34 = arith.constant 0 : index
    %43 = vector.load %arg1[%c0_33, %c32, %c0_34] : memref<1x176x32xf32, #tpu.memory_space<vmem>>, vector<1x128x32xf32>
    %44 = vector.shape_cast %43 : vector<1x128x32xf32> to vector<128x32xf32>
    %45 = arith.truncf %44 : vector<128x32xf32> to vector<128x32xbf16>
    %c6 = arith.constant 6 : index
    %c0_35 = arith.constant 0 : index
    %c0_36 = arith.constant 0 : index
    %46 = vector.load %arg2[%c6, %c0_35, %c0_36] : memref<9x32x32xbf16, #tpu.memory_space<vmem>>, vector<1x32x32xbf16>
    %47 = vector.shape_cast %46 : vector<1x32x32xbf16> to vector<32x32xbf16>
    %cst_37 = arith.constant dense<0.000000e+00> : vector<128x32xf32>
    %48 = tpu.matmul %45, %47, %cst_37 {dimension_numbers = #tpu.dot_dimension_numbers<[1], [0], [0], [1], [0, 0, 1, 1], [], []>} : vector<128x32xbf16>, vector<32x32xbf16>, vector<128x32xf32> -> vector<128x32xf32>
    %49 = arith.addf %42, %48 : vector<128x32xf32>
    %c0_38 = arith.constant 0 : index
    %c33 = arith.constant 33 : index
    %c0_39 = arith.constant 0 : index
    %50 = vector.load %arg1[%c0_38, %c33, %c0_39] : memref<1x176x32xf32, #tpu.memory_space<vmem>>, vector<1x128x32xf32>
    %51 = vector.shape_cast %50 : vector<1x128x32xf32> to vector<128x32xf32>
    %52 = arith.truncf %51 : vector<128x32xf32> to vector<128x32xbf16>
    %c7 = arith.constant 7 : index
    %c0_40 = arith.constant 0 : index
    %c0_41 = arith.constant 0 : index
    %53 = vector.load %arg2[%c7, %c0_40, %c0_41] : memref<9x32x32xbf16, #tpu.memory_space<vmem>>, vector<1x32x32xbf16>
    %54 = vector.shape_cast %53 : vector<1x32x32xbf16> to vector<32x32xbf16>
    %cst_42 = arith.constant dense<0.000000e+00> : vector<128x32xf32>
    %55 = tpu.matmul %52, %54, %cst_42 {dimension_numbers = #tpu.dot_dimension_numbers<[1], [0], [0], [1], [0, 0, 1, 1], [], []>} : vector<128x32xbf16>, vector<32x32xbf16>, vector<128x32xf32> -> vector<128x32xf32>
    %56 = arith.addf %49, %55 : vector<128x32xf32>
    %c0_43 = arith.constant 0 : index
    %c34 = arith.constant 34 : index
    %c0_44 = arith.constant 0 : index
    %57 = vector.load %arg1[%c0_43, %c34, %c0_44] : memref<1x176x32xf32, #tpu.memory_space<vmem>>, vector<1x128x32xf32>
    %58 = vector.shape_cast %57 : vector<1x128x32xf32> to vector<128x32xf32>
    %59 = arith.truncf %58 : vector<128x32xf32> to vector<128x32xbf16>
    %c8 = arith.constant 8 : index
    %c0_45 = arith.constant 0 : index
    %c0_46 = arith.constant 0 : index
    %60 = vector.load %arg2[%c8, %c0_45, %c0_46] : memref<9x32x32xbf16, #tpu.memory_space<vmem>>, vector<1x32x32xbf16>
    %61 = vector.shape_cast %60 : vector<1x32x32xbf16> to vector<32x32xbf16>
    %cst_47 = arith.constant dense<0.000000e+00> : vector<128x32xf32>
    %62 = tpu.matmul %59, %61, %cst_47 {dimension_numbers = #tpu.dot_dimension_numbers<[1], [0], [0], [1], [0, 0, 1, 1], [], []>} : vector<128x32xbf16>, vector<32x32xbf16>, vector<128x32xf32> -> vector<128x32xf32>
    %63 = arith.addf %56, %62 : vector<128x32xf32>
    %c0_48 = arith.constant 0 : index
    %c0_49 = arith.constant 0 : index
    %64 = vector.load %arg3[%c0_48, %c0_49] : memref<1x32xf32, #tpu.memory_space<vmem>>, vector<1x32xf32>
    %65 = vector.broadcast %64 : vector<1x32xf32> to vector<128x32xf32>
    %66 = arith.addf %63, %65 : vector<128x32xf32>
    %cst_50 = arith.constant 0.000000e+00 : f32
    %67 = vector.broadcast %cst_50 : f32 to vector<128x32xf32>
    %68 = arith.maximumf %66, %67 : vector<128x32xf32>
    %c0_51 = arith.constant 0 : index
    %c0_52 = arith.constant 0 : index
    %c0_53 = arith.constant 0 : index
    %69 = vector.load %arg4[%c0_51, %c0_52, %c0_53] : memref<1x128x32xf32, #tpu.memory_space<vmem>>, vector<1x128x32xf32>
    %70 = vector.shape_cast %69 : vector<1x128x32xf32> to vector<128x32xf32>
    %71 = vector.shape_cast %68 : vector<128x32xf32> to vector<1x128x32xf32>
    tpu.vector_store %arg4[%c0_51, %c0_52, %c0_53], %71 {strides = array<i32>} : memref<1x128x32xf32, #tpu.memory_space<vmem>>, vector<1x128x32xf32>,
    return
  }
  func.func @transform_0(%arg0: i32) -> (i32, i32, i32) {
    %c0_i32 = arith.constant 0 : i32
    %c0_i32_0 = arith.constant 0 : i32
    %c0_i32_1 = arith.constant 0 : i32
    return %arg0, %c0_i32, %c0_i32_0 : i32, i32, i32
  }
  func.func @transform_1(%arg0: i32) -> (i32, i32, i32) {
    %c0_i32 = arith.constant 0 : i32
    %c0_i32_0 = arith.constant 0 : i32
    %c0_i32_1 = arith.constant 0 : i32
    %c0_i32_2 = arith.constant 0 : i32
    return %c0_i32, %c0_i32_0, %c0_i32_1 : i32, i32, i32
  }
  func.func @transform_2(%arg0: i32) -> (i32, i32) {
    %c0_i32 = arith.constant 0 : i32
    %c0_i32_0 = arith.constant 0 : i32
    %c0_i32_1 = arith.constant 0 : i32
    return %c0_i32, %c0_i32_0 : i32, i32
  }
  func.func @transform_3(%arg0: i32) -> (i32, i32, i32) {
    %c0_i32 = arith.constant 0 : i32
    %c0_i32_0 = arith.constant 0 : i32
    %c0_i32_1 = arith.constant 0 : i32
    return %arg0, %c0_i32, %c0_i32_0 : i32, i32, i32
  }
}

module attributes {stable_mosaic.version = 11 : i64} {
  func.func @_conv3x3_bn_relu_kernel(%arg0: i32, %arg1: memref<1x176x32xf32, #tpu.memory_space<vmem>>, %arg2: memref<9x32x48xbf16, #tpu.memory_space<vmem>>, %arg3: memref<1x48xf32, #tpu.memory_space<vmem>>, %arg4: memref<1x128x48xf32, #tpu.memory_space<vmem>>) attributes {dimension_semantics = [#tpu.dimension_semantics<parallel>], iteration_bounds = array<i64: 2>, scalar_prefetch = 0 : i64, scratch_operands = 0 : i64, tpu.core_type = #tpu.core_type<tc>, window_params = [{transform_indices = @transform_0, window_bounds = array<i64: 1, 176, 32>}, {pipeline_mode = #tpu.pipeline_mode<synchronous>, transform_indices = @transform_1, window_bounds = array<i64: 9, 32, 48>}, {pipeline_mode = #tpu.pipeline_mode<synchronous>, transform_indices = @transform_2, window_bounds = array<i64: 1, 48>}, {transform_indices = @transform_3, window_bounds = array<i64: 1, 128, 48>}]} {
    %cst = arith.constant 0.000000e+00 : f32
    %0 = vector.broadcast %cst : f32 to vector<128x48xf32>
    %c0 = arith.constant 0 : index
    %c0_0 = arith.constant 0 : index
    %c0_1 = arith.constant 0 : index
    %1 = vector.load %arg1[%c0, %c0_0, %c0_1] : memref<1x176x32xf32, #tpu.memory_space<vmem>>, vector<1x128x32xf32>
    %2 = vector.shape_cast %1 : vector<1x128x32xf32> to vector<128x32xf32>
    %3 = arith.truncf %2 : vector<128x32xf32> to vector<128x32xbf16>
    %c0_2 = arith.constant 0 : index
    %c0_3 = arith.constant 0 : index
    %c0_4 = arith.constant 0 : index
    %4 = vector.load %arg2[%c0_2, %c0_3, %c0_4] : memref<9x32x48xbf16, #tpu.memory_space<vmem>>, vector<1x32x48xbf16>
    %5 = vector.shape_cast %4 : vector<1x32x48xbf16> to vector<32x48xbf16>
    %cst_5 = arith.constant dense<0.000000e+00> : vector<128x48xf32>
    %6 = tpu.matmul %3, %5, %cst_5 {dimension_numbers = #tpu.dot_dimension_numbers<[1], [0], [0], [1], [0, 0, 1, 1], [], []>} : vector<128x32xbf16>, vector<32x48xbf16>, vector<128x48xf32> -> vector<128x48xf32>
    %7 = arith.addf %0, %6 : vector<128x48xf32>
    %c0_6 = arith.constant 0 : index
    %c1 = arith.constant 1 : index
    %c0_7 = arith.constant 0 : index
    %8 = vector.load %arg1[%c0_6, %c1, %c0_7] : memref<1x176x32xf32, #tpu.memory_space<vmem>>, vector<1x128x32xf32>
    %9 = vector.shape_cast %8 : vector<1x128x32xf32> to vector<128x32xf32>
    %10 = arith.truncf %9 : vector<128x32xf32> to vector<128x32xbf16>
    %c1_8 = arith.constant 1 : index
    %c0_9 = arith.constant 0 : index
    %c0_10 = arith.constant 0 : index
    %11 = vector.load %arg2[%c1_8, %c0_9, %c0_10] : memref<9x32x48xbf16, #tpu.memory_space<vmem>>, vector<1x32x48xbf16>
    %12 = vector.shape_cast %11 : vector<1x32x48xbf16> to vector<32x48xbf16>
    %cst_11 = arith.constant dense<0.000000e+00> : vector<128x48xf32>
    %13 = tpu.matmul %10, %12, %cst_11 {dimension_numbers = #tpu.dot_dimension_numbers<[1], [0], [0], [1], [0, 0, 1, 1], [], []>} : vector<128x32xbf16>, vector<32x48xbf16>, vector<128x48xf32> -> vector<128x48xf32>
    %14 = arith.addf %7, %13 : vector<128x48xf32>
    %c0_12 = arith.constant 0 : index
    %c2 = arith.constant 2 : index
    %c0_13 = arith.constant 0 : index
    %15 = vector.load %arg1[%c0_12, %c2, %c0_13] : memref<1x176x32xf32, #tpu.memory_space<vmem>>, vector<1x128x32xf32>
    %16 = vector.shape_cast %15 : vector<1x128x32xf32> to vector<128x32xf32>
    %17 = arith.truncf %16 : vector<128x32xf32> to vector<128x32xbf16>
    %c2_14 = arith.constant 2 : index
    %c0_15 = arith.constant 0 : index
    %c0_16 = arith.constant 0 : index
    %18 = vector.load %arg2[%c2_14, %c0_15, %c0_16] : memref<9x32x48xbf16, #tpu.memory_space<vmem>>, vector<1x32x48xbf16>
    %19 = vector.shape_cast %18 : vector<1x32x48xbf16> to vector<32x48xbf16>
    %cst_17 = arith.constant dense<0.000000e+00> : vector<128x48xf32>
    %20 = tpu.matmul %17, %19, %cst_17 {dimension_numbers = #tpu.dot_dimension_numbers<[1], [0], [0], [1], [0, 0, 1, 1], [], []>} : vector<128x32xbf16>, vector<32x48xbf16>, vector<128x48xf32> -> vector<128x48xf32>
    %21 = arith.addf %14, %20 : vector<128x48xf32>
    %c0_18 = arith.constant 0 : index
    %c16 = arith.constant 16 : index
    %c0_19 = arith.constant 0 : index
    %22 = vector.load %arg1[%c0_18, %c16, %c0_19] : memref<1x176x32xf32, #tpu.memory_space<vmem>>, vector<1x128x32xf32>
    %23 = vector.shape_cast %22 : vector<1x128x32xf32> to vector<128x32xf32>
    %24 = arith.truncf %23 : vector<128x32xf32> to vector<128x32xbf16>
    %c3 = arith.constant 3 : index
    %c0_20 = arith.constant 0 : index
    %c0_21 = arith.constant 0 : index
    %25 = vector.load %arg2[%c3, %c0_20, %c0_21] : memref<9x32x48xbf16, #tpu.memory_space<vmem>>, vector<1x32x48xbf16>
    %26 = vector.shape_cast %25 : vector<1x32x48xbf16> to vector<32x48xbf16>
    %cst_22 = arith.constant dense<0.000000e+00> : vector<128x48xf32>
    %27 = tpu.matmul %24, %26, %cst_22 {dimension_numbers = #tpu.dot_dimension_numbers<[1], [0], [0], [1], [0, 0, 1, 1], [], []>} : vector<128x32xbf16>, vector<32x48xbf16>, vector<128x48xf32> -> vector<128x48xf32>
    %28 = arith.addf %21, %27 : vector<128x48xf32>
    %c0_23 = arith.constant 0 : index
    %c17 = arith.constant 17 : index
    %c0_24 = arith.constant 0 : index
    %29 = vector.load %arg1[%c0_23, %c17, %c0_24] : memref<1x176x32xf32, #tpu.memory_space<vmem>>, vector<1x128x32xf32>
    %30 = vector.shape_cast %29 : vector<1x128x32xf32> to vector<128x32xf32>
    %31 = arith.truncf %30 : vector<128x32xf32> to vector<128x32xbf16>
    %c4 = arith.constant 4 : index
    %c0_25 = arith.constant 0 : index
    %c0_26 = arith.constant 0 : index
    %32 = vector.load %arg2[%c4, %c0_25, %c0_26] : memref<9x32x48xbf16, #tpu.memory_space<vmem>>, vector<1x32x48xbf16>
    %33 = vector.shape_cast %32 : vector<1x32x48xbf16> to vector<32x48xbf16>
    %cst_27 = arith.constant dense<0.000000e+00> : vector<128x48xf32>
    %34 = tpu.matmul %31, %33, %cst_27 {dimension_numbers = #tpu.dot_dimension_numbers<[1], [0], [0], [1], [0, 0, 1, 1], [], []>} : vector<128x32xbf16>, vector<32x48xbf16>, vector<128x48xf32> -> vector<128x48xf32>
    %35 = arith.addf %28, %34 : vector<128x48xf32>
    %c0_28 = arith.constant 0 : index
    %c18 = arith.constant 18 : index
    %c0_29 = arith.constant 0 : index
    %36 = vector.load %arg1[%c0_28, %c18, %c0_29] : memref<1x176x32xf32, #tpu.memory_space<vmem>>, vector<1x128x32xf32>
    %37 = vector.shape_cast %36 : vector<1x128x32xf32> to vector<128x32xf32>
    %38 = arith.truncf %37 : vector<128x32xf32> to vector<128x32xbf16>
    %c5 = arith.constant 5 : index
    %c0_30 = arith.constant 0 : index
    %c0_31 = arith.constant 0 : index
    %39 = vector.load %arg2[%c5, %c0_30, %c0_31] : memref<9x32x48xbf16, #tpu.memory_space<vmem>>, vector<1x32x48xbf16>
    %40 = vector.shape_cast %39 : vector<1x32x48xbf16> to vector<32x48xbf16>
    %cst_32 = arith.constant dense<0.000000e+00> : vector<128x48xf32>
    %41 = tpu.matmul %38, %40, %cst_32 {dimension_numbers = #tpu.dot_dimension_numbers<[1], [0], [0], [1], [0, 0, 1, 1], [], []>} : vector<128x32xbf16>, vector<32x48xbf16>, vector<128x48xf32> -> vector<128x48xf32>
    %42 = arith.addf %35, %41 : vector<128x48xf32>
    %c0_33 = arith.constant 0 : index
    %c32 = arith.constant 32 : index
    %c0_34 = arith.constant 0 : index
    %43 = vector.load %arg1[%c0_33, %c32, %c0_34] : memref<1x176x32xf32, #tpu.memory_space<vmem>>, vector<1x128x32xf32>
    %44 = vector.shape_cast %43 : vector<1x128x32xf32> to vector<128x32xf32>
    %45 = arith.truncf %44 : vector<128x32xf32> to vector<128x32xbf16>
    %c6 = arith.constant 6 : index
    %c0_35 = arith.constant 0 : index
    %c0_36 = arith.constant 0 : index
    %46 = vector.load %arg2[%c6, %c0_35, %c0_36] : memref<9x32x48xbf16, #tpu.memory_space<vmem>>, vector<1x32x48xbf16>
    %47 = vector.shape_cast %46 : vector<1x32x48xbf16> to vector<32x48xbf16>
    %cst_37 = arith.constant dense<0.000000e+00> : vector<128x48xf32>
    %48 = tpu.matmul %45, %47, %cst_37 {dimension_numbers = #tpu.dot_dimension_numbers<[1], [0], [0], [1], [0, 0, 1, 1], [], []>} : vector<128x32xbf16>, vector<32x48xbf16>, vector<128x48xf32> -> vector<128x48xf32>
    %49 = arith.addf %42, %48 : vector<128x48xf32>
    %c0_38 = arith.constant 0 : index
    %c33 = arith.constant 33 : index
    %c0_39 = arith.constant 0 : index
    %50 = vector.load %arg1[%c0_38, %c33, %c0_39] : memref<1x176x32xf32, #tpu.memory_space<vmem>>, vector<1x128x32xf32>
    %51 = vector.shape_cast %50 : vector<1x128x32xf32> to vector<128x32xf32>
    %52 = arith.truncf %51 : vector<128x32xf32> to vector<128x32xbf16>
    %c7 = arith.constant 7 : index
    %c0_40 = arith.constant 0 : index
    %c0_41 = arith.constant 0 : index
    %53 = vector.load %arg2[%c7, %c0_40, %c0_41] : memref<9x32x48xbf16, #tpu.memory_space<vmem>>, vector<1x32x48xbf16>
    %54 = vector.shape_cast %53 : vector<1x32x48xbf16> to vector<32x48xbf16>
    %cst_42 = arith.constant dense<0.000000e+00> : vector<128x48xf32>
    %55 = tpu.matmul %52, %54, %cst_42 {dimension_numbers = #tpu.dot_dimension_numbers<[1], [0], [0], [1], [0, 0, 1, 1], [], []>} : vector<128x32xbf16>, vector<32x48xbf16>, vector<128x48xf32> -> vector<128x48xf32>
    %56 = arith.addf %49, %55 : vector<128x48xf32>
    %c0_43 = arith.constant 0 : index
    %c34 = arith.constant 34 : index
    %c0_44 = arith.constant 0 : index
    %57 = vector.load %arg1[%c0_43, %c34, %c0_44] : memref<1x176x32xf32, #tpu.memory_space<vmem>>, vector<1x128x32xf32>
    %58 = vector.shape_cast %57 : vector<1x128x32xf32> to vector<128x32xf32>
    %59 = arith.truncf %58 : vector<128x32xf32> to vector<128x32xbf16>
    %c8 = arith.constant 8 : index
    %c0_45 = arith.constant 0 : index
    %c0_46 = arith.constant 0 : index
    %60 = vector.load %arg2[%c8, %c0_45, %c0_46] : memref<9x32x48xbf16, #tpu.memory_space<vmem>>, vector<1x32x48xbf16>
    %61 = vector.shape_cast %60 : vector<1x32x48xbf16> to vector<32x48xbf16>
    %cst_47 = arith.constant dense<0.000000e+00> : vector<128x48xf32>
    %62 = tpu.matmul %59, %61, %cst_47 {dimension_numbers = #tpu.dot_dimension_numbers<[1], [0], [0], [1], [0, 0, 1, 1], [], []>} : vector<128x32xbf16>, vector<32x48xbf16>, vector<128x48xf32> -> vector<128x48xf32>
    %63 = arith.addf %56, %62 : vector<128x48xf32>
    %c0_48 = arith.constant 0 : index
    %c0_49 = arith.constant 0 : index
    %64 = vector.load %arg3[%c0_48, %c0_49] : memref<1x48xf32, #tpu.memory_space<vmem>>, vector<1x48xf32>
    %65 = vector.broadcast %64 : vector<1x48xf32> to vector<128x48xf32>
    %66 = arith.addf %63, %65 : vector<128x48xf32>
    %cst_50 = arith.constant 0.000000e+00 : f32
    %67 = vector.broadcast %cst_50 : f32 to vector<128x48xf32>
    %68 = arith.maximumf %66, %67 : vector<128x48xf32>
    %c0_51 = arith.constant 0 : index
    %c0_52 = arith.constant 0 : index
    %c0_53 = arith.constant 0 : index
    %69 = vector.load %arg4[%c0_51, %c0_52, %c0_53] : memref<1x128x48xf32, #tpu.memory_space<vmem>>, vector<1x128x48xf32>
    %70 = vector.shape_cast %69 : vector<1x128x48xf32> to vector<128x48xf32>
    %71 = vector.shape_cast %68 : vector<128x48xf32> to vector<1x128x48xf32>
    tpu.vector_store %arg4[%c0_51, %c0_52, %c0_53], %71 {strides = array<i32>} : memref<1x128x48xf32, #tpu.memory_space<vmem>>, vector<1x128x48xf32>,
    return
  }
  func.func @transform_0(%arg0: i32) -> (i32, i32, i32) {
    %c0_i32 = arith.constant 0 : i32
    %c0_i32_0 = arith.constant 0 : i32
    %c0_i32_1 = arith.constant 0 : i32
    return %arg0, %c0_i32, %c0_i32_0 : i32, i32, i32
  }
  func.func @transform_1(%arg0: i32) -> (i32, i32, i32) {
    %c0_i32 = arith.constant 0 : i32
    %c0_i32_0 = arith.constant 0 : i32
    %c0_i32_1 = arith.constant 0 : i32
    %c0_i32_2 = arith.constant 0 : i32
    return %c0_i32, %c0_i32_0, %c0_i32_1 : i32, i32, i32
  }
  func.func @transform_2(%arg0: i32) -> (i32, i32) {
    %c0_i32 = arith.constant 0 : i32
    %c0_i32_0 = arith.constant 0 : i32
    %c0_i32_1 = arith.constant 0 : i32
    return %c0_i32, %c0_i32_0 : i32, i32
  }
  func.func @transform_3(%arg0: i32) -> (i32, i32, i32) {
    %c0_i32 = arith.constant 0 : i32
    %c0_i32_0 = arith.constant 0 : i32
    %c0_i32_1 = arith.constant 0 : i32
    return %arg0, %c0_i32, %c0_i32_0 : i32, i32, i32
  }
}

module attributes {stable_mosaic.version = 11 : i64} {
  func.func @_conv3x3_bn_relu_kernel(%arg0: i32, %arg1: memref<1x176x48xf32, #tpu.memory_space<vmem>>, %arg2: memref<9x48x64xbf16, #tpu.memory_space<vmem>>, %arg3: memref<1x64xf32, #tpu.memory_space<vmem>>, %arg4: memref<1x128x64xf32, #tpu.memory_space<vmem>>) attributes {dimension_semantics = [#tpu.dimension_semantics<parallel>], iteration_bounds = array<i64: 2>, scalar_prefetch = 0 : i64, scratch_operands = 0 : i64, tpu.core_type = #tpu.core_type<tc>, window_params = [{transform_indices = @transform_0, window_bounds = array<i64: 1, 176, 48>}, {pipeline_mode = #tpu.pipeline_mode<synchronous>, transform_indices = @transform_1, window_bounds = array<i64: 9, 48, 64>}, {pipeline_mode = #tpu.pipeline_mode<synchronous>, transform_indices = @transform_2, window_bounds = array<i64: 1, 64>}, {transform_indices = @transform_3, window_bounds = array<i64: 1, 128, 64>}]} {
    %cst = arith.constant 0.000000e+00 : f32
    %0 = vector.broadcast %cst : f32 to vector<128x64xf32>
    %c0 = arith.constant 0 : index
    %c0_0 = arith.constant 0 : index
    %c0_1 = arith.constant 0 : index
    %1 = vector.load %arg1[%c0, %c0_0, %c0_1] : memref<1x176x48xf32, #tpu.memory_space<vmem>>, vector<1x128x48xf32>
    %2 = vector.shape_cast %1 : vector<1x128x48xf32> to vector<128x48xf32>
    %3 = arith.truncf %2 : vector<128x48xf32> to vector<128x48xbf16>
    %c0_2 = arith.constant 0 : index
    %c0_3 = arith.constant 0 : index
    %c0_4 = arith.constant 0 : index
    %4 = vector.load %arg2[%c0_2, %c0_3, %c0_4] : memref<9x48x64xbf16, #tpu.memory_space<vmem>>, vector<1x48x64xbf16>
    %5 = vector.shape_cast %4 : vector<1x48x64xbf16> to vector<48x64xbf16>
    %cst_5 = arith.constant dense<0.000000e+00> : vector<128x64xf32>
    %6 = tpu.matmul %3, %5, %cst_5 {dimension_numbers = #tpu.dot_dimension_numbers<[1], [0], [0], [1], [0, 0, 1, 1], [], []>} : vector<128x48xbf16>, vector<48x64xbf16>, vector<128x64xf32> -> vector<128x64xf32>
    %7 = arith.addf %0, %6 : vector<128x64xf32>
    %c0_6 = arith.constant 0 : index
    %c1 = arith.constant 1 : index
    %c0_7 = arith.constant 0 : index
    %8 = vector.load %arg1[%c0_6, %c1, %c0_7] : memref<1x176x48xf32, #tpu.memory_space<vmem>>, vector<1x128x48xf32>
    %9 = vector.shape_cast %8 : vector<1x128x48xf32> to vector<128x48xf32>
    %10 = arith.truncf %9 : vector<128x48xf32> to vector<128x48xbf16>
    %c1_8 = arith.constant 1 : index
    %c0_9 = arith.constant 0 : index
    %c0_10 = arith.constant 0 : index
    %11 = vector.load %arg2[%c1_8, %c0_9, %c0_10] : memref<9x48x64xbf16, #tpu.memory_space<vmem>>, vector<1x48x64xbf16>
    %12 = vector.shape_cast %11 : vector<1x48x64xbf16> to vector<48x64xbf16>
    %cst_11 = arith.constant dense<0.000000e+00> : vector<128x64xf32>
    %13 = tpu.matmul %10, %12, %cst_11 {dimension_numbers = #tpu.dot_dimension_numbers<[1], [0], [0], [1], [0, 0, 1, 1], [], []>} : vector<128x48xbf16>, vector<48x64xbf16>, vector<128x64xf32> -> vector<128x64xf32>
    %14 = arith.addf %7, %13 : vector<128x64xf32>
    %c0_12 = arith.constant 0 : index
    %c2 = arith.constant 2 : index
    %c0_13 = arith.constant 0 : index
    %15 = vector.load %arg1[%c0_12, %c2, %c0_13] : memref<1x176x48xf32, #tpu.memory_space<vmem>>, vector<1x128x48xf32>
    %16 = vector.shape_cast %15 : vector<1x128x48xf32> to vector<128x48xf32>
    %17 = arith.truncf %16 : vector<128x48xf32> to vector<128x48xbf16>
    %c2_14 = arith.constant 2 : index
    %c0_15 = arith.constant 0 : index
    %c0_16 = arith.constant 0 : index
    %18 = vector.load %arg2[%c2_14, %c0_15, %c0_16] : memref<9x48x64xbf16, #tpu.memory_space<vmem>>, vector<1x48x64xbf16>
    %19 = vector.shape_cast %18 : vector<1x48x64xbf16> to vector<48x64xbf16>
    %cst_17 = arith.constant dense<0.000000e+00> : vector<128x64xf32>
    %20 = tpu.matmul %17, %19, %cst_17 {dimension_numbers = #tpu.dot_dimension_numbers<[1], [0], [0], [1], [0, 0, 1, 1], [], []>} : vector<128x48xbf16>, vector<48x64xbf16>, vector<128x64xf32> -> vector<128x64xf32>
    %21 = arith.addf %14, %20 : vector<128x64xf32>
    %c0_18 = arith.constant 0 : index
    %c16 = arith.constant 16 : index
    %c0_19 = arith.constant 0 : index
    %22 = vector.load %arg1[%c0_18, %c16, %c0_19] : memref<1x176x48xf32, #tpu.memory_space<vmem>>, vector<1x128x48xf32>
    %23 = vector.shape_cast %22 : vector<1x128x48xf32> to vector<128x48xf32>
    %24 = arith.truncf %23 : vector<128x48xf32> to vector<128x48xbf16>
    %c3 = arith.constant 3 : index
    %c0_20 = arith.constant 0 : index
    %c0_21 = arith.constant 0 : index
    %25 = vector.load %arg2[%c3, %c0_20, %c0_21] : memref<9x48x64xbf16, #tpu.memory_space<vmem>>, vector<1x48x64xbf16>
    %26 = vector.shape_cast %25 : vector<1x48x64xbf16> to vector<48x64xbf16>
    %cst_22 = arith.constant dense<0.000000e+00> : vector<128x64xf32>
    %27 = tpu.matmul %24, %26, %cst_22 {dimension_numbers = #tpu.dot_dimension_numbers<[1], [0], [0], [1], [0, 0, 1, 1], [], []>} : vector<128x48xbf16>, vector<48x64xbf16>, vector<128x64xf32> -> vector<128x64xf32>
    %28 = arith.addf %21, %27 : vector<128x64xf32>
    %c0_23 = arith.constant 0 : index
    %c17 = arith.constant 17 : index
    %c0_24 = arith.constant 0 : index
    %29 = vector.load %arg1[%c0_23, %c17, %c0_24] : memref<1x176x48xf32, #tpu.memory_space<vmem>>, vector<1x128x48xf32>
    %30 = vector.shape_cast %29 : vector<1x128x48xf32> to vector<128x48xf32>
    %31 = arith.truncf %30 : vector<128x48xf32> to vector<128x48xbf16>
    %c4 = arith.constant 4 : index
    %c0_25 = arith.constant 0 : index
    %c0_26 = arith.constant 0 : index
    %32 = vector.load %arg2[%c4, %c0_25, %c0_26] : memref<9x48x64xbf16, #tpu.memory_space<vmem>>, vector<1x48x64xbf16>
    %33 = vector.shape_cast %32 : vector<1x48x64xbf16> to vector<48x64xbf16>
    %cst_27 = arith.constant dense<0.000000e+00> : vector<128x64xf32>
    %34 = tpu.matmul %31, %33, %cst_27 {dimension_numbers = #tpu.dot_dimension_numbers<[1], [0], [0], [1], [0, 0, 1, 1], [], []>} : vector<128x48xbf16>, vector<48x64xbf16>, vector<128x64xf32> -> vector<128x64xf32>
    %35 = arith.addf %28, %34 : vector<128x64xf32>
    %c0_28 = arith.constant 0 : index
    %c18 = arith.constant 18 : index
    %c0_29 = arith.constant 0 : index
    %36 = vector.load %arg1[%c0_28, %c18, %c0_29] : memref<1x176x48xf32, #tpu.memory_space<vmem>>, vector<1x128x48xf32>
    %37 = vector.shape_cast %36 : vector<1x128x48xf32> to vector<128x48xf32>
    %38 = arith.truncf %37 : vector<128x48xf32> to vector<128x48xbf16>
    %c5 = arith.constant 5 : index
    %c0_30 = arith.constant 0 : index
    %c0_31 = arith.constant 0 : index
    %39 = vector.load %arg2[%c5, %c0_30, %c0_31] : memref<9x48x64xbf16, #tpu.memory_space<vmem>>, vector<1x48x64xbf16>
    %40 = vector.shape_cast %39 : vector<1x48x64xbf16> to vector<48x64xbf16>
    %cst_32 = arith.constant dense<0.000000e+00> : vector<128x64xf32>
    %41 = tpu.matmul %38, %40, %cst_32 {dimension_numbers = #tpu.dot_dimension_numbers<[1], [0], [0], [1], [0, 0, 1, 1], [], []>} : vector<128x48xbf16>, vector<48x64xbf16>, vector<128x64xf32> -> vector<128x64xf32>
    %42 = arith.addf %35, %41 : vector<128x64xf32>
    %c0_33 = arith.constant 0 : index
    %c32 = arith.constant 32 : index
    %c0_34 = arith.constant 0 : index
    %43 = vector.load %arg1[%c0_33, %c32, %c0_34] : memref<1x176x48xf32, #tpu.memory_space<vmem>>, vector<1x128x48xf32>
    %44 = vector.shape_cast %43 : vector<1x128x48xf32> to vector<128x48xf32>
    %45 = arith.truncf %44 : vector<128x48xf32> to vector<128x48xbf16>
    %c6 = arith.constant 6 : index
    %c0_35 = arith.constant 0 : index
    %c0_36 = arith.constant 0 : index
    %46 = vector.load %arg2[%c6, %c0_35, %c0_36] : memref<9x48x64xbf16, #tpu.memory_space<vmem>>, vector<1x48x64xbf16>
    %47 = vector.shape_cast %46 : vector<1x48x64xbf16> to vector<48x64xbf16>
    %cst_37 = arith.constant dense<0.000000e+00> : vector<128x64xf32>
    %48 = tpu.matmul %45, %47, %cst_37 {dimension_numbers = #tpu.dot_dimension_numbers<[1], [0], [0], [1], [0, 0, 1, 1], [], []>} : vector<128x48xbf16>, vector<48x64xbf16>, vector<128x64xf32> -> vector<128x64xf32>
    %49 = arith.addf %42, %48 : vector<128x64xf32>
    %c0_38 = arith.constant 0 : index
    %c33 = arith.constant 33 : index
    %c0_39 = arith.constant 0 : index
    %50 = vector.load %arg1[%c0_38, %c33, %c0_39] : memref<1x176x48xf32, #tpu.memory_space<vmem>>, vector<1x128x48xf32>
    %51 = vector.shape_cast %50 : vector<1x128x48xf32> to vector<128x48xf32>
    %52 = arith.truncf %51 : vector<128x48xf32> to vector<128x48xbf16>
    %c7 = arith.constant 7 : index
    %c0_40 = arith.constant 0 : index
    %c0_41 = arith.constant 0 : index
    %53 = vector.load %arg2[%c7, %c0_40, %c0_41] : memref<9x48x64xbf16, #tpu.memory_space<vmem>>, vector<1x48x64xbf16>
    %54 = vector.shape_cast %53 : vector<1x48x64xbf16> to vector<48x64xbf16>
    %cst_42 = arith.constant dense<0.000000e+00> : vector<128x64xf32>
    %55 = tpu.matmul %52, %54, %cst_42 {dimension_numbers = #tpu.dot_dimension_numbers<[1], [0], [0], [1], [0, 0, 1, 1], [], []>} : vector<128x48xbf16>, vector<48x64xbf16>, vector<128x64xf32> -> vector<128x64xf32>
    %56 = arith.addf %49, %55 : vector<128x64xf32>
    %c0_43 = arith.constant 0 : index
    %c34 = arith.constant 34 : index
    %c0_44 = arith.constant 0 : index
    %57 = vector.load %arg1[%c0_43, %c34, %c0_44] : memref<1x176x48xf32, #tpu.memory_space<vmem>>, vector<1x128x48xf32>
    %58 = vector.shape_cast %57 : vector<1x128x48xf32> to vector<128x48xf32>
    %59 = arith.truncf %58 : vector<128x48xf32> to vector<128x48xbf16>
    %c8 = arith.constant 8 : index
    %c0_45 = arith.constant 0 : index
    %c0_46 = arith.constant 0 : index
    %60 = vector.load %arg2[%c8, %c0_45, %c0_46] : memref<9x48x64xbf16, #tpu.memory_space<vmem>>, vector<1x48x64xbf16>
    %61 = vector.shape_cast %60 : vector<1x48x64xbf16> to vector<48x64xbf16>
    %cst_47 = arith.constant dense<0.000000e+00> : vector<128x64xf32>
    %62 = tpu.matmul %59, %61, %cst_47 {dimension_numbers = #tpu.dot_dimension_numbers<[1], [0], [0], [1], [0, 0, 1, 1], [], []>} : vector<128x48xbf16>, vector<48x64xbf16>, vector<128x64xf32> -> vector<128x64xf32>
    %63 = arith.addf %56, %62 : vector<128x64xf32>
    %c0_48 = arith.constant 0 : index
    %c0_49 = arith.constant 0 : index
    %64 = vector.load %arg3[%c0_48, %c0_49] : memref<1x64xf32, #tpu.memory_space<vmem>>, vector<1x64xf32>
    %65 = vector.broadcast %64 : vector<1x64xf32> to vector<128x64xf32>
    %66 = arith.addf %63, %65 : vector<128x64xf32>
    %cst_50 = arith.constant 0.000000e+00 : f32
    %67 = vector.broadcast %cst_50 : f32 to vector<128x64xf32>
    %68 = arith.maximumf %66, %67 : vector<128x64xf32>
    %c0_51 = arith.constant 0 : index
    %c0_52 = arith.constant 0 : index
    %c0_53 = arith.constant 0 : index
    %69 = vector.load %arg4[%c0_51, %c0_52, %c0_53] : memref<1x128x64xf32, #tpu.memory_space<vmem>>, vector<1x128x64xf32>
    %70 = vector.shape_cast %69 : vector<1x128x64xf32> to vector<128x64xf32>
    %71 = vector.shape_cast %68 : vector<128x64xf32> to vector<1x128x64xf32>
    tpu.vector_store %arg4[%c0_51, %c0_52, %c0_53], %71 {strides = array<i32>} : memref<1x128x64xf32, #tpu.memory_space<vmem>>, vector<1x128x64xf32>,
    return
  }
  func.func @transform_0(%arg0: i32) -> (i32, i32, i32) {
    %c0_i32 = arith.constant 0 : i32
    %c0_i32_0 = arith.constant 0 : i32
    %c0_i32_1 = arith.constant 0 : i32
    return %arg0, %c0_i32, %c0_i32_0 : i32, i32, i32
  }
  func.func @transform_1(%arg0: i32) -> (i32, i32, i32) {
    %c0_i32 = arith.constant 0 : i32
    %c0_i32_0 = arith.constant 0 : i32
    %c0_i32_1 = arith.constant 0 : i32
    %c0_i32_2 = arith.constant 0 : i32
    return %c0_i32, %c0_i32_0, %c0_i32_1 : i32, i32, i32
  }
  func.func @transform_2(%arg0: i32) -> (i32, i32) {
    %c0_i32 = arith.constant 0 : i32
    %c0_i32_0 = arith.constant 0 : i32
    %c0_i32_1 = arith.constant 0 : i32
    return %c0_i32, %c0_i32_0 : i32, i32
  }
  func.func @transform_3(%arg0: i32) -> (i32, i32, i32) {
    %c0_i32 = arith.constant 0 : i32
    %c0_i32_0 = arith.constant 0 : i32
    %c0_i32_1 = arith.constant 0 : i32
    return %arg0, %c0_i32, %c0_i32_0 : i32, i32, i32
  }
}

module attributes {stable_mosaic.version = 11 : i64} {
  func.func @_residual_out_kernel(%arg0: i32, %arg1: memref<64x32xf32, #tpu.memory_space<vmem>>, %arg2: memref<64x32xf32, #tpu.memory_space<vmem>>, %arg3: memref<64x64xf32, #tpu.memory_space<vmem>>, %arg4: memref<64x320xf32, #tpu.memory_space<vmem>>, %arg5: memref<32x320xbf16, #tpu.memory_space<vmem>>, %arg6: memref<32x320xbf16, #tpu.memory_space<vmem>>, %arg7: memref<64x320xbf16, #tpu.memory_space<vmem>>, %arg8: memref<1x320xf32, #tpu.memory_space<vmem>>, %arg9: memref<64x320xf32, #tpu.memory_space<vmem>>) attributes {dimension_semantics = [#tpu.dimension_semantics<parallel>], iteration_bounds = array<i64: 2>, scalar_prefetch = 0 : i64, scratch_operands = 0 : i64, tpu.core_type = #tpu.core_type<tc>, window_params = [{transform_indices = @transform_0, window_bounds = array<i64: 64, 32>}, {transform_indices = @transform_1, window_bounds = array<i64: 64, 32>}, {transform_indices = @transform_2, window_bounds = array<i64: 64, 64>}, {transform_indices = @transform_3, window_bounds = array<i64: 64, 320>}, {pipeline_mode = #tpu.pipeline_mode<synchronous>, transform_indices = @transform_4, window_bounds = array<i64: 32, 320>}, {pipeline_mode = #tpu.pipeline_mode<synchronous>, transform_indices = @transform_5, window_bounds = array<i64: 32, 320>}, {pipeline_mode = #tpu.pipeline_mode<synchronous>, transform_indices = @transform_6, window_bounds = array<i64: 64, 320>}, {pipeline_mode = #tpu.pipeline_mode<synchronous>, transform_indices = @transform_7, window_bounds = array<i64: 1, 320>}, {transform_indices = @transform_8, window_bounds = array<i64: 64, 320>}]} {
    %c0 = arith.constant 0 : index
    %c0_0 = arith.constant 0 : index
    %0 = vector.load %arg1[%c0, %c0_0] : memref<64x32xf32, #tpu.memory_space<vmem>>, vector<64x32xf32>
    %1 = arith.truncf %0 : vector<64x32xf32> to vector<64x32xbf16>
    %c0_1 = arith.constant 0 : index
    %c0_2 = arith.constant 0 : index
    %2 = vector.load %arg5[%c0_1, %c0_2] : memref<32x320xbf16, #tpu.memory_space<vmem>>, vector<32x320xbf16>
    %cst = arith.constant dense<0.000000e+00> : vector<64x320xf32>
    %3 = tpu.matmul %1, %2, %cst {dimension_numbers = #tpu.dot_dimension_numbers<[1], [0], [0], [1], [0, 0, 1, 1], [], []>} : vector<64x32xbf16>, vector<32x320xbf16>, vector<64x320xf32> -> vector<64x320xf32>
    %c0_3 = arith.constant 0 : index
    %c0_4 = arith.constant 0 : index
    %4 = vector.load %arg2[%c0_3, %c0_4] : memref<64x32xf32, #tpu.memory_space<vmem>>, vector<64x32xf32>
    %5 = arith.truncf %4 : vector<64x32xf32> to vector<64x32xbf16>
    %c0_5 = arith.constant 0 : index
    %c0_6 = arith.constant 0 : index
    %6 = vector.load %arg6[%c0_5, %c0_6] : memref<32x320xbf16, #tpu.memory_space<vmem>>, vector<32x320xbf16>
    %cst_7 = arith.constant dense<0.000000e+00> : vector<64x320xf32>
    %7 = tpu.matmul %5, %6, %cst_7 {dimension_numbers = #tpu.dot_dimension_numbers<[1], [0], [0], [1], [0, 0, 1, 1], [], []>} : vector<64x32xbf16>, vector<32x320xbf16>, vector<64x320xf32> -> vector<64x320xf32>
    %8 = arith.addf %3, %7 : vector<64x320xf32>
    %c0_8 = arith.constant 0 : index
    %c0_9 = arith.constant 0 : index
    %9 = vector.load %arg3[%c0_8, %c0_9] : memref<64x64xf32, #tpu.memory_space<vmem>>, vector<64x64xf32>
    %10 = arith.truncf %9 : vector<64x64xf32> to vector<64x64xbf16>
    %c0_10 = arith.constant 0 : index
    %c0_11 = arith.constant 0 : index
    %11 = vector.load %arg7[%c0_10, %c0_11] : memref<64x320xbf16, #tpu.memory_space<vmem>>, vector<64x320xbf16>
    %cst_12 = arith.constant dense<0.000000e+00> : vector<64x320xf32>
    %12 = tpu.matmul %10, %11, %cst_12 {dimension_numbers = #tpu.dot_dimension_numbers<[1], [0], [0], [1], [0, 0, 1, 1], [], []>} : vector<64x64xbf16>, vector<64x320xbf16>, vector<64x320xf32> -> vector<64x320xf32>
    %13 = arith.addf %8, %12 : vector<64x320xf32>
    %c0_13 = arith.constant 0 : index
    %c0_14 = arith.constant 0 : index
    %14 = vector.load %arg4[%c0_13, %c0_14] : memref<64x320xf32, #tpu.memory_space<vmem>>, vector<64x320xf32>
    %15 = arith.addf %14, %13 : vector<64x320xf32>
    %c0_15 = arith.constant 0 : index
    %c0_16 = arith.constant 0 : index
    %16 = vector.load %arg8[%c0_15, %c0_16] : memref<1x320xf32, #tpu.memory_space<vmem>>, vector<1x320xf32>
    %17 = vector.broadcast %16 : vector<1x320xf32> to vector<64x320xf32>
    %18 = arith.addf %15, %17 : vector<64x320xf32>
    %cst_17 = arith.constant 0.000000e+00 : f32
    %19 = vector.broadcast %cst_17 : f32 to vector<64x320xf32>
    %20 = arith.maximumf %18, %19 : vector<64x320xf32>
    %c0_18 = arith.constant 0 : index
    %c0_19 = arith.constant 0 : index
    %21 = vector.load %arg9[%c0_18, %c0_19] : memref<64x320xf32, #tpu.memory_space<vmem>>, vector<64x320xf32>
    tpu.vector_store %arg9[%c0_18, %c0_19], %20 {strides = array<i32>} : memref<64x320xf32, #tpu.memory_space<vmem>>, vector<64x320xf32>,
    return
  }
  func.func @transform_0(%arg0: i32) -> (i32, i32) {
    %c0_i32 = arith.constant 0 : i32
    %c0_i32_0 = arith.constant 0 : i32
    return %arg0, %c0_i32 : i32, i32
  }
  func.func @transform_1(%arg0: i32) -> (i32, i32) {
    %c0_i32 = arith.constant 0 : i32
    %c0_i32_0 = arith.constant 0 : i32
    return %arg0, %c0_i32 : i32, i32
  }
  func.func @transform_2(%arg0: i32) -> (i32, i32) {
    %c0_i32 = arith.constant 0 : i32
    %c0_i32_0 = arith.constant 0 : i32
    return %arg0, %c0_i32 : i32, i32
  }
  func.func @transform_3(%arg0: i32) -> (i32, i32) {
    %c0_i32 = arith.constant 0 : i32
    %c0_i32_0 = arith.constant 0 : i32
    return %arg0, %c0_i32 : i32, i32
  }
  func.func @transform_4(%arg0: i32) -> (i32, i32) {
    %c0_i32 = arith.constant 0 : i32
    %c0_i32_0 = arith.constant 0 : i32
    %c0_i32_1 = arith.constant 0 : i32
    return %c0_i32, %c0_i32_0 : i32, i32
  }
  func.func @transform_5(%arg0: i32) -> (i32, i32) {
    %c0_i32 = arith.constant 0 : i32
    %c0_i32_0 = arith.constant 0 : i32
    %c0_i32_1 = arith.constant 0 : i32
    return %c0_i32, %c0_i32_0 : i32, i32
  }
  func.func @transform_6(%arg0: i32) -> (i32, i32) {
    %c0_i32 = arith.constant 0 : i32
    %c0_i32_0 = arith.constant 0 : i32
    %c0_i32_1 = arith.constant 0 : i32
    return %c0_i32, %c0_i32_0 : i32, i32
  }
  func.func @transform_7(%arg0: i32) -> (i32, i32) {
    %c0_i32 = arith.constant 0 : i32
    %c0_i32_0 = arith.constant 0 : i32
    %c0_i32_1 = arith.constant 0 : i32
    return %c0_i32, %c0_i32_0 : i32, i32
  }
  func.func @transform_8(%arg0: i32) -> (i32, i32) {
    %c0_i32 = arith.constant 0 : i32
    %c0_i32_0 = arith.constant 0 : i32
    return %arg0, %c0_i32 : i32, i32
  }
}

</mosaic_0001>

<bundles_post_ra>
// kernel: inception_resnet_a_forward.5
= control target key start
LH: loop header
LB: loop body
LE: loop exit
PB: predicated region body
PF: predicated region fallthrough
CT: control target
= control target key end

     0   :  { %8 = vsyncpa [#allocation3], 0  ;;  %s1086_s0 = inlined_call_operand.hbm [shape: f32[128,320], index: 0, kind: input, shape index: {}]   ;;  %s1087_s1 = inlined_call_operand.hbm [shape: bf16[320,96], index: 1, kind: input, shape index: {}]   ;;  %s1088_s2 = inlined_call_operand.vmem [shape: f32[1,96], index: 2, kind: input, shape index: {}]   ;;  %s1089_s3 = inlined_call_operand.vmem [shape: f32[128,96], index: 3, kind: output, shape index: {}]  }
   0x1   :  { %10 = vsyncpa [#allocation3 + $0x1], 0 }
   0x2   :  { %11 = vsyncpa [#allocation5], 0  ;;  %s925_s12 = smov 0   ;;  %s927_s13 = smov 0  }
   0x3   :  { %s929_s14 = smov 0   ;;  %s931_s15 = smov 0  }
   0x4 LB: > { %s608_s16 = sadd.s32 4294967295, %s898_s15   ;;  %p37_p0 = scmp.ne.s32.totalorder %s890_s13, %s886_s12  ;;  %s898_s15 = sphi %s931_s15, %s1097_s15   ;;  %s894_s14 = sphi %s929_s14, %s1096_s14   ;;  %s890_s13 = sphi %s927_s13, %s1095_s13   ;;  %s886_s12 = sphi %s925_s12, %s1094_s12  }
   0x5   : > { %p947_p1 = scmp.eq.s32.totalorder %s608_s16, 0  ;;  %p610_p2 = scmp.ge.s32.totalorder %s898_s15, 1 }
   0x6   : > { %p116_p3 = scmp.lt.s32.totalorder %s898_s15, 3  ;;  %s127_s21 = sshll.u32 %s1087_s1, 4  ;;  %s128_s21 = int_to_ptr.hbm [resolvable:$true] %s127_s21 }
   0x7   : > { %p955_p4 = por %p947_p1, %p37_p0  ;;  %s900_s23 = smov [#allocation4]  }
   0x8   : > { %p962_p5 = pnand %p610_p2, %p116_p3  ;;  %s129_s24 = sshll.u32 %s900_s23, 4  ;;  %s130_s24 = int_to_ptr.vmem [resolvable:$true] %s129_s24 }
   0x9   : > { %s971_s25 = sadd.s32 1, %s898_s15   ;;  %s901_s26 = smov 64  }
   0xa   : > { %p751_p6 = pneg %p962_p5  ;;  %s902_s27 = smov 4  }
   0xb   : > { %s21_s28 = ssub.s32 %s898_s15, %s971_s25  ;;  %s24_s29 = sadd.s32 1, %s894_s14 }
   0xc   : > { %p752_p7 = pnand %p751_p6, %p947_p1  ;;  %p22_p8 = scmp.eq.s32.totalorder %s21_s28, 0 }
   0xd   : > { %p31_p9 = scmp.ne.s32.totalorder %s894_s14, %s890_s13  ;;  %p32_p10 = scmp.eq.s32.totalorder %s898_s15, 0 }
   0xe   : > { %754 = dma.hbm_to_vmem [thread:$0]  (!%p752_p7), %s128_s21, 2560, %s130_s24, [#allocation5], %s901_s26, %s901_s26, %s902_s27  }
   0xf   : > { %p760_p11 = scmp.lt.s32.totalorder %s898_s15, 2  ;;  %p33_p12 = por %p32_p10, %p31_p9 }
  0x10   : > { %s981_s30 = scalar_select %p22_p8, %s894_s14, %s24_s29  }
  0x11   : > { %s146_s4 = sand.u32 1, %s894_s14   ;;  %s743_s6 = smul.u32 192, %s898_s15 }
  0x12   : > { %s742_s5 = smul.u32 192, %s146_s4  ;;  %p985_p13 = pnand %p760_p11, %p33_p12 }
  0x13   : > { %s156_s10 = scalar_lea.hbm %s1086_s0, %s743_s6  ;;  %s147_s20 = scalar_lea.sflag [#allocation3], %s146_s4 }
  0x14   : > { %s150_s11 = scalar_lea.vmem [#allocation2], %s742_s5  ;;  %s157_s19 = sshll.u32 %s156_s10, 4  ;;  %s158_s19 = int_to_ptr.hbm [resolvable:$true] %s157_s19 }
  0x15   : > { %s159_s12 = sshll.u32 %s150_s11, 4  ;;  %s830_s21 = sshra.s32 %s158_s19, 4  ;;  %s160_s12 = int_to_ptr.vmem [resolvable:$true] %s159_s12  ;;  %s831_s21 = int_to_ptr.hbm [resolvable:$true] %s830_s21 }
  0x16   : > { %s832_s23 = scalar_lea.hbm %s831_s21, 192  ;;  %p834_p2 = pneg %p985_p13 }
  0x17   : > { %p833_p0 = scmp.ne.s32.totalorder %s831_s21, %s832_s23  ;;  %s837_s27 = scalar_lea.hbm %s1086_s0, 384 }
  0x18   : > { %p838_p7 = scmp.lt.s32.totalorder %s831_s21, %s1086_s0  ;;  %p839_p8 = scmp.lt.s32.totalorder %s837_s27, %s832_s23 }
  0x19   : > { %p835_p3 = pnand %p834_p2, %p833_p0 }
  0x1a   : > { %p840_p9 = por %p839_p8, %p838_p7 }
  0x1b   : > { %p836_p6 = pneg %p835_p3 }
  0x1d   : > { %p841_p10 = pnand %p840_p9, %p836_p6 }
  0x1f   : > { %844 = shalt.err (!%p841_p10)
}
  0x20   : > { %s903_s4 = smov 384   ;;  %s904_s5 = smov 24  }
  0x21   : > { %758 = dma.hbm_to_vmem [thread:$0]  (!%p985_p13), %s158_s19, 3072, %s160_s12, %s147_s20, %s903_s4, %s903_s4, %s904_s5  }
  0x22   : > { %171 = sbr.rel (%p962_p5) target bundleno = 255 (0xff), region = 32  ;;  %s173_s6 = sand.u32 (!%p962_p5), 1, %s890_s13  }
  0x23   : > { %s744_s8 = smul.u32 (!%p962_p5), 192, %s173_s6  ;;  %s174_s9 = scalar_lea.sflag (!%p962_p5), [#allocation3], %s173_s6 }
  0x25   : > { %s1005_s10 = scalar_lea.vmem (!%p962_p5), [#allocation2], %s744_s8 }
  0x27   : > { %877 = dma.done.wait (%p955_p4), %s174_s9, 3072  }
  0x28   : > { %879 = vsyncadd (%p955_p4), %s174_s9, 4294964224 }
  0x29   : > { %881 = dma.done.wait (%p947_p1), [#allocation5], 2560  }
  0x2a   : > { %883 = vsyncadd (%p947_p1), [#allocation5], 4294964736  ;;  %v713_v0 = vld [vmem:[#allocation4 + $0x38] sm:$0xff]  ;;  %v712_v3 = vld [vmem:[#allocation4 + $0x30] sm:$0xff]  ;;  %vm414_vm0 = vcmask 523264   ;;  %s618_s17 = sshll.u32 %s608_s16, 3 }
  0x2b   : > { %v1015_v1 = vld [vmem:[#allocation4 + $0x78] sm:$0xff]  ;;  %427 = vmatpush.bf16.msra.mxu0 %v713_v0  ;;  %726 = vmatpush.bf16.msra.mxu3 %v713_v0  ;;  %v720_v4 = vld [vmem:[#allocation4 + $0x70] sm:$0xff]  ;;  %v711_v6 = vld [vmem:[#allocation4 + $0x28] sm:$0xff]  ;;  %p208_p1 = scmp.lt.s32.totalorder %s618_s17, 15  ;;  %vm522_vm1 = vcmask 785408  }
  0x2c   : > { %v725_v2 = vld [vmem:[#allocation4 + $0x98] sm:$0xff]  ;;  %734 = vmatpush.bf16.msra.mxu1 %v1015_v1  ;;  %v724_v5 = vld [vmem:[#allocation4 + $0x90] sm:$0xff]  ;;  %v719_v7 = vld [vmem:[#allocation4 + $0x68] sm:$0xff] }
  0x2d   : > { %489 = vmatpush.bf16.msra.mxu2 %v725_v2  ;;  %v723_v8 = vld [vmem:[#allocation4 + $0x88] sm:$0xff]  ;;  %v710_v9 = vld [vmem:[#allocation4 + $0x20] sm:$0xff]  ;;  %v216_v12 = vld [vmem:[%s1005_s10 + $0x10] sm:$0xff]  ;;  %s1099_s17 = smov (!%p208_p1, %s618_s17), 15 }
  0x2e   : > { %v718_v10 = vld [vmem:[#allocation4 + $0x60] sm:$0xff]  ;;  %v219_v13 = vld [vmem:[%s1005_s10 + $0x28] sm:$0xff]  ;;  %v709_v15 = vld [vmem:[#allocation4 + $0x18] sm:$0xff]  ;;  %s619_s7 = sshll.u32 %s1099_s17, 3 }
  0x2f   : > { %428 = vmatpush.bf16.msra.mxu0 %v712_v3  ;;  %727 = vmatpush.bf16.msra.mxu3 %v712_v3  ;;  %v722_v11 = vld [vmem:[#allocation4 + $0x80] sm:$0xff]  ;;  %v240_v14 = vpack.c.bf16 %v219_v13, %v216_v12  ;;  %v717_v16 = vld [vmem:[#allocation4 + $0x58] sm:$0xff]  ;;  %v708_v17 = vld [vmem:[#allocation4 + $0x10] sm:$0xff]  ;;  %s1055_s15 = scalar_lea.vmem %s1089_s3, %s619_s7 }
  0x30   : > { %735 = vmatpush.bf16.msra.mxu1 %v720_v4  ;;  %v716_v18 = vld [vmem:[#allocation4 + $0x50] sm:$0xff]  ;;  %v707_v19 = vld [vmem:[#allocation4 + $0x8] sm:$0xff]  ;;  %v706_v21 = vld [vmem:[#allocation4] sm:$0xff] }
  0x31   : > { %490 = vmatpush.bf16.msra.mxu2 %v724_v5  ;;  %v715_v20 = vld [vmem:[#allocation4 + $0x48] sm:$0xff]  ;;  %v714_v22 = vld [vmem:[#allocation4 + $0x40] sm:$0xff]  ;;  %v220_v23 = vld [vmem:[%s1005_s10 + $0x30] sm:$0xff] }
  0x32   : > { %v214_v24 = vld [vmem:[%s1005_s10] sm:$0xff]  ;;  %v217_v25 = vld [vmem:[%s1005_s10 + $0x18] sm:$0xff]  ;;  %v223_v26 = vld [vmem:[%s1005_s10 + $0x48] sm:$0xff] }
  0x33   : > { %429 = vmatpush.bf16.msra.mxu0 %v711_v6  ;;  %728 = vmatpush.bf16.msra.mxu3 %v711_v6  ;;  %v221_v27 = vld [vmem:[%s1005_s10 + $0x38] sm:$0xff]  ;;  %v224_v28 = vld [vmem:[%s1005_s10 + $0x50] sm:$0xff]  ;;  %v222_v29 = vld [vmem:[%s1005_s10 + $0x40] sm:$0xff]  ;;  %v238_v31 = vpack.c.bf16 %v217_v25, %v214_v24  ;;  %v241_v32 = vpack.c.bf16 %v223_v26, %v220_v23 }
  0x34   : > { %736 = vmatpush.bf16.msra.mxu1 %v719_v7  ;;  %v225_v30 = vld [vmem:[%s1005_s10 + $0x58] sm:$0xff]  ;;  %v242_v33 = vpack.c.bf16 %v224_v28, %v221_v27  ;;  %v226_v35 = vld [vmem:[%s1005_s10 + $0x60] sm:$0xff]  ;;  %v227_v37 = vld [vmem:[%s1005_s10 + $0x68] sm:$0xff] }
  0x35   : > { %491 = vmatpush.bf16.msra.mxu2 %v723_v8  ;;  %v243_v34 = vpack.c.bf16 %v225_v30, %v222_v29  ;;  %v229_v36 = vld [vmem:[%s1005_s10 + $0x78] sm:$0xff]  ;;  %v230_v38 = vld [vmem:[%s1005_s10 + $0x80] sm:$0xff]  ;;  %v228_v39 = vld [vmem:[%s1005_s10 + $0x70] sm:$0xff] }
  0x36   : > { %v231_v40 = vld [vmem:[%s1005_s10 + $0x88] sm:$0xff]  ;;  %v244_v41 = vpack.c.bf16 %v229_v36, %v226_v35  ;;  %v245_v42 = vpack.c.bf16 %v230_v38, %v227_v37  ;;  %v218_v45 = vld [vmem:[%s1005_s10 + $0x20] sm:$0xff]  ;;  %v232_v46 = vld [vmem:[%s1005_s10 + $0x90] sm:$0xff] }
  0x37   : > { %430 = vmatpush.bf16.msra.mxu0 %v710_v9  ;;  %729 = vmatpush.bf16.msra.mxu3 %v710_v9  ;;  %v246_v43 = vpack.c.bf16 %v231_v40, %v228_v39  ;;  %v215_v44 = vld [vmem:[%s1005_s10 + $0x8] sm:$0xff]  ;;  %v233_v49 = vld [vmem:[%s1005_s10 + $0x98] sm:$0xff]  ;;  %v236_v50 = vld [vmem:[%s1005_s10 + $0xb0] sm:$0xff] }
  0x38   : > { %737 = vmatpush.bf16.msra.mxu1 %v718_v10  ;;  %v239_v47 = vpack.c.bf16 %v218_v45, %v215_v44  ;;  %v235_v48 = vld [vmem:[%s1005_s10 + $0xa8] sm:$0xff]  ;;  %v234_v51 = vld [vmem:[%s1005_s10 + $0xa0] sm:$0xff]  ;;  %v237_v52 = vld [vmem:[%s1005_s10 + $0xb8] sm:$0xff]  ;;  %v248_v54 = vpack.c.bf16 %v236_v50, %v233_v49 }
  0x39   : > { %492 = vmatpush.bf16.msra.mxu2 %v722_v11  ;;  %v247_v53 = vpack.c.bf16 %v235_v48, %v232_v46  ;;  %v249_v55 = vpack.c.bf16 %v237_v52, %v234_v51  ;;  %v799_v59 = vld [vmem:[%s1088_s2] ss:$0 sm:$0xff] }
  0x3b   : > { %431 = vmatpush.bf16.msra.mxu0 %v709_v15  ;;  %730 = vmatpush.bf16.msra.mxu3 %v709_v15 }
  0x3c   : > { %700 = vmatmul.msk.bf16.vlgmr.msra.gmra.mxu2 %vm414_vm0, %v240_v14  ;;  %738 = vmatpush.bf16.msra.mxu1 %v717_v16 }
  0x3f   : > { %432 = vmatpush.bf16.msra.mxu0 %v708_v17  ;;  %731 = vmatpush.bf16.msra.mxu3 %v708_v17 }
  0x40   : > { %739 = vmatpush.bf16.msra.mxu1 %v716_v18 }
  0x43   : > { %433 = vmatpush.bf16.msra.mxu0 %v707_v19  ;;  %732 = vmatpush.bf16.msra.mxu3 %v707_v19 }
  0x44   : > { %740 = vmatpush.bf16.msra.mxu1 %v715_v20 }
  0x47   : > { %434 = vmatpush.bf16.msra.mxu0 %v706_v21  ;;  %733 = vmatpush.bf16.msra.mxu3 %v706_v21 }
  0x48   : > { %741 = vmatpush.bf16.msra.mxu1 %v714_v22 }
  0x4a   : > { %435 = vmatmul.bf16.vlgmr.msra.gmra.mxu0 %v238_v31  ;;  %440 = vmatmul.bf16.vlgmr.msra.gmra.mxu3 %v241_v32 }
  0x4b   : > { %456 = vmatpush.bf16.msrb.mxu0 %v1015_v1  ;;  %469 = vmatmul.bf16.vlgmr.msra.gmra.mxu1 %v242_v33 }
  0x4c   : > { %701 = vmatmul.msk.bf16.gmra.mxu2 %vm414_vm0, %v243_v34 }
  0x4f   : > { %457 = vmatpush.bf16.msrb.mxu0 %v720_v4 }
  0x53   : > { %458 = vmatpush.bf16.msrb.mxu0 %v719_v7 }
  0x57   : > { %459 = vmatpush.bf16.msrb.mxu0 %v718_v10 }
  0x5a   : > { %445 = vmatmul.bf16.gmra.mxu3 %v244_v41 }
  0x5b   : > { %460 = vmatpush.bf16.msrb.mxu0 %v717_v16  ;;  %474 = vmatmul.bf16.gmra.mxu1 %v245_v42 }
  0x5c   : > { %702 = vmatmul.msk.bf16.gmra.mxu2 %vm414_vm0, %v246_v43 }
  0x5f   : > { %461 = vmatpush.bf16.msrb.mxu0 %v716_v18 }
  0x63   : > { %462 = vmatpush.bf16.msrb.mxu0 %v715_v20 }
  0x67   : > { %463 = vmatpush.bf16.msrb.mxu0 %v714_v22 }
  0x6a   : > { %464 = vmatmul.bf16.vlgmr.msrb.gmra.mxu0 %v239_v47  ;;  %450 = vmatmul.bf16.gmra.mxu3 %v247_v53 }
  0x6b   : > { %479 = vmatmul.bf16.gmra.mxu1 %v248_v54 }
  0x6c   : > { %703 = vmatmul.msk.bf16.gmra.mxu2 %vm414_vm0, %v249_v55 }
  0xbf   : > { %v494_v56 = vpop.f32.mrf.mxu2 }
  0xc7   : > { %v496_v57 = vpop.f32.mrf.mxu2  ;;  %v436_v1 = vpop.f32.mrf.mxu0 }
  0xc8   : > { %v470_v58 = vpop.f32.mrf.mxu1  ;;  %v437_v17 = vadd.f32 %v799_v59, %v436_v1 }
  0xcd   : > { %v441_v60 = vpop.f32.mrf.mxu3 }
  0xce   : > { %v442_v61 = vadd.f32 %v799_v59, %v441_v60 }
  0xcf   : > { %v499_v62 = vpop.f32.mrf.mxu2  ;;  %v438_v10 = vpop.f32.mrf.mxu0 }
  0xd0   : > { %v472_v63 = vpop.f32.mrf.mxu1  ;;  %v471_v0 = vadd.f32 %v470_v58, %v442_v61  ;;  %v439_v29 = vadd.f32 %v799_v59, %v438_v10 }
  0xd2   : > { %v500_v2 = vadd.f32 %v499_v62, %v471_v0 }
  0xd4   : > { %v516_v3 = vmax.f32 %v500_v2, 0.0 }
  0xd5   : > { %v443_v4 = vpop.f32.mrf.mxu3 }
  0xd6   : > { %525 = vst.msk [vmem:[%s1055_s15 + $0x10] sm:$0xff] %vm522_vm1, %v516_v3  ;;  %v444_v5 = vadd.f32 %v799_v59, %v443_v4 }
  0xd7   : > { %v501_v6 = vpop.f32.mrf.mxu2 }
  0xd8   : > { %v473_v7 = vadd.f32 %v472_v63, %v444_v5  ;;  %v475_v8 = vpop.f32.mrf.mxu1 }
  0xda   : > { %v502_v9 = vadd.f32 %v501_v6, %v473_v7 }
  0xdc   : > { %v517_v11 = vmax.f32 %v502_v9, 0.0 }
  0xdd   : > { %v446_v12 = vpop.f32.mrf.mxu3 }
  0xde   : > { %526 = vst.msk [vmem:[%s1055_s15 + $0x18] sm:$0xff] %vm522_vm1, %v517_v11  ;;  %v447_v13 = vadd.f32 %v799_v59, %v446_v12 }
  0xdf   : > { %v504_v14 = vpop.f32.mrf.mxu2 }
  0xe0   : > { %v476_v15 = vadd.f32 %v475_v8, %v447_v13  ;;  %v477_v18 = vpop.f32.mrf.mxu1 }
  0xe2   : > { %v505_v16 = vadd.f32 %v504_v14, %v476_v15 }
  0xe4   : > { %v518_v19 = vmax.f32 %v505_v16, 0.0 }
  0xe5   : > { %v448_v22 = vpop.f32.mrf.mxu3 }
  0xe6   : > { %527 = vst.msk [vmem:[%s1055_s15 + $0x20] sm:$0xff] %vm522_vm1, %v518_v19  ;;  %v449_v23 = vadd.f32 %v799_v59, %v448_v22 }
  0xe7   : > { %v465_v20 = vpop.f32.mrf.mxu0  ;;  %v506_v24 = vpop.f32.mrf.mxu2 }
  0xe8   : > { %v466_v21 = vadd.f32 %v465_v20, %v437_v17  ;;  %v478_v26 = vadd.f32 %v477_v18, %v449_v23  ;;  %v480_v32 = vpop.f32.mrf.mxu1 }
  0xea   : > { %v495_v25 = vadd.f32 %v494_v56, %v466_v21  ;;  %v507_v28 = vadd.f32 %v506_v24, %v478_v26 }
  0xec   : > { %v514_v27 = vmax.f32 %v495_v25, 0.0  ;;  %v519_v30 = vmax.f32 %v507_v28, 0.0 }
  0xed   : > { %v451_v34 = vpop.f32.mrf.mxu3 }
  0xee   : > { %523 = vst.msk [vmem:[%s1055_s15] sm:$0xff] %vm522_vm1, %v514_v27  ;;  %v452_v35 = vadd.f32 %v799_v59, %v451_v34 }
  0xef   : > { %v467_v31 = vpop.f32.mrf.mxu0  ;;  %528 = vst.msk [vmem:[%s1055_s15 + $0x28] sm:$0xff] %vm522_vm1, %v519_v30  ;;  %v509_v37 = vpop.f32.mrf.mxu2 }
  0xf0   : > { %v468_v33 = vadd.f32 %v467_v31, %v439_v29  ;;  %v481_v38 = vadd.f32 %v480_v32, %v452_v35  ;;  %v482_v44 = vpop.f32.mrf.mxu1 }
  0xf2   : > { %v497_v36 = vadd.f32 %v496_v57, %v468_v33  ;;  %v510_v40 = vadd.f32 %v509_v37, %v481_v38 }
  0xf4   : > { %v515_v39 = vmax.f32 %v497_v36, 0.0  ;;  %v520_v41 = vmax.f32 %v510_v40, 0.0 }
  0xf5   : > { %v453_v42 = vpop.f32.mrf.mxu3 }
  0xf6   : > { %524 = vst.msk [vmem:[%s1055_s15 + $0x8] sm:$0xff] %vm522_vm1, %v515_v39  ;;  %v454_v43 = vadd.f32 %v799_v59, %v453_v42 }
  0xf7   : > { %529 = vst.msk [vmem:[%s1055_s15 + $0x30] sm:$0xff] %vm522_vm1, %v520_v41  ;;  %v511_v46 = vpop.f32.mrf.mxu2 }
  0xf8   : > { %v483_v45 = vadd.f32 %v482_v44, %v454_v43 }
  0xfa   : > { %v512_v47 = vadd.f32 %v511_v46, %v483_v45 }
  0xfc   : > { %v521_v48 = vmax.f32 %v512_v47, 0.0 }
  0xfe   : > { %530 = vst.msk [vmem:[%s1055_s15 + $0x38] sm:$0xff] %vm522_vm1, %v521_v48 }
  0xff PF: > { %p14_p4 = scmp.ge.s32.totalorder %s971_s25, 4   ;;  %s1094_s12 = smov %s890_s13 }
 0x100   : > { %s1095_s13 = smov %s894_s14  ;;  %s1096_s14 = smov %s981_s30 }
 0x101   : > { %s1097_s15 = smov %s971_s25  ;;  %16 = sbr.rel (!%p14_p4) target bundleno = 4 (0x4), region = 76 }
 0x106   :  { %553 = vsyncpa [#allocation3], 1 }
 0x107   :  { %555 = vsyncpa [#allocation3 + $0x1], 1 }
 0x108   :  { %556 = vsyncpa [#allocation5], 1 }

// kernel: inception_resnet_a_forward.6
= control target key start
LH: loop header
LB: loop body
LE: loop exit
PB: predicated region body
PF: predicated region fallthrough
CT: control target
= control target key end

     0   :  { %s1666_s12 = smov 0   ;;  %s2116_s0 = inlined_call_operand.vmem [shape: f32[2,176,32], index: 0, kind: input, shape index: {}]   ;;  %s2117_s1 = inlined_call_operand.vmem [shape: bf16[9,32,32], index: 1, kind: input, shape index: {}]   ;;  %s2118_s2 = inlined_call_operand.vmem [shape: f32[1,32], index: 2, kind: input, shape index: {}]   ;;  %s2119_s3 = inlined_call_operand.vmem [shape: f32[2,128,32], index: 3, kind: output, shape index: {}]  }
   0x1 LB: > { %s1417_s13 = sadd.s32 4294967295, %s1644_s12   ;;  %p1421_p0 = scmp.ge.s32.totalorder %s1644_s12, 1  ;;  %s1644_s12 = sphi %s1666_s12, %s13_s12  }
   0x2   : > { %p137_p1 = scmp.lt.s32.totalorder %s1644_s12, 3 }
   0x4   : > { %p138_p2 = pnand %p1421_p0, %p137_p1 }
   0x5   : > { %p161_p3 = scmp.lt.s32.totalorder (!%p138_p2), %s1417_s13, 1 }
   0x6   : > { %141 = sbr.rel (%p138_p2) target bundleno = 443 (0x1bb), region = 32 }
   0xb   : > { %v1607_v0 = vld [vmem:[%s2117_s1 + $0x18] sm:$0xff]  ;;  %v1606_v1 = vld [vmem:[%s2117_s1 + $0x10] sm:$0xff]  ;;  %s2121_s13 = smov (!%p161_p3, %s1417_s13), 1  ;;  %v1609_v2 = vld [vmem:[%s2117_s1 + $0x28] sm:$0xff]  ;;  %vm241_vm0 = vcmask 261120  }
   0xc   : > { %1622 = vmatpush.bf16.msra.mxu1 %v1607_v0  ;;  %1623 = vmatpush.bf16.msra.mxu2 %v1607_v0  ;;  %s1628_s18 = smul.u32 176, %s2121_s13  ;;  %v1611_v3 = vld [vmem:[%s2117_s1 + $0x38] sm:$0xff]  ;;  %v1605_v4 = vld [vmem:[%s2117_s1 + $0x8] sm:$0xff]  ;;  %v1608_v6 = vld [vmem:[%s2117_s1 + $0x20] sm:$0xff]  ;;  %s1603_s4 = sshll.u32 %s2121_s13, 7 }
   0xd   : > { %1624 = vmatpush.bf16.msra.mxu3 %v1607_v0  ;;  %272 = vmatpush.bf16.msra.mxu0 %v1607_v0  ;;  %v1613_v5 = vld [vmem:[%s2117_s1 + $0x48] sm:$0xff]  ;;  %v1610_v10 = vld [vmem:[%s2117_s1 + $0x30] sm:$0xff]  ;;  %v1604_v19 = vld [vmem:[%s2117_s1] sm:$0xff]  ;;  %s2050_s7 = scalar_lea.vmem %s2119_s3, %s1603_s4 }
   0xe   : > { %s1698_s29 = scalar_lea.vmem %s2116_s0, %s1628_s18  ;;  %v1612_v21 = vld [vmem:[%s2117_s1 + $0x40] sm:$0xff]  ;;  %v1617_v22 = vld [vmem:[%s2117_s1 + $0x68] sm:$0xff]  ;;  %v1619_v23 = vld [vmem:[%s2117_s1 + $0x78] sm:$0xff] }
   0xf   : > { %v204_v7 = vld [vmem:[%s1698_s29 + $0x21] sm:$0xff]  ;;  %v205_v8 = vld [vmem:[%s1698_s29 + $0x29] sm:$0xff]  ;;  %v1615_v24 = vld [vmem:[%s2117_s1 + $0x58] sm:$0xff] }
  0x10   : > { %1625 = vmatpush.bf16.msra.mxu1 %v1606_v1  ;;  %1626 = vmatpush.bf16.msra.mxu2 %v1606_v1  ;;  %v208_v9 = vld [vmem:[%s1698_s29 + $0x41] sm:$0xff]  ;;  %v1709_v11 = vpack.c.bf16 %v205_v8, %v204_v7  ;;  %v209_v12 = vld [vmem:[%s1698_s29 + $0x49] sm:$0xff]  ;;  %v206_v26 = vld [vmem:[%s1698_s29 + $0x31] sm:$0xff] }
  0x11   : > { %1627 = vmatpush.bf16.msra.mxu3 %v1606_v1  ;;  %273 = vmatpush.bf16.msra.mxu0 %v1606_v1  ;;  %v212_v13 = vld [vmem:[%s1698_s29 + $0x61] sm:$0xff]  ;;  %v213_v14 = vld [vmem:[%s1698_s29 + $0x69] sm:$0xff]  ;;  %v1714_v15 = vpack.c.bf16 %v209_v12, %v208_v9  ;;  %v207_v27 = vld [vmem:[%s1698_s29 + $0x39] sm:$0xff] }
  0x12   : > { %v1716_v16 = vpack.c.bf16 %v213_v14, %v212_v13  ;;  %v200_v17 = vld [vmem:[%s1698_s29 + $0x1] sm:$0xff]  ;;  %v201_v18 = vld [vmem:[%s1698_s29 + $0x9] sm:$0xff]  ;;  %v210_v28 = vld [vmem:[%s1698_s29 + $0x51] sm:$0xff]  ;;  %v1753_v34 = vpack.c.bf16 %v207_v27, %v206_v26 }
  0x13   : > { %1439 = vmatmul.msk.bf16.vlgmr.msra.gmra.mxu1 %vm241_vm0, %v1709_v11  ;;  %v216_v20 = vpack.c.bf16 %v201_v18, %v200_v17  ;;  %1441 = vmatmul.msk.bf16.vlgmr.msra.gmra.mxu2 %vm241_vm0, %v1714_v15  ;;  %v1621_v25 = vld [vmem:[%s2117_s1 + $0x88] sm:$0xff]  ;;  %v211_v29 = vld [vmem:[%s1698_s29 + $0x59] sm:$0xff]  ;;  %v214_v30 = vld [vmem:[%s1698_s29 + $0x71] sm:$0xff] }
  0x14   : > { %471 = vmatpush.bf16.msrb.mxu2 %v1609_v2  ;;  %357 = vmatpush.bf16.msrb.mxu1 %v1605_v4  ;;  %v215_v31 = vld [vmem:[%s1698_s29 + $0x79] sm:$0xff]  ;;  %v202_v32 = vld [vmem:[%s1698_s29 + $0x11] sm:$0xff]  ;;  %v1755_v35 = vpack.c.bf16 %v211_v29, %v210_v28  ;;  %v173_v39 = vld [vmem:[%s1698_s29 + $0x8] sm:$0xff] }
  0x15   : > { %601 = vmatpush.bf16.msrb.mxu3 %v1611_v3  ;;  %731 = vmatpush.bf16.msrb.mxu0 %v1613_v5  ;;  %v203_v33 = vld [vmem:[%s1698_s29 + $0x19] sm:$0xff]  ;;  %v1757_v36 = vpack.c.bf16 %v215_v31, %v214_v30  ;;  %v400_v40 = vld [vmem:[%s1698_s29 + $0x2] sm:$0xff]  ;;  %v401_v41 = vld [vmem:[%s1698_s29 + $0xa] sm:$0xff] }
  0x16   : > { %1443 = vmatmul.msk.bf16.vlgmr.msra.gmra.mxu3 %vm241_vm0, %v1716_v16  ;;  %1437 = vmatmul.msk.bf16.vlgmr.msra.gmra.mxu0 %vm241_vm0, %v216_v20  ;;  %v217_v37 = vpack.c.bf16 %v203_v33, %v202_v32  ;;  %v172_v38 = vld [vmem:[%s1698_s29] sm:$0xff]  ;;  %v530_v42 = vld [vmem:[%s1698_s29 + $0x10] sm:$0xff]  ;;  %v531_v43 = vld [vmem:[%s1698_s29 + $0x18] sm:$0xff]  ;;  %v416_v45 = vpack.c.bf16 %v401_v41, %v400_v40 }
  0x17   : > { %v188_v44 = vpack.c.bf16 %v173_v39, %v172_v38  ;;  %v546_v46 = vpack.c.bf16 %v531_v43, %v530_v42  ;;  %v402_v47 = vld [vmem:[%s1698_s29 + $0x12] sm:$0xff]  ;;  %v403_v48 = vld [vmem:[%s1698_s29 + $0x1a] sm:$0xff]  ;;  %v533_v50 = vld [vmem:[%s1698_s29 + $0x28] sm:$0xff] }
  0x18   : > { %472 = vmatpush.bf16.msrb.mxu2 %v1608_v6  ;;  %358 = vmatpush.bf16.msrb.mxu1 %v1604_v19  ;;  %v532_v49 = vld [vmem:[%s1698_s29 + $0x20] sm:$0xff]  ;;  %v1780_v51 = vpack.c.bf16 %v403_v48, %v402_v47  ;;  %v405_v54 = vld [vmem:[%s1698_s29 + $0x2a] sm:$0xff]  ;;  %v535_v56 = vld [vmem:[%s1698_s29 + $0x38] sm:$0xff] }
  0x19   : > { %602 = vmatpush.bf16.msrb.mxu3 %v1610_v10  ;;  %732 = vmatpush.bf16.msrb.mxu0 %v1612_v21  ;;  %v1782_v52 = vpack.c.bf16 %v533_v50, %v532_v49  ;;  %v404_v53 = vld [vmem:[%s1698_s29 + $0x22] sm:$0xff]  ;;  %v534_v55 = vld [vmem:[%s1698_s29 + $0x30] sm:$0xff]  ;;  %v407_v0 = vld [vmem:[%s1698_s29 + $0x3a] sm:$0xff] }
  0x1a   : > { %v1795_v57 = vpack.c.bf16 %v405_v54, %v404_v53  ;;  %v1797_v58 = vpack.c.bf16 %v535_v56, %v534_v55  ;;  %v1616_v59 = vld [vmem:[%s2117_s1 + $0x60] sm:$0xff]  ;;  %v1618_v60 = vld [vmem:[%s2117_s1 + $0x70] sm:$0xff]  ;;  %v537_v2 = vld [vmem:[%s1698_s29 + $0x48] sm:$0xff] }
  0x1b   : > { %v1614_v61 = vld [vmem:[%s2117_s1 + $0x50] sm:$0xff]  ;;  %v1620_v62 = vld [vmem:[%s2117_s1 + $0x80] sm:$0xff]  ;;  %v539_v8 = vld [vmem:[%s1698_s29 + $0x58] sm:$0xff] }
  0x1c   : > { %991 = vmatpush.bf16.msra.mxu2 %v1617_v22  ;;  %861 = vmatpush.bf16.msra.mxu1 %v1615_v24  ;;  %v406_v63 = vld [vmem:[%s1698_s29 + $0x32] sm:$0xff]  ;;  %v536_v1 = vld [vmem:[%s1698_s29 + $0x40] sm:$0xff]  ;;  %v409_v6 = vld [vmem:[%s1698_s29 + $0x4a] sm:$0xff] }
  0x1d   : > { %1121 = vmatpush.bf16.msra.mxu3 %v1619_v23  ;;  %1251 = vmatpush.bf16.msra.mxu0 %v1621_v25  ;;  %v1823_v3 = vpack.c.bf16 %v407_v0, %v406_v63  ;;  %v1825_v4 = vpack.c.bf16 %v537_v2, %v536_v1  ;;  %v408_v5 = vld [vmem:[%s1698_s29 + $0x42] sm:$0xff]  ;;  %v538_v7 = vld [vmem:[%s1698_s29 + $0x50] sm:$0xff]  ;;  %v411_v13 = vld [vmem:[%s1698_s29 + $0x5a] sm:$0xff] }
  0x1e   : > { %v1839_v9 = vpack.c.bf16 %v409_v6, %v408_v5  ;;  %v1841_v10 = vpack.c.bf16 %v539_v8, %v538_v7  ;;  %v410_v12 = vld [vmem:[%s1698_s29 + $0x52] sm:$0xff]  ;;  %v540_v14 = vld [vmem:[%s1698_s29 + $0x60] sm:$0xff]  ;;  %v541_v17 = vld [vmem:[%s1698_s29 + $0x68] sm:$0xff] }
  0x1f   : > { %v1855_v18 = vpack.c.bf16 %v411_v13, %v410_v12  ;;  %v1857_v19 = vpack.c.bf16 %v541_v17, %v540_v14  ;;  %v412_v20 = vld [vmem:[%s1698_s29 + $0x62] sm:$0xff]  ;;  %v413_v21 = vld [vmem:[%s1698_s29 + $0x6a] sm:$0xff]  ;;  %v543_v23 = vld [vmem:[%s1698_s29 + $0x78] sm:$0xff] }
  0x20   : > { %992 = vmatpush.bf16.msra.mxu2 %v1616_v59  ;;  %862 = vmatpush.bf16.msra.mxu1 %v1614_v61  ;;  %v542_v22 = vld [vmem:[%s1698_s29 + $0x70] sm:$0xff]  ;;  %v1873_v25 = vpack.c.bf16 %v413_v21, %v412_v20  ;;  %v415_v33 = vld [vmem:[%s1698_s29 + $0x7a] sm:$0xff]  ;;  %v545_v38 = vld [vmem:[%s1698_s29 + $0x88] sm:$0xff] }
  0x21   : > { %1122 = vmatpush.bf16.msra.mxu3 %v1618_v60  ;;  %1252 = vmatpush.bf16.msra.mxu0 %v1620_v62  ;;  %v1875_v26 = vpack.c.bf16 %v543_v23, %v542_v22  ;;  %v414_v32 = vld [vmem:[%s1698_s29 + $0x72] sm:$0xff]  ;;  %v674_v39 = vld [vmem:[%s1698_s29 + $0x81] sm:$0xff]  ;;  %v675_v40 = vld [vmem:[%s1698_s29 + $0x89] sm:$0xff] }
  0x23   : > { %1440 = vmatmul.msk.bf16.gmra.mxu1 %vm241_vm0, %v1753_v34  ;;  %1442 = vmatmul.msk.bf16.gmra.mxu2 %vm241_vm0, %v1755_v35 }
  0x26   : > { %1444 = vmatmul.msk.bf16.gmra.mxu3 %vm241_vm0, %v1757_v36  ;;  %1438 = vmatmul.msk.bf16.gmra.mxu0 %vm241_vm0, %v217_v37 }
  0x33   : > { %1453 = vmatmul.msk.bf16.vlgmr.msrb.gmra.mxu1 %vm241_vm0, %v188_v44  ;;  %1473 = vmatmul.msk.bf16.vlgmr.msrb.gmra.mxu2 %vm241_vm0, %v416_v45  ;;  %v1903_v44 = vpack.c.bf16 %v415_v33, %v414_v32 }
  0x36   : > { %1493 = vmatmul.msk.bf16.vlgmr.msrb.gmra.mxu3 %vm241_vm0, %v546_v46  ;;  %1513 = vmatmul.msk.bf16.vlgmr.msrb.gmra.mxu0 %vm241_vm0, %v217_v37  ;;  %v544_v37 = vld [vmem:[%s1698_s29 + $0x80] sm:$0xff] }
  0x37   : > { %v1905_v45 = vpack.c.bf16 %v545_v38, %v544_v37 }
  0x43   : > { %1454 = vmatmul.msk.bf16.gmra.mxu1 %vm241_vm0, %v546_v46  ;;  %1474 = vmatmul.msk.bf16.gmra.mxu2 %vm241_vm0, %v1780_v51  ;;  %v1907_v46 = vpack.c.bf16 %v675_v40, %v674_v39 }
  0x46   : > { %1494 = vmatmul.msk.bf16.gmra.mxu3 %vm241_vm0, %v1782_v52  ;;  %1514 = vmatmul.msk.bf16.gmra.mxu0 %vm241_vm0, %v1709_v11 }
  0x53   : > { %1455 = vmatmul.msk.bf16.gmra.mxu1 %vm241_vm0, %v1782_v52  ;;  %1475 = vmatmul.msk.bf16.gmra.mxu2 %vm241_vm0, %v1795_v57 }
  0x56   : > { %1495 = vmatmul.msk.bf16.gmra.mxu3 %vm241_vm0, %v1797_v58  ;;  %1515 = vmatmul.msk.bf16.gmra.mxu0 %vm241_vm0, %v1753_v34 }
  0x63   : > { %1456 = vmatmul.msk.bf16.gmra.mxu1 %vm241_vm0, %v1797_v58  ;;  %1476 = vmatmul.msk.bf16.gmra.mxu2 %vm241_vm0, %v1823_v3 }
  0x66   : > { %1496 = vmatmul.msk.bf16.gmra.mxu3 %vm241_vm0, %v1825_v4  ;;  %1516 = vmatmul.msk.bf16.gmra.mxu0 %vm241_vm0, %v1714_v15 }
  0x73   : > { %1457 = vmatmul.msk.bf16.gmra.mxu1 %vm241_vm0, %v1825_v4  ;;  %1477 = vmatmul.msk.bf16.gmra.mxu2 %vm241_vm0, %v1839_v9 }
  0x76   : > { %1497 = vmatmul.msk.bf16.gmra.mxu3 %vm241_vm0, %v1841_v10  ;;  %1517 = vmatmul.msk.bf16.gmra.mxu0 %vm241_vm0, %v1755_v35 }
  0x83   : > { %1458 = vmatmul.msk.bf16.gmra.mxu1 %vm241_vm0, %v1841_v10  ;;  %1478 = vmatmul.msk.bf16.gmra.mxu2 %vm241_vm0, %v1855_v18 }
  0x86   : > { %1498 = vmatmul.msk.bf16.gmra.mxu3 %vm241_vm0, %v1857_v19  ;;  %1518 = vmatmul.msk.bf16.gmra.mxu0 %vm241_vm0, %v1716_v16 }
  0x90   : > { %v1871_v24 = vpop.f32.mrf.mxu1 }
  0x93   : > { %v275_v27 = vpop.f32.mrf.mxu0  ;;  %1459 = vmatmul.msk.bf16.gmra.mxu1 %vm241_vm0, %v1857_v19  ;;  %1479 = vmatmul.msk.bf16.gmra.mxu2 %vm241_vm0, %v1873_v25 }
  0x96   : > { %1499 = vmatmul.msk.bf16.gmra.mxu3 %vm241_vm0, %v1875_v26  ;;  %1519 = vmatmul.msk.bf16.gmra.mxu0 %vm241_vm0, %v1757_v36  ;;  %v1885_v28 = vpop.f32.mrf.mxu2 }
  0x98   : > { %v1889_v30 = vpop.f32.mrf.mxu1 }
  0x99   : > { %v1887_v29 = vpop.f32.mrf.mxu3 }
  0x9b   : > { %v277_v31 = vpop.f32.mrf.mxu0 }
  0x9e   : > { %v1897_v41 = vpop.f32.mrf.mxu2 }
  0xa0   : > { %v1901_v43 = vpop.f32.mrf.mxu1 }
  0xa1   : > { %v1899_v42 = vpop.f32.mrf.mxu3 }
  0xa3   : > { %v280_v47 = vpop.f32.mrf.mxu0  ;;  %1460 = vmatmul.msk.bf16.gmra.mxu1 %vm241_vm0, %v1875_v26  ;;  %1480 = vmatmul.msk.bf16.gmra.mxu2 %vm241_vm0, %v1903_v44 }
  0xa6   : > { %1500 = vmatmul.msk.bf16.gmra.mxu3 %vm241_vm0, %v1905_v45  ;;  %1520 = vmatmul.msk.bf16.gmra.mxu0 %vm241_vm0, %v1907_v46  ;;  %v1917_v48 = vpop.f32.mrf.mxu2 }
  0xa8   : > { %v1921_v50 = vpop.f32.mrf.mxu1 }
  0xa9   : > { %v1919_v49 = vpop.f32.mrf.mxu3 }
  0xab   : > { %v282_v53 = vpop.f32.mrf.mxu0 }
  0xae   : > { %v1923_v54 = vpop.f32.mrf.mxu2 }
  0xb0   : > { %v360_v56 = vpop.f32.mrf.mxu1 }
  0xb1   : > { %v1925_v55 = vpop.f32.mrf.mxu3  ;;  %v361_v59 = vadd.f32 %v360_v56, %v275_v27 }
  0xb3   : > { %v734_v60 = vpop.f32.mrf.mxu0  ;;  %1533 = vmatmul.msk.bf16.vlgmr.msra.gmra.mxu1 %vm241_vm0, %v1780_v51  ;;  %1553 = vmatmul.msk.bf16.vlgmr.msra.gmra.mxu2 %vm241_vm0, %v1782_v52 }
  0xb6   : > { %1573 = vmatmul.msk.bf16.vlgmr.msra.gmra.mxu3 %vm241_vm0, %v1709_v11  ;;  %1593 = vmatmul.msk.bf16.vlgmr.msra.gmra.mxu0 %vm241_vm0, %v1795_v57  ;;  %v474_v61 = vpop.f32.mrf.mxu2 }
  0xb7   : > { %v514_v63 = vadd.f32 %v474_v61, %v361_v59 }
  0xb8   : > { %v362_v0 = vpop.f32.mrf.mxu1 }
  0xb9   : > { %v604_v62 = vpop.f32.mrf.mxu3  ;;  %v363_v1 = vadd.f32 %v362_v0, %v277_v31 }
  0xba   : > { %v644_v2 = vadd.f32 %v604_v62, %v514_v63 }
  0xbb   : > { %v736_v5 = vpop.f32.mrf.mxu0 }
  0xbc   : > { %v1935_v6 = vadd.f32 %v734_v60, %v644_v2 }
  0xbe   : > { %v476_v7 = vpop.f32.mrf.mxu2 }
  0xbf   : > { %v515_v8 = vadd.f32 %v476_v7, %v363_v1 }
  0xc0   : > { %v365_v12 = vpop.f32.mrf.mxu1 }
  0xc1   : > { %v606_v51 = vpop.f32.mrf.mxu3  ;;  %v366_v52 = vadd.f32 %v365_v12, %v280_v47 }
  0xc2   : > { %v645_v13 = vadd.f32 %v606_v51, %v515_v8 }
  0xc3   : > { %v739_v14 = vpop.f32.mrf.mxu0  ;;  %1534 = vmatmul.msk.bf16.gmra.mxu1 %vm241_vm0, %v1795_v57  ;;  %1554 = vmatmul.msk.bf16.gmra.mxu2 %vm241_vm0, %v1797_v58 }
  0xc4   : > { %v1943_v11 = vadd.f32 %v736_v5, %v645_v13 }
  0xc6   : > { %1574 = vmatmul.msk.bf16.gmra.mxu3 %vm241_vm0, %v1753_v34  ;;  %1594 = vmatmul.msk.bf16.gmra.mxu0 %vm241_vm0, %v1823_v3  ;;  %v479_v17 = vpop.f32.mrf.mxu2 }
  0xc7   : > { %v516_v21 = vadd.f32 %v479_v17, %v366_v52 }
  0xc8   : > { %v367_v22 = vpop.f32.mrf.mxu1 }
  0xc9   : > { %v609_v20 = vpop.f32.mrf.mxu3  ;;  %v368_v23 = vadd.f32 %v367_v22, %v282_v53 }
  0xca   : > { %v646_v27 = vadd.f32 %v609_v20, %v516_v21 }
  0xcb   : > { %v741_v31 = vpop.f32.mrf.mxu0 }
  0xcc   : > { %v1947_v32 = vadd.f32 %v739_v14, %v646_v27 }
  0xce   : > { %v481_v57 = vpop.f32.mrf.mxu2 }
  0xcf   : > { %v517_v58 = vadd.f32 %v481_v57, %v368_v23 }
  0xd0   : > { %v370_v37 = vpop.f32.mrf.mxu1 }
  0xd1   : > { %v611_v33 = vpop.f32.mrf.mxu3  ;;  %v371_v34 = vadd.f32 %v370_v37, %v1871_v24 }
  0xd2   : > { %v647_v38 = vadd.f32 %v611_v33, %v517_v58 }
  0xd3   : > { %v744_v39 = vpop.f32.mrf.mxu0  ;;  %1535 = vmatmul.msk.bf16.gmra.mxu1 %vm241_vm0, %v1823_v3  ;;  %1555 = vmatmul.msk.bf16.gmra.mxu2 %vm241_vm0, %v1825_v4 }
  0xd4   : > { %v1956_v40 = vadd.f32 %v741_v31, %v647_v38 }
  0xd6   : > { %1575 = vmatmul.msk.bf16.gmra.mxu3 %vm241_vm0, %v1714_v15  ;;  %1595 = vmatmul.msk.bf16.gmra.mxu0 %vm241_vm0, %v1839_v9  ;;  %v484_v47 = vpop.f32.mrf.mxu2 }
  0xd7   : > { %v518_v56 = vadd.f32 %v484_v47, %v371_v34 }
  0xd8   : > { %v372_v24 = vpop.f32.mrf.mxu1 }
  0xd9   : > { %v614_v53 = vpop.f32.mrf.mxu3  ;;  %v373_v59 = vadd.f32 %v372_v24, %v1889_v30 }
  0xda   : > { %v648_v60 = vadd.f32 %v614_v53, %v518_v56 }
  0xdb   : > { %v746_v61 = vpop.f32.mrf.mxu0 }
  0xdc   : > { %v1961_v3 = vadd.f32 %v744_v39, %v648_v60 }
  0xde   : > { %v486_v62 = vpop.f32.mrf.mxu2 }
  0xdf   : > { %v519_v63 = vadd.f32 %v486_v62, %v373_v59  ;;  %v1193_v62 = vld [vmem:[%s1698_s29 + $0x8a] sm:$0xff] }
  0xe0   : > { %v375_v0 = vpop.f32.mrf.mxu1 }
  0xe1   : > { %v616_v4 = vpop.f32.mrf.mxu3  ;;  %v376_v15 = vadd.f32 %v375_v0, %v1901_v43 }
  0xe2   : > { %v649_v1 = vadd.f32 %v616_v4, %v519_v63 }
  0xe3   : > { %v749_v2 = vpop.f32.mrf.mxu0  ;;  %1536 = vmatmul.msk.bf16.gmra.mxu1 %vm241_vm0, %v1839_v9  ;;  %1556 = vmatmul.msk.bf16.gmra.mxu2 %vm241_vm0, %v1841_v10 }
  0xe4   : > { %v1970_v30 = vadd.f32 %v746_v61, %v649_v1  ;;  %v1192_v61 = vld [vmem:[%s1698_s29 + $0x82] sm:$0xff] }
  0xe6   : > { %1576 = vmatmul.msk.bf16.gmra.mxu3 %vm241_vm0, %v1755_v35  ;;  %1596 = vmatmul.msk.bf16.gmra.mxu0 %vm241_vm0, %v1855_v18  ;;  %v489_v5 = vpop.f32.mrf.mxu2 }
  0xe7   : > { %v520_v51 = vadd.f32 %v489_v5, %v376_v15  ;;  %v1202_v15 = vpack.c.bf16 %v1193_v62, %v1192_v61 }
  0xe8   : > { %v377_v43 = vpop.f32.mrf.mxu1 }
  0xe9   : > { %v619_v7 = vpop.f32.mrf.mxu3  ;;  %v378_v8 = vadd.f32 %v377_v43, %v1921_v50 }
  0xea   : > { %v650_v12 = vadd.f32 %v619_v7, %v520_v51 }
  0xeb   : > { %v751_v52 = vpop.f32.mrf.mxu0 }
  0xec   : > { %v1975_v9 = vadd.f32 %v749_v2, %v650_v12  ;;  %v934_v12 = vld [vmem:[%s1698_s29 + $0x90] sm:$0xff] }
  0xee   : > { %v491_v13 = vpop.f32.mrf.mxu2 }
  0xef   : > { %v521_v14 = vadd.f32 %v491_v13, %v378_v8  ;;  %v1064_v13 = vld [vmem:[%s1698_s29 + $0x91] sm:$0xff] }
  0xf0   : > { %v380_v17 = vpop.f32.mrf.mxu1 }
  0xf1   : > { %v621_v10 = vpop.f32.mrf.mxu3  ;;  %v381_v21 = vadd.f32 %v380_v17, %v1885_v28  ;;  %v1195_v17 = vld [vmem:[%s1698_s29 + $0x9a] sm:$0xff] }
  0xf2   : > { %v651_v35 = vadd.f32 %v621_v10, %v521_v14  ;;  %v1194_v14 = vld [vmem:[%s1698_s29 + $0x92] sm:$0xff] }
  0xf3   : > { %v754_v20 = vpop.f32.mrf.mxu0  ;;  %1537 = vmatmul.msk.bf16.gmra.mxu1 %vm241_vm0, %v1855_v18  ;;  %1557 = vmatmul.msk.bf16.gmra.mxu2 %vm241_vm0, %v1857_v19 }
  0xf4   : > { %v1983_v50 = vadd.f32 %v751_v52, %v651_v35 }
  0xf6   : > { %1577 = vmatmul.msk.bf16.gmra.mxu3 %vm241_vm0, %v1716_v16  ;;  %1597 = vmatmul.msk.bf16.gmra.mxu0 %vm241_vm0, %v1873_v25  ;;  %v494_v22 = vpop.f32.mrf.mxu2 }
  0xf7   : > { %v522_v27 = vadd.f32 %v494_v22, %v381_v21 }
  0xf8   : > { %v382_v31 = vpop.f32.mrf.mxu1 }
  0xf9   : > { %v624_v23 = vpop.f32.mrf.mxu3  ;;  %v383_v19 = vadd.f32 %v382_v31, %v1897_v41 }
  0xfa   : > { %v652_v57 = vadd.f32 %v624_v23, %v522_v27  ;;  %v1203_v27 = vpack.c.bf16 %v1195_v17, %v1194_v14 }
  0xfb   : > { %v756_v33 = vpop.f32.mrf.mxu0 }
  0xfc   : > { %v1988_v18 = vadd.f32 %v754_v20, %v652_v57 }
  0xfe   : > { %v496_v58 = vpop.f32.mrf.mxu2 }
  0xff   : > { %v523_v16 = vadd.f32 %v496_v58, %v383_v19 }
 0x100   : > { %v385_v34 = vpop.f32.mrf.mxu1 }
 0x101   : > { %v626_v37 = vpop.f32.mrf.mxu3  ;;  %v386_v41 = vadd.f32 %v385_v34, %v1917_v48 }
 0x102   : > { %v653_v38 = vadd.f32 %v626_v37, %v523_v16 }
 0x103   : > { %v759_v39 = vpop.f32.mrf.mxu0  ;;  %1538 = vmatmul.msk.bf16.gmra.mxu1 %vm241_vm0, %v1873_v25  ;;  %1558 = vmatmul.msk.bf16.gmra.mxu2 %vm241_vm0, %v1875_v26 }
 0x104   : > { %v1997_v28 = vadd.f32 %v756_v33, %v653_v38 }
 0x106   : > { %1578 = vmatmul.msk.bf16.gmra.mxu3 %vm241_vm0, %v1757_v36  ;;  %1598 = vmatmul.msk.bf16.gmra.mxu0 %vm241_vm0, %v1903_v44  ;;  %v499_v47 = vpop.f32.mrf.mxu2 }
 0x107   : > { %v524_v56 = vadd.f32 %v499_v47, %v386_v41 }
 0x108   : > { %v387_v24 = vpop.f32.mrf.mxu1 }
 0x109   : > { %v629_v53 = vpop.f32.mrf.mxu3  ;;  %v388_v26 = vadd.f32 %v387_v24, %v1923_v54 }
 0x10a   : > { %v654_v59 = vadd.f32 %v629_v53, %v524_v56 }
 0x10b   : > { %v761_v60 = vpop.f32.mrf.mxu0 }
 0x10c   : > { %v2002_v25 = vadd.f32 %v759_v39, %v654_v59 }
 0x10e   : > { %v501_v36 = vpop.f32.mrf.mxu2 }
 0x10f   : > { %v525_v63 = vadd.f32 %v501_v36, %v388_v26 }
 0x110   : > { %v390_v0 = vpop.f32.mrf.mxu1 }
 0x111   : > { %v631_v4 = vpop.f32.mrf.mxu3  ;;  %v391_v2 = vadd.f32 %v390_v0, %v1887_v29 }
 0x112   : > { %v655_v1 = vadd.f32 %v631_v4, %v525_v63 }
 0x113   : > { %v764_v48 = vpop.f32.mrf.mxu0  ;;  %1539 = vmatmul.msk.bf16.gmra.mxu1 %vm241_vm0, %v1903_v44  ;;  %1559 = vmatmul.msk.bf16.gmra.mxu2 %vm241_vm0, %v1905_v45  ;;  %v935_v45 = vld [vmem:[%s1698_s29 + $0x98] sm:$0xff] }
 0x114   : > { %v2013_v54 = vadd.f32 %v761_v60, %v655_v1  ;;  %v943_v22 = vpack.c.bf16 %v935_v45, %v934_v12 }
 0x116   : > { %1579 = vmatmul.msk.bf16.gmra.mxu3 %vm241_vm0, %v1907_v46  ;;  %1599 = vmatmul.msk.bf16.gmra.mxu0 %vm241_vm0, %v1202_v15  ;;  %v504_v5 = vpop.f32.mrf.mxu2  ;;  %v1065_v46 = vld [vmem:[%s1698_s29 + $0x99] sm:$0xff] }
 0x117   : > { %v526_v51 = vadd.f32 %v504_v5, %v391_v2  ;;  %v1073_v23 = vpack.c.bf16 %v1065_v46, %v1064_v13 }
 0x118   : > { %v392_v43 = vpop.f32.mrf.mxu1 }
 0x119   : > { %v634_v7 = vpop.f32.mrf.mxu3  ;;  %v393_v10 = vadd.f32 %v392_v43, %v1899_v42 }
 0x11a   : > { %v656_v44 = vadd.f32 %v634_v7, %v526_v51 }
 0x11b   : > { %v766_v8 = vpop.f32.mrf.mxu0 }
 0x11c   : > { %v2018_v52 = vadd.f32 %v764_v48, %v656_v44 }
 0x11e   : > { %v506_v35 = vpop.f32.mrf.mxu2 }
 0x11f   : > { %v527_v21 = vadd.f32 %v506_v35, %v393_v10 }
 0x120   : > { %v395_v29 = vpop.f32.mrf.mxu1 }
 0x121   : > { %v636_v20 = vpop.f32.mrf.mxu3  ;;  %v396_v42 = vadd.f32 %v395_v29, %v1919_v49 }
 0x122   : > { %v657_v31 = vadd.f32 %v636_v20, %v527_v21 }
 0x123   : > { %v769_v57 = vpop.f32.mrf.mxu0  ;;  %1540 = vmatmul.msk.bf16.gmra.mxu1 %vm241_vm0, %v1202_v15  ;;  %1560 = vmatmul.msk.bf16.gmra.mxu2 %vm241_vm0, %v943_v22 }
 0x124   : > { %v2029_v33 = vadd.f32 %v766_v8, %v657_v31 }
 0x126   : > { %1580 = vmatmul.msk.bf16.gmra.mxu3 %vm241_vm0, %v1073_v23  ;;  %1600 = vmatmul.msk.bf16.gmra.mxu0 %vm241_vm0, %v1203_v27  ;;  %v509_v19 = vpop.f32.mrf.mxu2 }
 0x127   : > { %v528_v37 = vadd.f32 %v509_v19, %v396_v42 }
 0x128   : > { %v397_v16 = vpop.f32.mrf.mxu1 }
 0x129   : > { %v639_v58 = vpop.f32.mrf.mxu3  ;;  %v398_v41 = vadd.f32 %v397_v16, %v1925_v55  ;;  %v2042_v55 = vld [vmem:[%s2118_s2] ss:$0 sm:$0xff] }
 0x12a   : > { %v658_v34 = vadd.f32 %v639_v58, %v528_v37 }
 0x12b   : > { %v771_v38 = vpop.f32.mrf.mxu0 }
 0x12c   : > { %v2033_v39 = vadd.f32 %v769_v57, %v658_v34 }
 0x12e   : > { %v511_v47 = vpop.f32.mrf.mxu2 }
 0x12f   : > { %v529_v56 = vadd.f32 %v511_v47, %v398_v41 }
 0x130   : > { %v864_v24 = vpop.f32.mrf.mxu1 }
 0x131   : > { %v641_v53 = vpop.f32.mrf.mxu3  ;;  %v904_v49 = vadd.f32 %v864_v24, %v1935_v6 }
 0x132   : > { %v659_v59 = vadd.f32 %v641_v53, %v529_v56 }
 0x133   : > { %v1254_v60 = vpop.f32.mrf.mxu0 }
 0x134   : > { %v2036_v26 = vadd.f32 %v771_v38, %v659_v59 }
 0x136   : > { %v994_v61 = vpop.f32.mrf.mxu2 }
 0x137   : > { %v1034_v36 = vadd.f32 %v994_v61, %v904_v49 }
 0x138   : > { %v866_v4 = vpop.f32.mrf.mxu1 }
 0x139   : > { %v1124_v62 = vpop.f32.mrf.mxu3  ;;  %v905_v48 = vadd.f32 %v866_v4, %v1943_v11 }
 0x13a   : > { %v1164_v63 = vadd.f32 %v1124_v62, %v1034_v36 }
 0x13b   : > { %v1256_v0 = vpop.f32.mrf.mxu0 }
 0x13c   : > { %v1294_v15 = vadd.f32 %v1254_v60, %v1164_v63 }
 0x13e   : > { %v1314_v1 = vadd.f32 %v2042_v55, %v1294_v15  ;;  %v996_v6 = vpop.f32.mrf.mxu2 }
 0x13f   : > { %v1035_v7 = vadd.f32 %v996_v6, %v905_v48 }
 0x140   : > { %v1330_v5 = vmax.f32 %v1314_v1, 0.0  ;;  %v869_v51 = vpop.f32.mrf.mxu1 }
 0x141   : > { %v1126_v2 = vpop.f32.mrf.mxu3  ;;  %v906_v11 = vadd.f32 %v869_v51, %v1947_v32 }
 0x142   : > { %1346 = vst.msk [vmem:[%s2050_s7] sm:$0xff] %vm241_vm0, %v1330_v5  ;;  %v1165_v43 = vadd.f32 %v1126_v2, %v1035_v7 }
 0x143   : > { %v1259_v44 = vpop.f32.mrf.mxu0 }
 0x144   : > { %v1295_v8 = vadd.f32 %v1256_v0, %v1165_v43 }
 0x146   : > { %v1315_v12 = vadd.f32 %v2042_v55, %v1295_v8  ;;  %v999_v45 = vpop.f32.mrf.mxu2 }
 0x147   : > { %v1036_v10 = vadd.f32 %v999_v45, %v906_v11 }
 0x148   : > { %v1331_v46 = vmax.f32 %v1315_v12, 0.0  ;;  %v871_v14 = vpop.f32.mrf.mxu1 }
 0x149   : > { %v1129_v13 = vpop.f32.mrf.mxu3  ;;  %v907_v29 = vadd.f32 %v871_v14, %v1956_v40 }
 0x14a   : > { %1347 = vst.msk [vmem:[%s2050_s7 + $0x8] sm:$0xff] %vm241_vm0, %v1331_v46  ;;  %v1166_v17 = vadd.f32 %v1129_v13, %v1036_v10 }
 0x14b   : > { %v1261_v35 = vpop.f32.mrf.mxu0 }
 0x14c   : > { %v1296_v20 = vadd.f32 %v1259_v44, %v1166_v17 }
 0x14e   : > { %v1316_v21 = vadd.f32 %v2042_v55, %v1296_v20  ;;  %v1001_v22 = vpop.f32.mrf.mxu2 }
 0x14f   : > { %v1037_v32 = vadd.f32 %v1001_v22, %v907_v29 }
 0x150   : > { %v1332_v27 = vmax.f32 %v1316_v21, 0.0  ;;  %v874_v31 = vpop.f32.mrf.mxu1 }
 0x151   : > { %v1131_v23 = vpop.f32.mrf.mxu3  ;;  %v908_v37 = vadd.f32 %v874_v31, %v1961_v3 }
 0x152   : > { %1348 = vst.msk [vmem:[%s2050_s7 + $0x10] sm:$0xff] %vm241_vm0, %v1332_v27  ;;  %v1167_v57 = vadd.f32 %v1131_v23, %v1037_v32 }
 0x153   : > { %v1264_v42 = vpop.f32.mrf.mxu0 }
 0x154   : > { %v1297_v19 = vadd.f32 %v1261_v35, %v1167_v57 }
 0x156   : > { %v1317_v58 = vadd.f32 %v2042_v55, %v1297_v19  ;;  %v1004_v16 = vpop.f32.mrf.mxu2 }
 0x157   : > { %v1038_v40 = vadd.f32 %v1004_v16, %v908_v37 }
 0x158   : > { %v1333_v38 = vmax.f32 %v1317_v58, 0.0  ;;  %v876_v41 = vpop.f32.mrf.mxu1 }
 0x159   : > { %v1134_v34 = vpop.f32.mrf.mxu3  ;;  %v909_v59 = vadd.f32 %v876_v41, %v1970_v30 }
 0x15a   : > { %1349 = vst.msk [vmem:[%s2050_s7 + $0x18] sm:$0xff] %vm241_vm0, %v1333_v38  ;;  %v1168_v47 = vadd.f32 %v1134_v34, %v1038_v40 }
 0x15b   : > { %v1266_v53 = vpop.f32.mrf.mxu0 }
 0x15c   : > { %v1298_v56 = vadd.f32 %v1264_v42, %v1168_v47 }
 0x15e   : > { %v1318_v24 = vadd.f32 %v2042_v55, %v1298_v56  ;;  %v1006_v60 = vpop.f32.mrf.mxu2 }
 0x15f   : > { %v1039_v3 = vadd.f32 %v1006_v60, %v909_v59 }
 0x160   : > { %v1334_v61 = vmax.f32 %v1318_v24, 0.0  ;;  %v879_v62 = vpop.f32.mrf.mxu1 }
 0x161   : > { %v1136_v49 = vpop.f32.mrf.mxu3  ;;  %v910_v15 = vadd.f32 %v879_v62, %v1975_v9 }
 0x162   : > { %1350 = vst.msk [vmem:[%s2050_s7 + $0x20] sm:$0xff] %vm241_vm0, %v1334_v61  ;;  %v1169_v36 = vadd.f32 %v1136_v49, %v1039_v3 }
 0x163   : > { %v1269_v4 = vpop.f32.mrf.mxu0 }
 0x164   : > { %v1299_v63 = vadd.f32 %v1266_v53, %v1169_v36 }
 0x166   : > { %v1319_v0 = vadd.f32 %v2042_v55, %v1299_v63  ;;  %v1009_v1 = vpop.f32.mrf.mxu2 }
 0x167   : > { %v1040_v30 = vadd.f32 %v1009_v1, %v910_v15 }
 0x168   : > { %v1335_v6 = vmax.f32 %v1319_v0, 0.0  ;;  %v881_v2 = vpop.f32.mrf.mxu1 }
 0x169   : > { %v1139_v48 = vpop.f32.mrf.mxu3  ;;  %v911_v44 = vadd.f32 %v881_v2, %v1983_v50 }
 0x16a   : > { %1351 = vst.msk [vmem:[%s2050_s7 + $0x28] sm:$0xff] %vm241_vm0, %v1335_v6  ;;  %v1170_v5 = vadd.f32 %v1139_v48, %v1040_v30 }
 0x16b   : > { %v1271_v7 = vpop.f32.mrf.mxu0 }
 0x16c   : > { %v1300_v51 = vadd.f32 %v1269_v4, %v1170_v5 }
 0x16e   : > { %v1320_v43 = vadd.f32 %v2042_v55, %v1300_v51  ;;  %v1011_v8 = vpop.f32.mrf.mxu2 }
 0x16f   : > { %v1041_v9 = vadd.f32 %v1011_v8, %v911_v44 }
 0x170   : > { %v1336_v11 = vmax.f32 %v1320_v43, 0.0  ;;  %v884_v45 = vpop.f32.mrf.mxu1 }
 0x171   : > { %v1141_v12 = vpop.f32.mrf.mxu3  ;;  %v912_v17 = vadd.f32 %v884_v45, %v1988_v18 }
 0x172   : > { %1352 = vst.msk [vmem:[%s2050_s7 + $0x30] sm:$0xff] %vm241_vm0, %v1336_v11  ;;  %v1171_v13 = vadd.f32 %v1141_v12, %v1041_v9 }
 0x173   : > { %v1274_v46 = vpop.f32.mrf.mxu0 }
 0x174   : > { %v1301_v10 = vadd.f32 %v1271_v7, %v1171_v13 }
 0x176   : > { %v1321_v14 = vadd.f32 %v2042_v55, %v1301_v10  ;;  %v1014_v35 = vpop.f32.mrf.mxu2 }
 0x177   : > { %v1042_v50 = vadd.f32 %v1014_v35, %v912_v17 }
 0x178   : > { %v1337_v21 = vmax.f32 %v1321_v14, 0.0  ;;  %v886_v29 = vpop.f32.mrf.mxu1 }
 0x179   : > { %v1144_v20 = vpop.f32.mrf.mxu3  ;;  %v913_v31 = vadd.f32 %v886_v29, %v1997_v28 }
 0x17a   : > { %1353 = vst.msk [vmem:[%s2050_s7 + $0x38] sm:$0xff] %vm241_vm0, %v1337_v21  ;;  %v1172_v22 = vadd.f32 %v1144_v20, %v1042_v50 }
 0x17b   : > { %v1276_v23 = vpop.f32.mrf.mxu0 }
 0x17c   : > { %v1302_v27 = vadd.f32 %v1274_v46, %v1172_v22 }
 0x17e   : > { %v1322_v32 = vadd.f32 %v2042_v55, %v1302_v27  ;;  %v1016_v57 = vpop.f32.mrf.mxu2 }
 0x17f   : > { %v1043_v18 = vadd.f32 %v1016_v57, %v913_v31 }
 0x180   : > { %v1338_v19 = vmax.f32 %v1322_v32, 0.0  ;;  %v889_v58 = vpop.f32.mrf.mxu1 }
 0x181   : > { %v1146_v42 = vpop.f32.mrf.mxu3  ;;  %v914_v40 = vadd.f32 %v889_v58, %v2002_v25 }
 0x182   : > { %1354 = vst.msk [vmem:[%s2050_s7 + $0x40] sm:$0xff] %vm241_vm0, %v1338_v19  ;;  %v1173_v37 = vadd.f32 %v1146_v42, %v1043_v18 }
 0x183   : > { %v1279_v16 = vpop.f32.mrf.mxu0 }
 0x184   : > { %v1303_v34 = vadd.f32 %v1276_v23, %v1173_v37 }
 0x186   : > { %v1323_v38 = vadd.f32 %v2042_v55, %v1303_v34  ;;  %v1019_v41 = vpop.f32.mrf.mxu2 }
 0x187   : > { %v1044_v28 = vadd.f32 %v1019_v41, %v914_v40 }
 0x188   : > { %v1339_v53 = vmax.f32 %v1323_v38, 0.0  ;;  %v891_v56 = vpop.f32.mrf.mxu1 }
 0x189   : > { %v1149_v47 = vpop.f32.mrf.mxu3  ;;  %v915_v61 = vadd.f32 %v891_v56, %v2013_v54 }
 0x18a   : > { %1355 = vst.msk [vmem:[%s2050_s7 + $0x48] sm:$0xff] %vm241_vm0, %v1339_v53  ;;  %v1174_v24 = vadd.f32 %v1149_v47, %v1044_v28 }
 0x18b   : > { %v1281_v59 = vpop.f32.mrf.mxu0 }
 0x18c   : > { %v1304_v60 = vadd.f32 %v1279_v16, %v1174_v24 }
 0x18e   : > { %v1324_v49 = vadd.f32 %v2042_v55, %v1304_v60  ;;  %v1021_v3 = vpop.f32.mrf.mxu2 }
 0x18f   : > { %v1045_v25 = vadd.f32 %v1021_v3, %v915_v61 }
 0x190   : > { %v1340_v36 = vmax.f32 %v1324_v49, 0.0  ;;  %v894_v4 = vpop.f32.mrf.mxu1 }
 0x191   : > { %v1151_v62 = vpop.f32.mrf.mxu3  ;;  %v916_v48 = vadd.f32 %v894_v4, %v2018_v52 }
 0x192   : > { %1356 = vst.msk [vmem:[%s2050_s7 + $0x50] sm:$0xff] %vm241_vm0, %v1340_v36  ;;  %v1175_v63 = vadd.f32 %v1151_v62, %v1045_v25 }
 0x193   : > { %v1284_v15 = vpop.f32.mrf.mxu0 }
 0x194   : > { %v1305_v0 = vadd.f32 %v1281_v59, %v1175_v63 }
 0x196   : > { %v1325_v1 = vadd.f32 %v2042_v55, %v1305_v0  ;;  %v1024_v6 = vpop.f32.mrf.mxu2 }
 0x197   : > { %v1046_v54 = vadd.f32 %v1024_v6, %v916_v48 }
 0x198   : > { %v1341_v2 = vmax.f32 %v1325_v1, 0.0  ;;  %v896_v5 = vpop.f32.mrf.mxu1 }
 0x199   : > { %v1154_v30 = vpop.f32.mrf.mxu3  ;;  %v917_v44 = vadd.f32 %v896_v5, %v2029_v33 }
 0x19a   : > { %1357 = vst.msk [vmem:[%s2050_s7 + $0x58] sm:$0xff] %vm241_vm0, %v1341_v2  ;;  %v1176_v7 = vadd.f32 %v1154_v30, %v1046_v54 }
 0x19b   : > { %v1286_v8 = vpop.f32.mrf.mxu0 }
 0x19c   : > { %v1306_v51 = vadd.f32 %v1284_v15, %v1176_v7 }
 0x19e   : > { %v1326_v43 = vadd.f32 %v2042_v55, %v1306_v51  ;;  %v1026_v12 = vpop.f32.mrf.mxu2 }
 0x19f   : > { %v1047_v52 = vadd.f32 %v1026_v12, %v917_v44 }
 0x1a0   : > { %v1342_v9 = vmax.f32 %v1326_v43, 0.0  ;;  %v899_v45 = vpop.f32.mrf.mxu1 }
 0x1a1   : > { %v1156_v11 = vpop.f32.mrf.mxu3  ;;  %v918_v14 = vadd.f32 %v899_v45, %v2033_v39 }
 0x1a2   : > { %1358 = vst.msk [vmem:[%s2050_s7 + $0x60] sm:$0xff] %vm241_vm0, %v1342_v9  ;;  %v1177_v13 = vadd.f32 %v1156_v11, %v1047_v52 }
 0x1a3   : > { %v1289_v21 = vpop.f32.mrf.mxu0 }
 0x1a4   : > { %v1307_v46 = vadd.f32 %v1286_v8, %v1177_v13 }
 0x1a6   : > { %v1327_v10 = vadd.f32 %v2042_v55, %v1307_v46  ;;  %v1029_v17 = vpop.f32.mrf.mxu2 }
 0x1a7   : > { %v1048_v33 = vadd.f32 %v1029_v17, %v918_v14 }
 0x1a8   : > { %v1343_v20 = vmax.f32 %v1327_v10, 0.0  ;;  %v901_v29 = vpop.f32.mrf.mxu1 }
 0x1a9   : > { %v1159_v35 = vpop.f32.mrf.mxu3  ;;  %v919_v27 = vadd.f32 %v901_v29, %v2036_v26 }
 0x1aa   : > { %1359 = vst.msk [vmem:[%s2050_s7 + $0x68] sm:$0xff] %vm241_vm0, %v1343_v20  ;;  %v1178_v50 = vadd.f32 %v1159_v35, %v1048_v33 }
 0x1ab   : > { %v1291_v19 = vpop.f32.mrf.mxu0 }
 0x1ac   : > { %v1308_v22 = vadd.f32 %v1289_v21, %v1178_v50 }
 0x1ae   : > { %v1328_v23 = vadd.f32 %v2042_v55, %v1308_v22  ;;  %v1031_v32 = vpop.f32.mrf.mxu2 }
 0x1af   : > { %v1049_v57 = vadd.f32 %v1031_v32, %v919_v27 }
 0x1b0   : > { %v1344_v31 = vmax.f32 %v1328_v23, 0.0 }
 0x1b1   : > { %v1161_v39 = vpop.f32.mrf.mxu3 }
 0x1b2   : > { %1360 = vst.msk [vmem:[%s2050_s7 + $0x70] sm:$0xff] %vm241_vm0, %v1344_v31  ;;  %v1179_v42 = vadd.f32 %v1161_v39, %v1049_v57 }
 0x1b4   : > { %v1309_v18 = vadd.f32 %v1291_v19, %v1179_v42 }
 0x1b6   : > { %v1329_v58 = vadd.f32 %v2042_v55, %v1309_v18 }
 0x1b8   : > { %v1345_v37 = vmax.f32 %v1329_v58, 0.0 }
 0x1ba   : > { %1361 = vst.msk [vmem:[%s2050_s7 + $0x78] sm:$0xff] %vm241_vm0, %v1345_v37 }
 0x1bb PF: > { %s13_s12 = sadd.s32 1, %s1644_s12  }
 0x1bc   : > { %p10_p4 = scmp.ge.s32.totalorder %s13_s12, 4  }
 0x1be   :  { %12 = sbr.rel (!%p10_p4) target bundleno = 1 (0x1), region = 70 }

// kernel: inception_resnet_a_forward.7
= control target key start
LH: loop header
LB: loop body
LE: loop exit
PB: predicated region body
PF: predicated region fallthrough
CT: control target
= control target key end

     0   :  { %s1667_s12 = smov 0   ;;  %s2117_s0 = inlined_call_operand.vmem [shape: f32[2,176,32], index: 0, kind: input, shape index: {}]   ;;  %s2118_s1 = inlined_call_operand.vmem [shape: bf16[9,32,48], index: 1, kind: input, shape index: {}]   ;;  %s2119_s2 = inlined_call_operand.vmem [shape: f32[1,48], index: 2, kind: input, shape index: {}]   ;;  %s2120_s3 = inlined_call_operand.vmem [shape: f32[2,128,48], index: 3, kind: output, shape index: {}]  }
   0x1 LB: > { %s1418_s13 = sadd.s32 4294967295, %s1645_s12   ;;  %p1422_p0 = scmp.ge.s32.totalorder %s1645_s12, 1  ;;  %s1645_s12 = sphi %s1667_s12, %s13_s12  }
   0x2   : > { %p137_p1 = scmp.lt.s32.totalorder %s1645_s12, 3 }
   0x4   : > { %p138_p2 = pnand %p1422_p0, %p137_p1 }
   0x5   : > { %p161_p3 = scmp.lt.s32.totalorder (!%p138_p2), %s1418_s13, 1 }
   0x6   : > { %141 = sbr.rel (%p138_p2) target bundleno = 443 (0x1bb), region = 32 }
   0xb   : > { %v1608_v0 = vld [vmem:[%s2118_s1 + $0x18] sm:$0xff]  ;;  %v1607_v1 = vld [vmem:[%s2118_s1 + $0x10] sm:$0xff]  ;;  %s2122_s13 = smov (!%p161_p3, %s1418_s13), 1  ;;  %v1610_v2 = vld [vmem:[%s2118_s1 + $0x28] sm:$0xff]  ;;  %vm241_vm0 = vcmask 261120   ;;  %vm1346_vm1 = vcmask 392192  }
   0xc   : > { %1623 = vmatpush.bf16.msra.mxu1 %v1608_v0  ;;  %1624 = vmatpush.bf16.msra.mxu2 %v1608_v0  ;;  %s1629_s18 = smul.u32 176, %s2122_s13  ;;  %v1612_v3 = vld [vmem:[%s2118_s1 + $0x38] sm:$0xff]  ;;  %v1606_v4 = vld [vmem:[%s2118_s1 + $0x8] sm:$0xff]  ;;  %v1609_v6 = vld [vmem:[%s2118_s1 + $0x20] sm:$0xff]  ;;  %s1604_s4 = sshll.u32 %s2122_s13, 7 }
   0xd   : > { %1625 = vmatpush.bf16.msra.mxu3 %v1608_v0  ;;  %272 = vmatpush.bf16.msra.mxu0 %v1608_v0  ;;  %v1614_v5 = vld [vmem:[%s2118_s1 + $0x48] sm:$0xff]  ;;  %v1611_v10 = vld [vmem:[%s2118_s1 + $0x30] sm:$0xff]  ;;  %v1605_v19 = vld [vmem:[%s2118_s1] sm:$0xff]  ;;  %s2051_s7 = scalar_lea.vmem %s2120_s3, %s1604_s4 }
   0xe   : > { %s1699_s29 = scalar_lea.vmem %s2117_s0, %s1629_s18  ;;  %v1613_v21 = vld [vmem:[%s2118_s1 + $0x40] sm:$0xff]  ;;  %v1618_v22 = vld [vmem:[%s2118_s1 + $0x68] sm:$0xff]  ;;  %v1620_v23 = vld [vmem:[%s2118_s1 + $0x78] sm:$0xff] }
   0xf   : > { %v204_v7 = vld [vmem:[%s1699_s29 + $0x21] sm:$0xff]  ;;  %v205_v8 = vld [vmem:[%s1699_s29 + $0x29] sm:$0xff]  ;;  %v1616_v24 = vld [vmem:[%s2118_s1 + $0x58] sm:$0xff] }
  0x10   : > { %1626 = vmatpush.bf16.msra.mxu1 %v1607_v1  ;;  %1627 = vmatpush.bf16.msra.mxu2 %v1607_v1  ;;  %v208_v9 = vld [vmem:[%s1699_s29 + $0x41] sm:$0xff]  ;;  %v1710_v11 = vpack.c.bf16 %v205_v8, %v204_v7  ;;  %v209_v12 = vld [vmem:[%s1699_s29 + $0x49] sm:$0xff]  ;;  %v206_v26 = vld [vmem:[%s1699_s29 + $0x31] sm:$0xff] }
  0x11   : > { %1628 = vmatpush.bf16.msra.mxu3 %v1607_v1  ;;  %273 = vmatpush.bf16.msra.mxu0 %v1607_v1  ;;  %v212_v13 = vld [vmem:[%s1699_s29 + $0x61] sm:$0xff]  ;;  %v213_v14 = vld [vmem:[%s1699_s29 + $0x69] sm:$0xff]  ;;  %v1715_v15 = vpack.c.bf16 %v209_v12, %v208_v9  ;;  %v207_v27 = vld [vmem:[%s1699_s29 + $0x39] sm:$0xff] }
  0x12   : > { %v1717_v16 = vpack.c.bf16 %v213_v14, %v212_v13  ;;  %v200_v17 = vld [vmem:[%s1699_s29 + $0x1] sm:$0xff]  ;;  %v201_v18 = vld [vmem:[%s1699_s29 + $0x9] sm:$0xff]  ;;  %v210_v28 = vld [vmem:[%s1699_s29 + $0x51] sm:$0xff]  ;;  %v1754_v34 = vpack.c.bf16 %v207_v27, %v206_v26 }
  0x13   : > { %1440 = vmatmul.msk.bf16.vlgmr.msra.gmra.mxu1 %vm241_vm0, %v1710_v11  ;;  %v216_v20 = vpack.c.bf16 %v201_v18, %v200_v17  ;;  %1442 = vmatmul.msk.bf16.vlgmr.msra.gmra.mxu2 %vm241_vm0, %v1715_v15  ;;  %v1622_v25 = vld [vmem:[%s2118_s1 + $0x88] sm:$0xff]  ;;  %v211_v29 = vld [vmem:[%s1699_s29 + $0x59] sm:$0xff]  ;;  %v214_v30 = vld [vmem:[%s1699_s29 + $0x71] sm:$0xff] }
  0x14   : > { %471 = vmatpush.bf16.msrb.mxu2 %v1610_v2  ;;  %357 = vmatpush.bf16.msrb.mxu1 %v1606_v4  ;;  %v215_v31 = vld [vmem:[%s1699_s29 + $0x79] sm:$0xff]  ;;  %v202_v32 = vld [vmem:[%s1699_s29 + $0x11] sm:$0xff]  ;;  %v1756_v35 = vpack.c.bf16 %v211_v29, %v210_v28  ;;  %v173_v39 = vld [vmem:[%s1699_s29 + $0x8] sm:$0xff] }
  0x15   : > { %601 = vmatpush.bf16.msrb.mxu3 %v1612_v3  ;;  %731 = vmatpush.bf16.msrb.mxu0 %v1614_v5  ;;  %v203_v33 = vld [vmem:[%s1699_s29 + $0x19] sm:$0xff]  ;;  %v1758_v36 = vpack.c.bf16 %v215_v31, %v214_v30  ;;  %v400_v40 = vld [vmem:[%s1699_s29 + $0x2] sm:$0xff]  ;;  %v401_v41 = vld [vmem:[%s1699_s29 + $0xa] sm:$0xff] }
  0x16   : > { %1444 = vmatmul.msk.bf16.vlgmr.msra.gmra.mxu3 %vm241_vm0, %v1717_v16  ;;  %1438 = vmatmul.msk.bf16.vlgmr.msra.gmra.mxu0 %vm241_vm0, %v216_v20  ;;  %v217_v37 = vpack.c.bf16 %v203_v33, %v202_v32  ;;  %v172_v38 = vld [vmem:[%s1699_s29] sm:$0xff]  ;;  %v530_v42 = vld [vmem:[%s1699_s29 + $0x10] sm:$0xff]  ;;  %v531_v43 = vld [vmem:[%s1699_s29 + $0x18] sm:$0xff]  ;;  %v416_v45 = vpack.c.bf16 %v401_v41, %v400_v40 }
  0x17   : > { %v188_v44 = vpack.c.bf16 %v173_v39, %v172_v38  ;;  %v546_v46 = vpack.c.bf16 %v531_v43, %v530_v42  ;;  %v402_v47 = vld [vmem:[%s1699_s29 + $0x12] sm:$0xff]  ;;  %v403_v48 = vld [vmem:[%s1699_s29 + $0x1a] sm:$0xff]  ;;  %v533_v50 = vld [vmem:[%s1699_s29 + $0x28] sm:$0xff] }
  0x18   : > { %472 = vmatpush.bf16.msrb.mxu2 %v1609_v6  ;;  %358 = vmatpush.bf16.msrb.mxu1 %v1605_v19  ;;  %v532_v49 = vld [vmem:[%s1699_s29 + $0x20] sm:$0xff]  ;;  %v1781_v51 = vpack.c.bf16 %v403_v48, %v402_v47  ;;  %v405_v54 = vld [vmem:[%s1699_s29 + $0x2a] sm:$0xff]  ;;  %v535_v56 = vld [vmem:[%s1699_s29 + $0x38] sm:$0xff] }
  0x19   : > { %602 = vmatpush.bf16.msrb.mxu3 %v1611_v10  ;;  %732 = vmatpush.bf16.msrb.mxu0 %v1613_v21  ;;  %v1783_v52 = vpack.c.bf16 %v533_v50, %v532_v49  ;;  %v404_v53 = vld [vmem:[%s1699_s29 + $0x22] sm:$0xff]  ;;  %v534_v55 = vld [vmem:[%s1699_s29 + $0x30] sm:$0xff]  ;;  %v407_v0 = vld [vmem:[%s1699_s29 + $0x3a] sm:$0xff] }
  0x1a   : > { %v1796_v57 = vpack.c.bf16 %v405_v54, %v404_v53  ;;  %v1798_v58 = vpack.c.bf16 %v535_v56, %v534_v55  ;;  %v1617_v59 = vld [vmem:[%s2118_s1 + $0x60] sm:$0xff]  ;;  %v1619_v60 = vld [vmem:[%s2118_s1 + $0x70] sm:$0xff]  ;;  %v537_v2 = vld [vmem:[%s1699_s29 + $0x48] sm:$0xff] }
  0x1b   : > { %v1615_v61 = vld [vmem:[%s2118_s1 + $0x50] sm:$0xff]  ;;  %v1621_v62 = vld [vmem:[%s2118_s1 + $0x80] sm:$0xff]  ;;  %v539_v8 = vld [vmem:[%s1699_s29 + $0x58] sm:$0xff] }
  0x1c   : > { %991 = vmatpush.bf16.msra.mxu2 %v1618_v22  ;;  %861 = vmatpush.bf16.msra.mxu1 %v1616_v24  ;;  %v406_v63 = vld [vmem:[%s1699_s29 + $0x32] sm:$0xff]  ;;  %v536_v1 = vld [vmem:[%s1699_s29 + $0x40] sm:$0xff]  ;;  %v409_v6 = vld [vmem:[%s1699_s29 + $0x4a] sm:$0xff] }
  0x1d   : > { %1121 = vmatpush.bf16.msra.mxu3 %v1620_v23  ;;  %1251 = vmatpush.bf16.msra.mxu0 %v1622_v25  ;;  %v1824_v3 = vpack.c.bf16 %v407_v0, %v406_v63  ;;  %v1826_v4 = vpack.c.bf16 %v537_v2, %v536_v1  ;;  %v408_v5 = vld [vmem:[%s1699_s29 + $0x42] sm:$0xff]  ;;  %v538_v7 = vld [vmem:[%s1699_s29 + $0x50] sm:$0xff]  ;;  %v411_v13 = vld [vmem:[%s1699_s29 + $0x5a] sm:$0xff] }
  0x1e   : > { %v1840_v9 = vpack.c.bf16 %v409_v6, %v408_v5  ;;  %v1842_v10 = vpack.c.bf16 %v539_v8, %v538_v7  ;;  %v410_v12 = vld [vmem:[%s1699_s29 + $0x52] sm:$0xff]  ;;  %v540_v14 = vld [vmem:[%s1699_s29 + $0x60] sm:$0xff]  ;;  %v541_v17 = vld [vmem:[%s1699_s29 + $0x68] sm:$0xff] }
  0x1f   : > { %v1856_v18 = vpack.c.bf16 %v411_v13, %v410_v12  ;;  %v1858_v19 = vpack.c.bf16 %v541_v17, %v540_v14  ;;  %v412_v20 = vld [vmem:[%s1699_s29 + $0x62] sm:$0xff]  ;;  %v413_v21 = vld [vmem:[%s1699_s29 + $0x6a] sm:$0xff]  ;;  %v543_v23 = vld [vmem:[%s1699_s29 + $0x78] sm:$0xff] }
  0x20   : > { %992 = vmatpush.bf16.msra.mxu2 %v1617_v59  ;;  %862 = vmatpush.bf16.msra.mxu1 %v1615_v61  ;;  %v542_v22 = vld [vmem:[%s1699_s29 + $0x70] sm:$0xff]  ;;  %v1874_v25 = vpack.c.bf16 %v413_v21, %v412_v20  ;;  %v415_v33 = vld [vmem:[%s1699_s29 + $0x7a] sm:$0xff]  ;;  %v545_v38 = vld [vmem:[%s1699_s29 + $0x88] sm:$0xff] }
  0x21   : > { %1122 = vmatpush.bf16.msra.mxu3 %v1619_v60  ;;  %1252 = vmatpush.bf16.msra.mxu0 %v1621_v62  ;;  %v1876_v26 = vpack.c.bf16 %v543_v23, %v542_v22  ;;  %v414_v32 = vld [vmem:[%s1699_s29 + $0x72] sm:$0xff]  ;;  %v674_v39 = vld [vmem:[%s1699_s29 + $0x81] sm:$0xff]  ;;  %v675_v40 = vld [vmem:[%s1699_s29 + $0x89] sm:$0xff] }
  0x23   : > { %1441 = vmatmul.msk.bf16.gmra.mxu1 %vm241_vm0, %v1754_v34  ;;  %1443 = vmatmul.msk.bf16.gmra.mxu2 %vm241_vm0, %v1756_v35 }
  0x26   : > { %1445 = vmatmul.msk.bf16.gmra.mxu3 %vm241_vm0, %v1758_v36  ;;  %1439 = vmatmul.msk.bf16.gmra.mxu0 %vm241_vm0, %v217_v37 }
  0x33   : > { %1454 = vmatmul.msk.bf16.vlgmr.msrb.gmra.mxu1 %vm241_vm0, %v188_v44  ;;  %1474 = vmatmul.msk.bf16.vlgmr.msrb.gmra.mxu2 %vm241_vm0, %v416_v45  ;;  %v1904_v44 = vpack.c.bf16 %v415_v33, %v414_v32 }
  0x36   : > { %1494 = vmatmul.msk.bf16.vlgmr.msrb.gmra.mxu3 %vm241_vm0, %v546_v46  ;;  %1514 = vmatmul.msk.bf16.vlgmr.msrb.gmra.mxu0 %vm241_vm0, %v217_v37  ;;  %v544_v37 = vld [vmem:[%s1699_s29 + $0x80] sm:$0xff] }
  0x37   : > { %v1906_v45 = vpack.c.bf16 %v545_v38, %v544_v37 }
  0x43   : > { %1455 = vmatmul.msk.bf16.gmra.mxu1 %vm241_vm0, %v546_v46  ;;  %1475 = vmatmul.msk.bf16.gmra.mxu2 %vm241_vm0, %v1781_v51  ;;  %v1908_v46 = vpack.c.bf16 %v675_v40, %v674_v39 }
  0x46   : > { %1495 = vmatmul.msk.bf16.gmra.mxu3 %vm241_vm0, %v1783_v52  ;;  %1515 = vmatmul.msk.bf16.gmra.mxu0 %vm241_vm0, %v1710_v11 }
  0x53   : > { %1456 = vmatmul.msk.bf16.gmra.mxu1 %vm241_vm0, %v1783_v52  ;;  %1476 = vmatmul.msk.bf16.gmra.mxu2 %vm241_vm0, %v1796_v57 }
  0x56   : > { %1496 = vmatmul.msk.bf16.gmra.mxu3 %vm241_vm0, %v1798_v58  ;;  %1516 = vmatmul.msk.bf16.gmra.mxu0 %vm241_vm0, %v1754_v34 }
  0x63   : > { %1457 = vmatmul.msk.bf16.gmra.mxu1 %vm241_vm0, %v1798_v58  ;;  %1477 = vmatmul.msk.bf16.gmra.mxu2 %vm241_vm0, %v1824_v3 }
  0x66   : > { %1497 = vmatmul.msk.bf16.gmra.mxu3 %vm241_vm0, %v1826_v4  ;;  %1517 = vmatmul.msk.bf16.gmra.mxu0 %vm241_vm0, %v1715_v15 }
  0x73   : > { %1458 = vmatmul.msk.bf16.gmra.mxu1 %vm241_vm0, %v1826_v4  ;;  %1478 = vmatmul.msk.bf16.gmra.mxu2 %vm241_vm0, %v1840_v9 }
  0x76   : > { %1498 = vmatmul.msk.bf16.gmra.mxu3 %vm241_vm0, %v1842_v10  ;;  %1518 = vmatmul.msk.bf16.gmra.mxu0 %vm241_vm0, %v1756_v35 }
  0x83   : > { %1459 = vmatmul.msk.bf16.gmra.mxu1 %vm241_vm0, %v1842_v10  ;;  %1479 = vmatmul.msk.bf16.gmra.mxu2 %vm241_vm0, %v1856_v18 }
  0x86   : > { %1499 = vmatmul.msk.bf16.gmra.mxu3 %vm241_vm0, %v1858_v19  ;;  %1519 = vmatmul.msk.bf16.gmra.mxu0 %vm241_vm0, %v1717_v16 }
  0x90   : > { %v1872_v24 = vpop.f32.mrf.mxu1 }
  0x93   : > { %v275_v27 = vpop.f32.mrf.mxu0  ;;  %1460 = vmatmul.msk.bf16.gmra.mxu1 %vm241_vm0, %v1858_v19  ;;  %1480 = vmatmul.msk.bf16.gmra.mxu2 %vm241_vm0, %v1874_v25 }
  0x96   : > { %1500 = vmatmul.msk.bf16.gmra.mxu3 %vm241_vm0, %v1876_v26  ;;  %1520 = vmatmul.msk.bf16.gmra.mxu0 %vm241_vm0, %v1758_v36  ;;  %v1886_v28 = vpop.f32.mrf.mxu2 }
  0x98   : > { %v1890_v30 = vpop.f32.mrf.mxu1 }
  0x99   : > { %v1888_v29 = vpop.f32.mrf.mxu3 }
  0x9b   : > { %v277_v31 = vpop.f32.mrf.mxu0 }
  0x9e   : > { %v1898_v41 = vpop.f32.mrf.mxu2 }
  0xa0   : > { %v1902_v43 = vpop.f32.mrf.mxu1 }
  0xa1   : > { %v1900_v42 = vpop.f32.mrf.mxu3 }
  0xa3   : > { %v280_v47 = vpop.f32.mrf.mxu0  ;;  %1461 = vmatmul.msk.bf16.gmra.mxu1 %vm241_vm0, %v1876_v26  ;;  %1481 = vmatmul.msk.bf16.gmra.mxu2 %vm241_vm0, %v1904_v44 }
  0xa6   : > { %1501 = vmatmul.msk.bf16.gmra.mxu3 %vm241_vm0, %v1906_v45  ;;  %1521 = vmatmul.msk.bf16.gmra.mxu0 %vm241_vm0, %v1908_v46  ;;  %v1918_v48 = vpop.f32.mrf.mxu2 }
  0xa8   : > { %v1922_v50 = vpop.f32.mrf.mxu1 }
  0xa9   : > { %v1920_v49 = vpop.f32.mrf.mxu3 }
  0xab   : > { %v282_v53 = vpop.f32.mrf.mxu0 }
  0xae   : > { %v1924_v54 = vpop.f32.mrf.mxu2 }
  0xb0   : > { %v360_v56 = vpop.f32.mrf.mxu1 }
  0xb1   : > { %v1926_v55 = vpop.f32.mrf.mxu3  ;;  %v361_v59 = vadd.f32 %v360_v56, %v275_v27 }
  0xb3   : > { %v734_v60 = vpop.f32.mrf.mxu0  ;;  %1534 = vmatmul.msk.bf16.vlgmr.msra.gmra.mxu1 %vm241_vm0, %v1781_v51  ;;  %1554 = vmatmul.msk.bf16.vlgmr.msra.gmra.mxu2 %vm241_vm0, %v1783_v52 }
  0xb6   : > { %1574 = vmatmul.msk.bf16.vlgmr.msra.gmra.mxu3 %vm241_vm0, %v1710_v11  ;;  %1594 = vmatmul.msk.bf16.vlgmr.msra.gmra.mxu0 %vm241_vm0, %v1796_v57  ;;  %v474_v61 = vpop.f32.mrf.mxu2 }
  0xb7   : > { %v514_v63 = vadd.f32 %v474_v61, %v361_v59 }
  0xb8   : > { %v362_v0 = vpop.f32.mrf.mxu1 }
  0xb9   : > { %v604_v62 = vpop.f32.mrf.mxu3  ;;  %v363_v1 = vadd.f32 %v362_v0, %v277_v31 }
  0xba   : > { %v644_v2 = vadd.f32 %v604_v62, %v514_v63 }
  0xbb   : > { %v736_v5 = vpop.f32.mrf.mxu0 }
  0xbc   : > { %v1936_v6 = vadd.f32 %v734_v60, %v644_v2 }
  0xbe   : > { %v476_v7 = vpop.f32.mrf.mxu2 }
  0xbf   : > { %v515_v8 = vadd.f32 %v476_v7, %v363_v1 }
  0xc0   : > { %v365_v12 = vpop.f32.mrf.mxu1 }
  0xc1   : > { %v606_v51 = vpop.f32.mrf.mxu3  ;;  %v366_v52 = vadd.f32 %v365_v12, %v280_v47 }
  0xc2   : > { %v645_v13 = vadd.f32 %v606_v51, %v515_v8 }
  0xc3   : > { %v739_v14 = vpop.f32.mrf.mxu0  ;;  %1535 = vmatmul.msk.bf16.gmra.mxu1 %vm241_vm0, %v1796_v57  ;;  %1555 = vmatmul.msk.bf16.gmra.mxu2 %vm241_vm0, %v1798_v58 }
  0xc4   : > { %v1944_v11 = vadd.f32 %v736_v5, %v645_v13 }
  0xc6   : > { %1575 = vmatmul.msk.bf16.gmra.mxu3 %vm241_vm0, %v1754_v34  ;;  %1595 = vmatmul.msk.bf16.gmra.mxu0 %vm241_vm0, %v1824_v3  ;;  %v479_v17 = vpop.f32.mrf.mxu2 }
  0xc7   : > { %v516_v21 = vadd.f32 %v479_v17, %v366_v52 }
  0xc8   : > { %v367_v22 = vpop.f32.mrf.mxu1 }
  0xc9   : > { %v609_v20 = vpop.f32.mrf.mxu3  ;;  %v368_v23 = vadd.f32 %v367_v22, %v282_v53 }
  0xca   : > { %v646_v27 = vadd.f32 %v609_v20, %v516_v21 }
  0xcb   : > { %v741_v31 = vpop.f32.mrf.mxu0 }
  0xcc   : > { %v1948_v32 = vadd.f32 %v739_v14, %v646_v27 }
  0xce   : > { %v481_v57 = vpop.f32.mrf.mxu2 }
  0xcf   : > { %v517_v58 = vadd.f32 %v481_v57, %v368_v23 }
  0xd0   : > { %v370_v37 = vpop.f32.mrf.mxu1 }
  0xd1   : > { %v611_v33 = vpop.f32.mrf.mxu3  ;;  %v371_v34 = vadd.f32 %v370_v37, %v1872_v24 }
  0xd2   : > { %v647_v38 = vadd.f32 %v611_v33, %v517_v58 }
  0xd3   : > { %v744_v39 = vpop.f32.mrf.mxu0  ;;  %1536 = vmatmul.msk.bf16.gmra.mxu1 %vm241_vm0, %v1824_v3  ;;  %1556 = vmatmul.msk.bf16.gmra.mxu2 %vm241_vm0, %v1826_v4 }
  0xd4   : > { %v1957_v40 = vadd.f32 %v741_v31, %v647_v38 }
  0xd6   : > { %1576 = vmatmul.msk.bf16.gmra.mxu3 %vm241_vm0, %v1715_v15  ;;  %1596 = vmatmul.msk.bf16.gmra.mxu0 %vm241_vm0, %v1840_v9  ;;  %v484_v47 = vpop.f32.mrf.mxu2 }
  0xd7   : > { %v518_v56 = vadd.f32 %v484_v47, %v371_v34 }
  0xd8   : > { %v372_v24 = vpop.f32.mrf.mxu1 }
  0xd9   : > { %v614_v53 = vpop.f32.mrf.mxu3  ;;  %v373_v59 = vadd.f32 %v372_v24, %v1890_v30 }
  0xda   : > { %v648_v60 = vadd.f32 %v614_v53, %v518_v56 }
  0xdb   : > { %v746_v61 = vpop.f32.mrf.mxu0 }
  0xdc   : > { %v1962_v3 = vadd.f32 %v744_v39, %v648_v60 }
  0xde   : > { %v486_v62 = vpop.f32.mrf.mxu2 }
  0xdf   : > { %v519_v63 = vadd.f32 %v486_v62, %v373_v59  ;;  %v1193_v62 = vld [vmem:[%s1699_s29 + $0x8a] sm:$0xff] }
  0xe0   : > { %v375_v0 = vpop.f32.mrf.mxu1 }
  0xe1   : > { %v616_v4 = vpop.f32.mrf.mxu3  ;;  %v376_v15 = vadd.f32 %v375_v0, %v1902_v43 }
  0xe2   : > { %v649_v1 = vadd.f32 %v616_v4, %v519_v63 }
  0xe3   : > { %v749_v2 = vpop.f32.mrf.mxu0  ;;  %1537 = vmatmul.msk.bf16.gmra.mxu1 %vm241_vm0, %v1840_v9  ;;  %1557 = vmatmul.msk.bf16.gmra.mxu2 %vm241_vm0, %v1842_v10 }
  0xe4   : > { %v1971_v30 = vadd.f32 %v746_v61, %v649_v1  ;;  %v1192_v61 = vld [vmem:[%s1699_s29 + $0x82] sm:$0xff] }
  0xe6   : > { %1577 = vmatmul.msk.bf16.gmra.mxu3 %vm241_vm0, %v1756_v35  ;;  %1597 = vmatmul.msk.bf16.gmra.mxu0 %vm241_vm0, %v1856_v18  ;;  %v489_v5 = vpop.f32.mrf.mxu2 }
  0xe7   : > { %v520_v51 = vadd.f32 %v489_v5, %v376_v15  ;;  %v1202_v15 = vpack.c.bf16 %v1193_v62, %v1192_v61 }
  0xe8   : > { %v377_v43 = vpop.f32.mrf.mxu1 }
  0xe9   : > { %v619_v7 = vpop.f32.mrf.mxu3  ;;  %v378_v8 = vadd.f32 %v377_v43, %v1922_v50 }
  0xea   : > { %v650_v12 = vadd.f32 %v619_v7, %v520_v51 }
  0xeb   : > { %v751_v52 = vpop.f32.mrf.mxu0 }
  0xec   : > { %v1976_v9 = vadd.f32 %v749_v2, %v650_v12  ;;  %v934_v12 = vld [vmem:[%s1699_s29 + $0x90] sm:$0xff] }
  0xee   : > { %v491_v13 = vpop.f32.mrf.mxu2 }
  0xef   : > { %v521_v14 = vadd.f32 %v491_v13, %v378_v8  ;;  %v1064_v13 = vld [vmem:[%s1699_s29 + $0x91] sm:$0xff] }
  0xf0   : > { %v380_v17 = vpop.f32.mrf.mxu1 }
  0xf1   : > { %v621_v10 = vpop.f32.mrf.mxu3  ;;  %v381_v21 = vadd.f32 %v380_v17, %v1886_v28  ;;  %v1195_v17 = vld [vmem:[%s1699_s29 + $0x9a] sm:$0xff] }
  0xf2   : > { %v651_v35 = vadd.f32 %v621_v10, %v521_v14  ;;  %v1194_v14 = vld [vmem:[%s1699_s29 + $0x92] sm:$0xff] }
  0xf3   : > { %v754_v20 = vpop.f32.mrf.mxu0  ;;  %1538 = vmatmul.msk.bf16.gmra.mxu1 %vm241_vm0, %v1856_v18  ;;  %1558 = vmatmul.msk.bf16.gmra.mxu2 %vm241_vm0, %v1858_v19 }
  0xf4   : > { %v1984_v50 = vadd.f32 %v751_v52, %v651_v35 }
  0xf6   : > { %1578 = vmatmul.msk.bf16.gmra.mxu3 %vm241_vm0, %v1717_v16  ;;  %1598 = vmatmul.msk.bf16.gmra.mxu0 %vm241_vm0, %v1874_v25  ;;  %v494_v22 = vpop.f32.mrf.mxu2 }
  0xf7   : > { %v522_v27 = vadd.f32 %v494_v22, %v381_v21 }
  0xf8   : > { %v382_v31 = vpop.f32.mrf.mxu1 }
  0xf9   : > { %v624_v23 = vpop.f32.mrf.mxu3  ;;  %v383_v19 = vadd.f32 %v382_v31, %v1898_v41 }
  0xfa   : > { %v652_v57 = vadd.f32 %v624_v23, %v522_v27  ;;  %v1203_v27 = vpack.c.bf16 %v1195_v17, %v1194_v14 }
  0xfb   : > { %v756_v33 = vpop.f32.mrf.mxu0 }
  0xfc   : > { %v1989_v18 = vadd.f32 %v754_v20, %v652_v57 }
  0xfe   : > { %v496_v58 = vpop.f32.mrf.mxu2 }
  0xff   : > { %v523_v16 = vadd.f32 %v496_v58, %v383_v19 }
 0x100   : > { %v385_v34 = vpop.f32.mrf.mxu1 }
 0x101   : > { %v626_v37 = vpop.f32.mrf.mxu3  ;;  %v386_v41 = vadd.f32 %v385_v34, %v1918_v48 }
 0x102   : > { %v653_v38 = vadd.f32 %v626_v37, %v523_v16 }
 0x103   : > { %v759_v39 = vpop.f32.mrf.mxu0  ;;  %1539 = vmatmul.msk.bf16.gmra.mxu1 %vm241_vm0, %v1874_v25  ;;  %1559 = vmatmul.msk.bf16.gmra.mxu2 %vm241_vm0, %v1876_v26 }
 0x104   : > { %v1998_v28 = vadd.f32 %v756_v33, %v653_v38 }
 0x106   : > { %1579 = vmatmul.msk.bf16.gmra.mxu3 %vm241_vm0, %v1758_v36  ;;  %1599 = vmatmul.msk.bf16.gmra.mxu0 %vm241_vm0, %v1904_v44  ;;  %v499_v47 = vpop.f32.mrf.mxu2 }
 0x107   : > { %v524_v56 = vadd.f32 %v499_v47, %v386_v41 }
 0x108   : > { %v387_v24 = vpop.f32.mrf.mxu1 }
 0x109   : > { %v629_v53 = vpop.f32.mrf.mxu3  ;;  %v388_v26 = vadd.f32 %v387_v24, %v1924_v54 }
 0x10a   : > { %v654_v59 = vadd.f32 %v629_v53, %v524_v56 }
 0x10b   : > { %v761_v60 = vpop.f32.mrf.mxu0 }
 0x10c   : > { %v2003_v25 = vadd.f32 %v759_v39, %v654_v59 }
 0x10e   : > { %v501_v36 = vpop.f32.mrf.mxu2 }
 0x10f   : > { %v525_v63 = vadd.f32 %v501_v36, %v388_v26 }
 0x110   : > { %v390_v0 = vpop.f32.mrf.mxu1 }
 0x111   : > { %v631_v4 = vpop.f32.mrf.mxu3  ;;  %v391_v2 = vadd.f32 %v390_v0, %v1888_v29 }
 0x112   : > { %v655_v1 = vadd.f32 %v631_v4, %v525_v63 }
 0x113   : > { %v764_v48 = vpop.f32.mrf.mxu0  ;;  %1540 = vmatmul.msk.bf16.gmra.mxu1 %vm241_vm0, %v1904_v44  ;;  %1560 = vmatmul.msk.bf16.gmra.mxu2 %vm241_vm0, %v1906_v45  ;;  %v935_v45 = vld [vmem:[%s1699_s29 + $0x98] sm:$0xff] }
 0x114   : > { %v2014_v54 = vadd.f32 %v761_v60, %v655_v1  ;;  %v943_v22 = vpack.c.bf16 %v935_v45, %v934_v12 }
 0x116   : > { %1580 = vmatmul.msk.bf16.gmra.mxu3 %vm241_vm0, %v1908_v46  ;;  %1600 = vmatmul.msk.bf16.gmra.mxu0 %vm241_vm0, %v1202_v15  ;;  %v504_v5 = vpop.f32.mrf.mxu2  ;;  %v1065_v46 = vld [vmem:[%s1699_s29 + $0x99] sm:$0xff] }
 0x117   : > { %v526_v51 = vadd.f32 %v504_v5, %v391_v2  ;;  %v1073_v23 = vpack.c.bf16 %v1065_v46, %v1064_v13 }
 0x118   : > { %v392_v43 = vpop.f32.mrf.mxu1 }
 0x119   : > { %v634_v7 = vpop.f32.mrf.mxu3  ;;  %v393_v10 = vadd.f32 %v392_v43, %v1900_v42 }
 0x11a   : > { %v656_v44 = vadd.f32 %v634_v7, %v526_v51 }
 0x11b   : > { %v766_v8 = vpop.f32.mrf.mxu0 }
 0x11c   : > { %v2019_v52 = vadd.f32 %v764_v48, %v656_v44 }
 0x11e   : > { %v506_v35 = vpop.f32.mrf.mxu2 }
 0x11f   : > { %v527_v21 = vadd.f32 %v506_v35, %v393_v10 }
 0x120   : > { %v395_v29 = vpop.f32.mrf.mxu1 }
 0x121   : > { %v636_v20 = vpop.f32.mrf.mxu3  ;;  %v396_v42 = vadd.f32 %v395_v29, %v1920_v49 }
 0x122   : > { %v657_v31 = vadd.f32 %v636_v20, %v527_v21 }
 0x123   : > { %v769_v57 = vpop.f32.mrf.mxu0  ;;  %1541 = vmatmul.msk.bf16.gmra.mxu1 %vm241_vm0, %v1202_v15  ;;  %1561 = vmatmul.msk.bf16.gmra.mxu2 %vm241_vm0, %v943_v22 }
 0x124   : > { %v2030_v33 = vadd.f32 %v766_v8, %v657_v31 }
 0x126   : > { %1581 = vmatmul.msk.bf16.gmra.mxu3 %vm241_vm0, %v1073_v23  ;;  %1601 = vmatmul.msk.bf16.gmra.mxu0 %vm241_vm0, %v1203_v27  ;;  %v509_v19 = vpop.f32.mrf.mxu2 }
 0x127   : > { %v528_v37 = vadd.f32 %v509_v19, %v396_v42 }
 0x128   : > { %v397_v16 = vpop.f32.mrf.mxu1 }
 0x129   : > { %v639_v58 = vpop.f32.mrf.mxu3  ;;  %v398_v41 = vadd.f32 %v397_v16, %v1926_v55  ;;  %v2043_v55 = vld [vmem:[%s2119_s2] ss:$0 sm:$0xff] }
 0x12a   : > { %v658_v34 = vadd.f32 %v639_v58, %v528_v37 }
 0x12b   : > { %v771_v38 = vpop.f32.mrf.mxu0 }
 0x12c   : > { %v2034_v39 = vadd.f32 %v769_v57, %v658_v34 }
 0x12e   : > { %v511_v47 = vpop.f32.mrf.mxu2 }
 0x12f   : > { %v529_v56 = vadd.f32 %v511_v47, %v398_v41 }
 0x130   : > { %v864_v24 = vpop.f32.mrf.mxu1 }
 0x131   : > { %v641_v53 = vpop.f32.mrf.mxu3  ;;  %v904_v49 = vadd.f32 %v864_v24, %v1936_v6 }
 0x132   : > { %v659_v59 = vadd.f32 %v641_v53, %v529_v56 }
 0x133   : > { %v1254_v60 = vpop.f32.mrf.mxu0 }
 0x134   : > { %v2037_v26 = vadd.f32 %v771_v38, %v659_v59 }
 0x136   : > { %v994_v61 = vpop.f32.mrf.mxu2 }
 0x137   : > { %v1034_v36 = vadd.f32 %v994_v61, %v904_v49 }
 0x138   : > { %v866_v4 = vpop.f32.mrf.mxu1 }
 0x139   : > { %v1124_v62 = vpop.f32.mrf.mxu3  ;;  %v905_v48 = vadd.f32 %v866_v4, %v1944_v11 }
 0x13a   : > { %v1164_v63 = vadd.f32 %v1124_v62, %v1034_v36 }
 0x13b   : > { %v1256_v0 = vpop.f32.mrf.mxu0 }
 0x13c   : > { %v1294_v15 = vadd.f32 %v1254_v60, %v1164_v63 }
 0x13e   : > { %v1314_v1 = vadd.f32 %v2043_v55, %v1294_v15  ;;  %v996_v6 = vpop.f32.mrf.mxu2 }
 0x13f   : > { %v1035_v7 = vadd.f32 %v996_v6, %v905_v48 }
 0x140   : > { %v1330_v5 = vmax.f32 %v1314_v1, 0.0  ;;  %v869_v51 = vpop.f32.mrf.mxu1 }
 0x141   : > { %v1126_v2 = vpop.f32.mrf.mxu3  ;;  %v906_v12 = vadd.f32 %v869_v51, %v1948_v32 }
 0x142   : > { %1347 = vst.msk [vmem:[%s2051_s7] sm:$0xff] %vm1346_vm1, %v1330_v5  ;;  %v1165_v43 = vadd.f32 %v1126_v2, %v1035_v7 }
 0x143   : > { %v1259_v44 = vpop.f32.mrf.mxu0 }
 0x144   : > { %v1295_v8 = vadd.f32 %v1256_v0, %v1165_v43 }
 0x146   : > { %v1315_v11 = vadd.f32 %v2043_v55, %v1295_v8  ;;  %v999_v45 = vpop.f32.mrf.mxu2 }
 0x147   : > { %v1036_v10 = vadd.f32 %v999_v45, %v906_v12 }
 0x148   : > { %v1331_v46 = vmax.f32 %v1315_v11, 0.0  ;;  %v871_v14 = vpop.f32.mrf.mxu1 }
 0x149   : > { %v1129_v13 = vpop.f32.mrf.mxu3  ;;  %v907_v29 = vadd.f32 %v871_v14, %v1957_v40 }
 0x14a   : > { %1348 = vst.msk [vmem:[%s2051_s7 + $0x8] sm:$0xff] %vm1346_vm1, %v1331_v46  ;;  %v1166_v17 = vadd.f32 %v1129_v13, %v1036_v10 }
 0x14b   : > { %v1261_v35 = vpop.f32.mrf.mxu0 }
 0x14c   : > { %v1296_v20 = vadd.f32 %v1259_v44, %v1166_v17 }
 0x14e   : > { %v1316_v21 = vadd.f32 %v2043_v55, %v1296_v20  ;;  %v1001_v22 = vpop.f32.mrf.mxu2 }
 0x14f   : > { %v1037_v32 = vadd.f32 %v1001_v22, %v907_v29 }
 0x150   : > { %v1332_v27 = vmax.f32 %v1316_v21, 0.0  ;;  %v874_v31 = vpop.f32.mrf.mxu1 }
 0x151   : > { %v1131_v23 = vpop.f32.mrf.mxu3  ;;  %v908_v37 = vadd.f32 %v874_v31, %v1962_v3 }
 0x152   : > { %1349 = vst.msk [vmem:[%s2051_s7 + $0x10] sm:$0xff] %vm1346_vm1, %v1332_v27  ;;  %v1167_v57 = vadd.f32 %v1131_v23, %v1037_v32 }
 0x153   : > { %v1264_v42 = vpop.f32.mrf.mxu0 }
 0x154   : > { %v1297_v19 = vadd.f32 %v1261_v35, %v1167_v57 }
 0x156   : > { %v1317_v58 = vadd.f32 %v2043_v55, %v1297_v19  ;;  %v1004_v16 = vpop.f32.mrf.mxu2 }
 0x157   : > { %v1038_v40 = vadd.f32 %v1004_v16, %v908_v37 }
 0x158   : > { %v1333_v38 = vmax.f32 %v1317_v58, 0.0  ;;  %v876_v41 = vpop.f32.mrf.mxu1 }
 0x159   : > { %v1134_v34 = vpop.f32.mrf.mxu3  ;;  %v909_v59 = vadd.f32 %v876_v41, %v1971_v30 }
 0x15a   : > { %1350 = vst.msk [vmem:[%s2051_s7 + $0x18] sm:$0xff] %vm1346_vm1, %v1333_v38  ;;  %v1168_v47 = vadd.f32 %v1134_v34, %v1038_v40 }
 0x15b   : > { %v1266_v53 = vpop.f32.mrf.mxu0 }
 0x15c   : > { %v1298_v56 = vadd.f32 %v1264_v42, %v1168_v47 }
 0x15e   : > { %v1318_v24 = vadd.f32 %v2043_v55, %v1298_v56  ;;  %v1006_v60 = vpop.f32.mrf.mxu2 }
 0x15f   : > { %v1039_v3 = vadd.f32 %v1006_v60, %v909_v59 }
 0x160   : > { %v1334_v61 = vmax.f32 %v1318_v24, 0.0  ;;  %v879_v62 = vpop.f32.mrf.mxu1 }
 0x161   : > { %v1136_v49 = vpop.f32.mrf.mxu3  ;;  %v910_v15 = vadd.f32 %v879_v62, %v1976_v9 }
 0x162   : > { %1351 = vst.msk [vmem:[%s2051_s7 + $0x20] sm:$0xff] %vm1346_vm1, %v1334_v61  ;;  %v1169_v36 = vadd.f32 %v1136_v49, %v1039_v3 }
 0x163   : > { %v1269_v4 = vpop.f32.mrf.mxu0 }
 0x164   : > { %v1299_v63 = vadd.f32 %v1266_v53, %v1169_v36 }
 0x166   : > { %v1319_v0 = vadd.f32 %v2043_v55, %v1299_v63  ;;  %v1009_v1 = vpop.f32.mrf.mxu2 }
 0x167   : > { %v1040_v30 = vadd.f32 %v1009_v1, %v910_v15 }
 0x168   : > { %v1335_v6 = vmax.f32 %v1319_v0, 0.0  ;;  %v881_v2 = vpop.f32.mrf.mxu1 }
 0x169   : > { %v1139_v48 = vpop.f32.mrf.mxu3  ;;  %v911_v44 = vadd.f32 %v881_v2, %v1984_v50 }
 0x16a   : > { %1352 = vst.msk [vmem:[%s2051_s7 + $0x28] sm:$0xff] %vm1346_vm1, %v1335_v6  ;;  %v1170_v5 = vadd.f32 %v1139_v48, %v1040_v30 }
 0x16b   : > { %v1271_v7 = vpop.f32.mrf.mxu0 }
 0x16c   : > { %v1300_v51 = vadd.f32 %v1269_v4, %v1170_v5 }
 0x16e   : > { %v1320_v43 = vadd.f32 %v2043_v55, %v1300_v51  ;;  %v1011_v8 = vpop.f32.mrf.mxu2 }
 0x16f   : > { %v1041_v9 = vadd.f32 %v1011_v8, %v911_v44 }
 0x170   : > { %v1336_v12 = vmax.f32 %v1320_v43, 0.0  ;;  %v884_v45 = vpop.f32.mrf.mxu1 }
 0x171   : > { %v1141_v11 = vpop.f32.mrf.mxu3  ;;  %v912_v17 = vadd.f32 %v884_v45, %v1989_v18 }
 0x172   : > { %1353 = vst.msk [vmem:[%s2051_s7 + $0x30] sm:$0xff] %vm1346_vm1, %v1336_v12  ;;  %v1171_v13 = vadd.f32 %v1141_v11, %v1041_v9 }
 0x173   : > { %v1274_v46 = vpop.f32.mrf.mxu0 }
 0x174   : > { %v1301_v10 = vadd.f32 %v1271_v7, %v1171_v13 }
 0x176   : > { %v1321_v14 = vadd.f32 %v2043_v55, %v1301_v10  ;;  %v1014_v35 = vpop.f32.mrf.mxu2 }
 0x177   : > { %v1042_v50 = vadd.f32 %v1014_v35, %v912_v17 }
 0x178   : > { %v1337_v21 = vmax.f32 %v1321_v14, 0.0  ;;  %v886_v29 = vpop.f32.mrf.mxu1 }
 0x179   : > { %v1144_v20 = vpop.f32.mrf.mxu3  ;;  %v913_v31 = vadd.f32 %v886_v29, %v1998_v28 }
 0x17a   : > { %1354 = vst.msk [vmem:[%s2051_s7 + $0x38] sm:$0xff] %vm1346_vm1, %v1337_v21  ;;  %v1172_v22 = vadd.f32 %v1144_v20, %v1042_v50 }
 0x17b   : > { %v1276_v23 = vpop.f32.mrf.mxu0 }
 0x17c   : > { %v1302_v27 = vadd.f32 %v1274_v46, %v1172_v22 }
 0x17e   : > { %v1322_v32 = vadd.f32 %v2043_v55, %v1302_v27  ;;  %v1016_v57 = vpop.f32.mrf.mxu2 }
 0x17f   : > { %v1043_v18 = vadd.f32 %v1016_v57, %v913_v31 }
 0x180   : > { %v1338_v19 = vmax.f32 %v1322_v32, 0.0  ;;  %v889_v58 = vpop.f32.mrf.mxu1 }
 0x181   : > { %v1146_v42 = vpop.f32.mrf.mxu3  ;;  %v914_v40 = vadd.f32 %v889_v58, %v2003_v25 }
 0x182   : > { %1355 = vst.msk [vmem:[%s2051_s7 + $0x40] sm:$0xff] %vm1346_vm1, %v1338_v19  ;;  %v1173_v37 = vadd.f32 %v1146_v42, %v1043_v18 }
 0x183   : > { %v1279_v16 = vpop.f32.mrf.mxu0 }
 0x184   : > { %v1303_v34 = vadd.f32 %v1276_v23, %v1173_v37 }
 0x186   : > { %v1323_v38 = vadd.f32 %v2043_v55, %v1303_v34  ;;  %v1019_v41 = vpop.f32.mrf.mxu2 }
 0x187   : > { %v1044_v28 = vadd.f32 %v1019_v41, %v914_v40 }
 0x188   : > { %v1339_v53 = vmax.f32 %v1323_v38, 0.0  ;;  %v891_v56 = vpop.f32.mrf.mxu1 }
 0x189   : > { %v1149_v47 = vpop.f32.mrf.mxu3  ;;  %v915_v61 = vadd.f32 %v891_v56, %v2014_v54 }
 0x18a   : > { %1356 = vst.msk [vmem:[%s2051_s7 + $0x48] sm:$0xff] %vm1346_vm1, %v1339_v53  ;;  %v1174_v24 = vadd.f32 %v1149_v47, %v1044_v28 }
 0x18b   : > { %v1281_v59 = vpop.f32.mrf.mxu0 }
 0x18c   : > { %v1304_v60 = vadd.f32 %v1279_v16, %v1174_v24 }
 0x18e   : > { %v1324_v49 = vadd.f32 %v2043_v55, %v1304_v60  ;;  %v1021_v3 = vpop.f32.mrf.mxu2 }
 0x18f   : > { %v1045_v25 = vadd.f32 %v1021_v3, %v915_v61 }
 0x190   : > { %v1340_v36 = vmax.f32 %v1324_v49, 0.0  ;;  %v894_v4 = vpop.f32.mrf.mxu1 }
 0x191   : > { %v1151_v62 = vpop.f32.mrf.mxu3  ;;  %v916_v48 = vadd.f32 %v894_v4, %v2019_v52 }
 0x192   : > { %1357 = vst.msk [vmem:[%s2051_s7 + $0x50] sm:$0xff] %vm1346_vm1, %v1340_v36  ;;  %v1175_v63 = vadd.f32 %v1151_v62, %v1045_v25 }
 0x193   : > { %v1284_v15 = vpop.f32.mrf.mxu0 }
 0x194   : > { %v1305_v0 = vadd.f32 %v1281_v59, %v1175_v63 }
 0x196   : > { %v1325_v1 = vadd.f32 %v2043_v55, %v1305_v0  ;;  %v1024_v6 = vpop.f32.mrf.mxu2 }
 0x197   : > { %v1046_v54 = vadd.f32 %v1024_v6, %v916_v48 }
 0x198   : > { %v1341_v2 = vmax.f32 %v1325_v1, 0.0  ;;  %v896_v5 = vpop.f32.mrf.mxu1 }
 0x199   : > { %v1154_v30 = vpop.f32.mrf.mxu3  ;;  %v917_v44 = vadd.f32 %v896_v5, %v2030_v33 }
 0x19a   : > { %1358 = vst.msk [vmem:[%s2051_s7 + $0x58] sm:$0xff] %vm1346_vm1, %v1341_v2  ;;  %v1176_v7 = vadd.f32 %v1154_v30, %v1046_v54 }
 0x19b   : > { %v1286_v8 = vpop.f32.mrf.mxu0 }
 0x19c   : > { %v1306_v51 = vadd.f32 %v1284_v15, %v1176_v7 }
 0x19e   : > { %v1326_v43 = vadd.f32 %v2043_v55, %v1306_v51  ;;  %v1026_v11 = vpop.f32.mrf.mxu2 }
 0x19f   : > { %v1047_v52 = vadd.f32 %v1026_v11, %v917_v44 }
 0x1a0   : > { %v1342_v9 = vmax.f32 %v1326_v43, 0.0  ;;  %v899_v45 = vpop.f32.mrf.mxu1 }
 0x1a1   : > { %v1156_v12 = vpop.f32.mrf.mxu3  ;;  %v918_v14 = vadd.f32 %v899_v45, %v2034_v39 }
 0x1a2   : > { %1359 = vst.msk [vmem:[%s2051_s7 + $0x60] sm:$0xff] %vm1346_vm1, %v1342_v9  ;;  %v1177_v13 = vadd.f32 %v1156_v12, %v1047_v52 }
 0x1a3   : > { %v1289_v21 = vpop.f32.mrf.mxu0 }
 0x1a4   : > { %v1307_v46 = vadd.f32 %v1286_v8, %v1177_v13 }
 0x1a6   : > { %v1327_v10 = vadd.f32 %v2043_v55, %v1307_v46  ;;  %v1029_v17 = vpop.f32.mrf.mxu2 }
 0x1a7   : > { %v1048_v33 = vadd.f32 %v1029_v17, %v918_v14 }
 0x1a8   : > { %v1343_v20 = vmax.f32 %v1327_v10, 0.0  ;;  %v901_v29 = vpop.f32.mrf.mxu1 }
 0x1a9   : > { %v1159_v35 = vpop.f32.mrf.mxu3  ;;  %v919_v27 = vadd.f32 %v901_v29, %v2037_v26 }
 0x1aa   : > { %1360 = vst.msk [vmem:[%s2051_s7 + $0x68] sm:$0xff] %vm1346_vm1, %v1343_v20  ;;  %v1178_v50 = vadd.f32 %v1159_v35, %v1048_v33 }
 0x1ab   : > { %v1291_v19 = vpop.f32.mrf.mxu0 }
 0x1ac   : > { %v1308_v22 = vadd.f32 %v1289_v21, %v1178_v50 }
 0x1ae   : > { %v1328_v23 = vadd.f32 %v2043_v55, %v1308_v22  ;;  %v1031_v32 = vpop.f32.mrf.mxu2 }
 0x1af   : > { %v1049_v57 = vadd.f32 %v1031_v32, %v919_v27 }
 0x1b0   : > { %v1344_v31 = vmax.f32 %v1328_v23, 0.0 }
 0x1b1   : > { %v1161_v39 = vpop.f32.mrf.mxu3 }
 0x1b2   : > { %1361 = vst.msk [vmem:[%s2051_s7 + $0x70] sm:$0xff] %vm1346_vm1, %v1344_v31  ;;  %v1179_v42 = vadd.f32 %v1161_v39, %v1049_v57 }
 0x1b4   : > { %v1309_v18 = vadd.f32 %v1291_v19, %v1179_v42 }
 0x1b6   : > { %v1329_v58 = vadd.f32 %v2043_v55, %v1309_v18 }
 0x1b8   : > { %v1345_v37 = vmax.f32 %v1329_v58, 0.0 }
 0x1ba   : > { %1362 = vst.msk [vmem:[%s2051_s7 + $0x78] sm:$0xff] %vm1346_vm1, %v1345_v37 }
 0x1bb PF: > { %s13_s12 = sadd.s32 1, %s1645_s12  }
 0x1bc   : > { %p10_p4 = scmp.ge.s32.totalorder %s13_s12, 4  }
 0x1be   :  { %12 = sbr.rel (!%p10_p4) target bundleno = 1 (0x1), region = 70 }

// kernel: inception_resnet_a_forward.8
= control target key start
LH: loop header
LB: loop body
LE: loop exit
PB: predicated region body
PF: predicated region fallthrough
CT: control target
= control target key end

     0   :  { %s1803_s12 = smov 0   ;;  %s2280_s0 = inlined_call_operand.vmem [shape: f32[2,176,48], index: 0, kind: input, shape index: {}]   ;;  %s2281_s1 = inlined_call_operand.vmem [shape: bf16[9,48,64], index: 1, kind: input, shape index: {}]   ;;  %s2282_s2 = inlined_call_operand.vmem [shape: f32[1,64], index: 2, kind: input, shape index: {}]   ;;  %s2283_s3 = inlined_call_operand.vmem [shape: f32[2,128,64], index: 3, kind: output, shape index: {}]  }
   0x1 LB: > { %s1490_s13 = sadd.s32 4294967295, %s1781_s12   ;;  %p1494_p0 = scmp.ge.s32.totalorder %s1781_s12, 1  ;;  %s1781_s12 = sphi %s1803_s12, %s13_s12  }
   0x2   : > { %p137_p1 = scmp.lt.s32.totalorder %s1781_s12, 3 }
   0x4   : > { %p138_p2 = pnand %p1494_p0, %p137_p1 }
   0x5   : > { %p161_p3 = scmp.lt.s32.totalorder (!%p138_p2), %s1490_s13, 1 }
   0x6   : > { %141 = sbr.rel (%p138_p2) target bundleno = 446 (0x1be), region = 32 }
   0xb   : > { %v1734_v0 = vld [vmem:[%s2281_s1 + $0x28] sm:$0xff]  ;;  %v1733_v1 = vld [vmem:[%s2281_s1 + $0x20] sm:$0xff]  ;;  %s2285_s13 = smov (!%p161_p3, %s1490_s13), 1  ;;  %v1732_v2 = vld [vmem:[%s2281_s1 + $0x18] sm:$0xff]  ;;  %vm251_vm0 = vcmask 392192   ;;  %vm1418_vm1 = vcmask 523264  }
   0xc   : > { %1756 = vmatpush.bf16.msra.mxu1 %v1734_v0  ;;  %1757 = vmatpush.bf16.msra.mxu2 %v1734_v0  ;;  %s1765_s18 = smul.u32 176, %s2285_s13  ;;  %v1737_v3 = vld [vmem:[%s2281_s1 + $0x40] sm:$0xff]  ;;  %v1740_v4 = vld [vmem:[%s2281_s1 + $0x58] sm:$0xff]  ;;  %v1731_v17 = vld [vmem:[%s2281_s1 + $0x10] sm:$0xff]  ;;  %s1728_s25 = sshll.u32 %s2285_s13, 7 }
   0xd   : > { %1758 = vmatpush.bf16.msra.mxu3 %v1734_v0  ;;  %281 = vmatpush.bf16.msra.mxu0 %v1734_v0  ;;  %v1743_v18 = vld [vmem:[%s2281_s1 + $0x70] sm:$0xff]  ;;  %v1736_v19 = vld [vmem:[%s2281_s1 + $0x38] sm:$0xff]  ;;  %v1730_v21 = vld [vmem:[%s2281_s1 + $0x8] sm:$0xff]  ;;  %s2214_s28 = scalar_lea.vmem %s2283_s3, %s1728_s25 }
   0xe   : > { %s1826_s23 = scalar_lea.vmem %s2280_s0, %s1765_s18  ;;  %v1739_v20 = vld [vmem:[%s2281_s1 + $0x50] sm:$0xff]  ;;  %v1742_v22 = vld [vmem:[%s2281_s1 + $0x68] sm:$0xff]  ;;  %v1749_v25 = vld [vmem:[%s2281_s1 + $0xa0] sm:$0xff] }
   0xf   : > { %v206_v5 = vld [vmem:[%s1826_s23 + $0x21] sm:$0xff]  ;;  %v207_v6 = vld [vmem:[%s1826_s23 + $0x29] sm:$0xff]  ;;  %v1752_v26 = vld [vmem:[%s2281_s1 + $0xb8] sm:$0xff] }
  0x10   : > { %1759 = vmatpush.bf16.msra.mxu1 %v1733_v1  ;;  %1760 = vmatpush.bf16.msra.mxu2 %v1733_v1  ;;  %v210_v7 = vld [vmem:[%s1826_s23 + $0x41] sm:$0xff]  ;;  %v211_v8 = vld [vmem:[%s1826_s23 + $0x49] sm:$0xff]  ;;  %v1840_v11 = vpack.c.bf16 %v207_v6, %v206_v5  ;;  %v208_v31 = vld [vmem:[%s1826_s23 + $0x31] sm:$0xff] }
  0x11   : > { %1761 = vmatpush.bf16.msra.mxu3 %v1733_v1  ;;  %282 = vmatpush.bf16.msra.mxu0 %v1733_v1  ;;  %v214_v9 = vld [vmem:[%s1826_s23 + $0x61] sm:$0xff]  ;;  %v215_v10 = vld [vmem:[%s1826_s23 + $0x69] sm:$0xff]  ;;  %v1842_v12 = vpack.c.bf16 %v211_v8, %v210_v7  ;;  %v209_v32 = vld [vmem:[%s1826_s23 + $0x39] sm:$0xff] }
  0x12   : > { %v202_v13 = vld [vmem:[%s1826_s23 + $0x1] sm:$0xff]  ;;  %v203_v14 = vld [vmem:[%s1826_s23 + $0x9] sm:$0xff]  ;;  %v1846_v15 = vpack.c.bf16 %v215_v10, %v214_v9  ;;  %v212_v33 = vld [vmem:[%s1826_s23 + $0x51] sm:$0xff]  ;;  %v1905_v39 = vpack.c.bf16 %v209_v32, %v208_v31 }
  0x13   : > { %v218_v16 = vpack.c.bf16 %v203_v14, %v202_v13  ;;  %v1735_v23 = vld [vmem:[%s2281_s1 + $0x30] sm:$0xff]  ;;  %v1738_v24 = vld [vmem:[%s2281_s1 + $0x48] sm:$0xff]  ;;  %v1729_v27 = vld [vmem:[%s2281_s1] sm:$0xff] }
  0x14   : > { %1762 = vmatpush.bf16.msra.mxu1 %v1732_v2  ;;  %1763 = vmatpush.bf16.msra.mxu2 %v1732_v2  ;;  %v1741_v28 = vld [vmem:[%s2281_s1 + $0x60] sm:$0xff]  ;;  %v1746_v29 = vld [vmem:[%s2281_s1 + $0x88] sm:$0xff]  ;;  %v1755_v30 = vld [vmem:[%s2281_s1 + $0xd0] sm:$0xff] }
  0x15   : > { %1764 = vmatpush.bf16.msra.mxu3 %v1732_v2  ;;  %283 = vmatpush.bf16.msra.mxu0 %v1732_v2  ;;  %v213_v34 = vld [vmem:[%s1826_s23 + $0x59] sm:$0xff]  ;;  %v216_v35 = vld [vmem:[%s1826_s23 + $0x71] sm:$0xff]  ;;  %v173_v44 = vld [vmem:[%s1826_s23 + $0x8] sm:$0xff] }
  0x16   : > { %v217_v36 = vld [vmem:[%s1826_s23 + $0x79] sm:$0xff]  ;;  %v204_v37 = vld [vmem:[%s1826_s23 + $0x11] sm:$0xff]  ;;  %v1907_v40 = vpack.c.bf16 %v213_v34, %v212_v33  ;;  %v416_v45 = vld [vmem:[%s1826_s23 + $0x2] sm:$0xff] }
  0x17   : > { %1518 = vmatmul.msk.bf16.vlgmr.msra.gmra.mxu1 %vm251_vm0, %v1840_v11  ;;  %1520 = vmatmul.msk.bf16.vlgmr.msra.gmra.mxu2 %vm251_vm0, %v1842_v12  ;;  %v205_v38 = vld [vmem:[%s1826_s23 + $0x19] sm:$0xff]  ;;  %v1909_v41 = vpack.c.bf16 %v217_v36, %v216_v35  ;;  %v417_v46 = vld [vmem:[%s1826_s23 + $0xa] sm:$0xff]  ;;  %v420_v62 = vld [vmem:[%s1826_s23 + $0x22] sm:$0xff] }
  0x18   : > { %494 = vmatpush.bf16.msrb.mxu2 %v1737_v3  ;;  %1522 = vmatmul.msk.bf16.vlgmr.msra.gmra.mxu3 %vm251_vm0, %v1846_v15  ;;  %v219_v42 = vpack.c.bf16 %v205_v38, %v204_v37  ;;  %v172_v43 = vld [vmem:[%s1826_s23] sm:$0xff]  ;;  %v554_v47 = vld [vmem:[%s1826_s23 + $0x10] sm:$0xff]  ;;  %v555_v48 = vld [vmem:[%s1826_s23 + $0x18] sm:$0xff]  ;;  %v432_v50 = vpack.c.bf16 %v417_v46, %v416_v45 }
  0x19   : > { %632 = vmatpush.bf16.msrb.mxu3 %v1740_v4  ;;  %1516 = vmatmul.msk.bf16.vlgmr.msra.gmra.mxu0 %vm251_vm0, %v218_v16  ;;  %v188_v49 = vpack.c.bf16 %v173_v44, %v172_v43  ;;  %v570_v51 = vpack.c.bf16 %v555_v48, %v554_v47  ;;  %v1748_v52 = vld [vmem:[%s2281_s1 + $0x98] sm:$0xff]  ;;  %v1751_v53 = vld [vmem:[%s2281_s1 + $0xb0] sm:$0xff]  ;;  %v1745_v54 = vld [vmem:[%s2281_s1 + $0x80] sm:$0xff] }
  0x1a   : > { %372 = vmatpush.bf16.msrb.mxu1 %v1731_v17  ;;  %770 = vmatpush.bf16.msrb.mxu0 %v1743_v18  ;;  %v418_v55 = vld [vmem:[%s1826_s23 + $0x12] sm:$0xff]  ;;  %v419_v56 = vld [vmem:[%s1826_s23 + $0x1a] sm:$0xff]  ;;  %v557_v58 = vld [vmem:[%s1826_s23 + $0x28] sm:$0xff] }
  0x1b   : > { %v556_v57 = vld [vmem:[%s1826_s23 + $0x20] sm:$0xff]  ;;  %v1941_v59 = vpack.c.bf16 %v419_v56, %v418_v55  ;;  %v1754_v61 = vld [vmem:[%s2281_s1 + $0xc8] sm:$0xff]  ;;  %v558_v0 = vld [vmem:[%s1826_s23 + $0x30] sm:$0xff] }
  0x1c   : > { %495 = vmatpush.bf16.msrb.mxu2 %v1736_v19  ;;  %v1943_v60 = vpack.c.bf16 %v557_v58, %v556_v57  ;;  %v421_v63 = vld [vmem:[%s1826_s23 + $0x2a] sm:$0xff]  ;;  %v559_v1 = vld [vmem:[%s1826_s23 + $0x38] sm:$0xff]  ;;  %v560_v6 = vld [vmem:[%s1826_s23 + $0x40] sm:$0xff] }
  0x1d   : > { %633 = vmatpush.bf16.msrb.mxu3 %v1739_v20  ;;  %v1959_v2 = vpack.c.bf16 %v421_v63, %v420_v62  ;;  %v1961_v3 = vpack.c.bf16 %v559_v1, %v558_v0  ;;  %v422_v4 = vld [vmem:[%s1826_s23 + $0x32] sm:$0xff]  ;;  %v423_v5 = vld [vmem:[%s1826_s23 + $0x3a] sm:$0xff]  ;;  %v561_v7 = vld [vmem:[%s1826_s23 + $0x48] sm:$0xff] }
  0x1e   : > { %373 = vmatpush.bf16.msrb.mxu1 %v1730_v21  ;;  %771 = vmatpush.bf16.msrb.mxu0 %v1742_v22  ;;  %v1975_v8 = vpack.c.bf16 %v423_v5, %v422_v4  ;;  %v1977_v9 = vpack.c.bf16 %v561_v7, %v560_v6  ;;  %v1747_v10 = vld [vmem:[%s2281_s1 + $0x90] sm:$0xff]  ;;  %v1750_v13 = vld [vmem:[%s2281_s1 + $0xa8] sm:$0xff]  ;;  %v1744_v14 = vld [vmem:[%s2281_s1 + $0x78] sm:$0xff] }
  0x1f   : > { %v424_v16 = vld [vmem:[%s1826_s23 + $0x42] sm:$0xff]  ;;  %v425_v17 = vld [vmem:[%s1826_s23 + $0x4a] sm:$0xff]  ;;  %v563_v19 = vld [vmem:[%s1826_s23 + $0x58] sm:$0xff] }
  0x20   : > { %496 = vmatpush.bf16.msrb.mxu2 %v1735_v23  ;;  %v562_v18 = vld [vmem:[%s1826_s23 + $0x50] sm:$0xff]  ;;  %v2000_v20 = vpack.c.bf16 %v425_v17, %v424_v16  ;;  %v1753_v22 = vld [vmem:[%s2281_s1 + $0xc0] sm:$0xff]  ;;  %v567_v32 = vld [vmem:[%s1826_s23 + $0x78] sm:$0xff] }
  0x21   : > { %634 = vmatpush.bf16.msrb.mxu3 %v1738_v24  ;;  %v2002_v21 = vpack.c.bf16 %v563_v19, %v562_v18  ;;  %v426_v23 = vld [vmem:[%s1826_s23 + $0x52] sm:$0xff]  ;;  %v427_v24 = vld [vmem:[%s1826_s23 + $0x5a] sm:$0xff]  ;;  %v569_v47 = vld [vmem:[%s1826_s23 + $0x88] sm:$0xff] }
  0x22   : > { %374 = vmatpush.bf16.msrb.mxu1 %v1729_v27  ;;  %772 = vmatpush.bf16.msrb.mxu0 %v1741_v28  ;;  %v2019_v27 = vpack.c.bf16 %v427_v24, %v426_v23  ;;  %v566_v31 = vld [vmem:[%s1826_s23 + $0x70] sm:$0xff]  ;;  %v431_v45 = vld [vmem:[%s1826_s23 + $0x7a] sm:$0xff] }
  0x23   : > { %v2039_v35 = vpack.c.bf16 %v567_v32, %v566_v31  ;;  %v430_v44 = vld [vmem:[%s1826_s23 + $0x72] sm:$0xff]  ;;  %v568_v46 = vld [vmem:[%s1826_s23 + $0x80] sm:$0xff] }
  0x24   : > { %1046 = vmatpush.bf16.msra.mxu2 %v1749_v25  ;;  %v564_v25 = vld [vmem:[%s1826_s23 + $0x60] sm:$0xff] }
  0x25   : > { %1184 = vmatpush.bf16.msra.mxu3 %v1752_v26  ;;  %v565_v26 = vld [vmem:[%s1826_s23 + $0x68] sm:$0xff] }
  0x26   : > { %908 = vmatpush.bf16.msra.mxu1 %v1746_v29  ;;  %1322 = vmatpush.bf16.msra.mxu0 %v1755_v30  ;;  %v2021_v28 = vpack.c.bf16 %v565_v26, %v564_v25  ;;  %v428_v29 = vld [vmem:[%s1826_s23 + $0x62] sm:$0xff]  ;;  %v429_v30 = vld [vmem:[%s1826_s23 + $0x6a] sm:$0xff] }
  0x27   : > { %1519 = vmatmul.msk.bf16.gmra.mxu1 %vm251_vm0, %v1905_v39  ;;  %1521 = vmatmul.msk.bf16.gmra.mxu2 %vm251_vm0, %v1907_v40  ;;  %v2035_v33 = vpack.c.bf16 %v429_v30, %v428_v29  ;;  %v706_v48 = vld [vmem:[%s1826_s23 + $0x81] sm:$0xff] }
  0x28   : > { %1523 = vmatmul.msk.bf16.gmra.mxu3 %vm251_vm0, %v1909_v41  ;;  %1047 = vmatpush.bf16.msra.mxu2 %v1748_v52  ;;  %v2065_v52 = vpack.c.bf16 %v431_v45, %v430_v44 }
  0x29   : > { %1517 = vmatmul.msk.bf16.gmra.mxu0 %vm251_vm0, %v219_v42  ;;  %1185 = vmatpush.bf16.msra.mxu3 %v1751_v53 }
  0x2a   : > { %909 = vmatpush.bf16.msra.mxu1 %v1745_v54  ;;  %1323 = vmatpush.bf16.msra.mxu0 %v1754_v61  ;;  %v2069_v54 = vpack.c.bf16 %v569_v47, %v568_v46 }
  0x2c   : > { %1048 = vmatpush.bf16.msra.mxu2 %v1747_v10 }
  0x2d   : > { %1186 = vmatpush.bf16.msra.mxu3 %v1750_v13 }
  0x2e   : > { %910 = vmatpush.bf16.msra.mxu1 %v1744_v14  ;;  %1324 = vmatpush.bf16.msra.mxu0 %v1753_v22 }
  0x37   : > { %1536 = vmatmul.msk.bf16.vlgmr.msrb.gmra.mxu1 %vm251_vm0, %v188_v49  ;;  %1562 = vmatmul.msk.bf16.vlgmr.msrb.gmra.mxu2 %vm251_vm0, %v432_v50  ;;  %v707_v49 = vld [vmem:[%s1826_s23 + $0x89] sm:$0xff] }
  0x38   : > { %1588 = vmatmul.msk.bf16.vlgmr.msrb.gmra.mxu3 %vm251_vm0, %v570_v51  ;;  %v2071_v55 = vpack.c.bf16 %v707_v49, %v706_v48 }
  0x39   : > { %1614 = vmatmul.msk.bf16.vlgmr.msrb.gmra.mxu0 %vm251_vm0, %v219_v42 }
  0x47   : > { %1537 = vmatmul.msk.bf16.gmra.mxu1 %vm251_vm0, %v570_v51  ;;  %1563 = vmatmul.msk.bf16.gmra.mxu2 %vm251_vm0, %v1941_v59 }
  0x48   : > { %1589 = vmatmul.msk.bf16.gmra.mxu3 %vm251_vm0, %v1943_v60 }
  0x49   : > { %1615 = vmatmul.msk.bf16.gmra.mxu0 %vm251_vm0, %v1840_v11 }
  0x57   : > { %1538 = vmatmul.msk.bf16.gmra.mxu1 %vm251_vm0, %v1943_v60  ;;  %1564 = vmatmul.msk.bf16.gmra.mxu2 %vm251_vm0, %v1959_v2 }
  0x58   : > { %1590 = vmatmul.msk.bf16.gmra.mxu3 %vm251_vm0, %v1961_v3 }
  0x59   : > { %1616 = vmatmul.msk.bf16.gmra.mxu0 %vm251_vm0, %v1905_v39 }
  0x67   : > { %1539 = vmatmul.msk.bf16.gmra.mxu1 %vm251_vm0, %v1961_v3  ;;  %1565 = vmatmul.msk.bf16.gmra.mxu2 %vm251_vm0, %v1975_v8 }
  0x68   : > { %1591 = vmatmul.msk.bf16.gmra.mxu3 %vm251_vm0, %v1977_v9 }
  0x69   : > { %1617 = vmatmul.msk.bf16.gmra.mxu0 %vm251_vm0, %v1842_v12 }
  0x77   : > { %1540 = vmatmul.msk.bf16.gmra.mxu1 %vm251_vm0, %v1977_v9  ;;  %1566 = vmatmul.msk.bf16.gmra.mxu2 %vm251_vm0, %v2000_v20 }
  0x78   : > { %1592 = vmatmul.msk.bf16.gmra.mxu3 %vm251_vm0, %v2002_v21 }
  0x79   : > { %1618 = vmatmul.msk.bf16.gmra.mxu0 %vm251_vm0, %v1907_v40 }
  0x87   : > { %1541 = vmatmul.msk.bf16.gmra.mxu1 %vm251_vm0, %v2002_v21  ;;  %1567 = vmatmul.msk.bf16.gmra.mxu2 %vm251_vm0, %v2019_v27 }
  0x88   : > { %1593 = vmatmul.msk.bf16.gmra.mxu3 %vm251_vm0, %v2021_v28 }
  0x89   : > { %1619 = vmatmul.msk.bf16.gmra.mxu0 %vm251_vm0, %v1846_v15 }
  0x94   : > { %v2037_v34 = vpop.f32.mrf.mxu1 }
  0x96   : > { %v285_v36 = vpop.f32.mrf.mxu0 }
  0x97   : > { %1542 = vmatmul.msk.bf16.gmra.mxu1 %vm251_vm0, %v2021_v28  ;;  %1568 = vmatmul.msk.bf16.gmra.mxu2 %vm251_vm0, %v2035_v33 }
  0x98   : > { %1594 = vmatmul.msk.bf16.gmra.mxu3 %vm251_vm0, %v2039_v35 }
  0x99   : > { %1620 = vmatmul.msk.bf16.gmra.mxu0 %vm251_vm0, %v1909_v41 }
  0x9a   : > { %v2049_v37 = vpop.f32.mrf.mxu2 }
  0x9b   : > { %v2051_v38 = vpop.f32.mrf.mxu3 }
  0x9c   : > { %v2053_v42 = vpop.f32.mrf.mxu1 }
  0x9e   : > { %v287_v43 = vpop.f32.mrf.mxu0 }
  0xa2   : > { %v2061_v50 = vpop.f32.mrf.mxu2 }
  0xa3   : > { %v2063_v51 = vpop.f32.mrf.mxu3 }
  0xa4   : > { %v2067_v53 = vpop.f32.mrf.mxu1 }
  0xa6   : > { %v290_v56 = vpop.f32.mrf.mxu0 }
  0xa7   : > { %1543 = vmatmul.msk.bf16.gmra.mxu1 %vm251_vm0, %v2039_v35  ;;  %1569 = vmatmul.msk.bf16.gmra.mxu2 %vm251_vm0, %v2065_v52 }
  0xa8   : > { %1595 = vmatmul.msk.bf16.gmra.mxu3 %vm251_vm0, %v2069_v54 }
  0xa9   : > { %1621 = vmatmul.msk.bf16.gmra.mxu0 %vm251_vm0, %v2071_v55 }
  0xaa   : > { %v2081_v57 = vpop.f32.mrf.mxu2 }
  0xab   : > { %v2083_v58 = vpop.f32.mrf.mxu3 }
  0xac   : > { %v2085_v61 = vpop.f32.mrf.mxu1 }
  0xae   : > { %v292_v62 = vpop.f32.mrf.mxu0 }
  0xb2   : > { %v2087_v63 = vpop.f32.mrf.mxu2 }
  0xb3   : > { %v2089_v0 = vpop.f32.mrf.mxu3 }
  0xb4   : > { %v376_v1 = vpop.f32.mrf.mxu1 }
  0xb5   : > { %v377_v4 = vadd.f32 %v376_v1, %v285_v36 }
  0xb6   : > { %v774_v5 = vpop.f32.mrf.mxu0 }
  0xb7   : > { %1640 = vmatmul.msk.bf16.vlgmr.msra.gmra.mxu1 %vm251_vm0, %v1941_v59  ;;  %1666 = vmatmul.msk.bf16.vlgmr.msra.gmra.mxu2 %vm251_vm0, %v1943_v60 }
  0xb8   : > { %1692 = vmatmul.msk.bf16.vlgmr.msra.gmra.mxu3 %vm251_vm0, %v1840_v11 }
  0xb9   : > { %1718 = vmatmul.msk.bf16.vlgmr.msra.gmra.mxu0 %vm251_vm0, %v1959_v2 }
  0xba   : > { %v498_v6 = vpop.f32.mrf.mxu2 }
  0xbb   : > { %v538_v7 = vadd.f32 %v498_v6, %v377_v4  ;;  %v636_v10 = vpop.f32.mrf.mxu3 }
  0xbc   : > { %v378_v13 = vpop.f32.mrf.mxu1 }
  0xbd   : > { %v676_v14 = vadd.f32 %v636_v10, %v538_v7  ;;  %v379_v16 = vadd.f32 %v378_v13, %v287_v43 }
  0xbe   : > { %v776_v17 = vpop.f32.mrf.mxu0 }
  0xbf   : > { %v2099_v18 = vadd.f32 %v774_v5, %v676_v14 }
  0xc2   : > { %v500_v19 = vpop.f32.mrf.mxu2 }
  0xc3   : > { %v539_v59 = vadd.f32 %v500_v19, %v379_v16  ;;  %v638_v22 = vpop.f32.mrf.mxu3 }
  0xc4   : > { %v381_v23 = vpop.f32.mrf.mxu1 }
  0xc5   : > { %v677_v60 = vadd.f32 %v638_v22, %v539_v59  ;;  %v382_v24 = vadd.f32 %v381_v23, %v290_v56 }
  0xc6   : > { %v779_v25 = vpop.f32.mrf.mxu0 }
  0xc7   : > { %1641 = vmatmul.msk.bf16.gmra.mxu1 %vm251_vm0, %v1959_v2  ;;  %1667 = vmatmul.msk.bf16.gmra.mxu2 %vm251_vm0, %v1961_v3  ;;  %v2105_v11 = vadd.f32 %v776_v17, %v677_v60 }
  0xc8   : > { %1693 = vmatmul.msk.bf16.gmra.mxu3 %vm251_vm0, %v1905_v39 }
  0xc9   : > { %1719 = vmatmul.msk.bf16.gmra.mxu0 %vm251_vm0, %v1975_v8 }
  0xca   : > { %v503_v26 = vpop.f32.mrf.mxu2 }
  0xcb   : > { %v540_v29 = vadd.f32 %v503_v26, %v382_v24  ;;  %v641_v30 = vpop.f32.mrf.mxu3 }
  0xcc   : > { %v383_v31 = vpop.f32.mrf.mxu1 }
  0xcd   : > { %v678_v32 = vadd.f32 %v641_v30, %v540_v29  ;;  %v384_v36 = vadd.f32 %v383_v31, %v292_v62 }
  0xce   : > { %v781_v43 = vpop.f32.mrf.mxu0 }
  0xcf   : > { %v2111_v44 = vadd.f32 %v779_v25, %v678_v32 }
  0xd2   : > { %v505_v2 = vpop.f32.mrf.mxu2 }
  0xd3   : > { %v541_v45 = vadd.f32 %v505_v2, %v384_v36  ;;  %v643_v3 = vpop.f32.mrf.mxu3 }
  0xd4   : > { %v386_v46 = vpop.f32.mrf.mxu1 }
  0xd5   : > { %v679_v47 = vadd.f32 %v643_v3, %v541_v45  ;;  %v387_v48 = vadd.f32 %v386_v46, %v2037_v34 }
  0xd6   : > { %v784_v39 = vpop.f32.mrf.mxu0 }
  0xd7   : > { %1642 = vmatmul.msk.bf16.gmra.mxu1 %vm251_vm0, %v1975_v8  ;;  %1668 = vmatmul.msk.bf16.gmra.mxu2 %vm251_vm0, %v1977_v9  ;;  %v2118_v49 = vadd.f32 %v781_v43, %v679_v47 }
  0xd8   : > { %1694 = vmatmul.msk.bf16.gmra.mxu3 %vm251_vm0, %v1842_v12 }
  0xd9   : > { %1720 = vmatmul.msk.bf16.gmra.mxu0 %vm251_vm0, %v2000_v20 }
  0xda   : > { %v508_v56 = vpop.f32.mrf.mxu2 }
  0xdb   : > { %v542_v62 = vadd.f32 %v508_v56, %v387_v48  ;;  %v646_v1 = vpop.f32.mrf.mxu3 }
  0xdc   : > { %v388_v4 = vpop.f32.mrf.mxu1 }
  0xdd   : > { %v680_v34 = vadd.f32 %v646_v1, %v542_v62  ;;  %v389_v5 = vadd.f32 %v388_v4, %v2053_v42 }
  0xde   : > { %v786_v6 = vpop.f32.mrf.mxu0 }
  0xdf   : > { %v2125_v8 = vadd.f32 %v784_v39, %v680_v34 }
  0xe2   : > { %v510_v7 = vpop.f32.mrf.mxu2 }
  0xe3   : > { %v543_v9 = vadd.f32 %v510_v7, %v389_v5  ;;  %v648_v10 = vpop.f32.mrf.mxu3  ;;  %v1257_v7 = vld [vmem:[%s1826_s23 + $0x8a] sm:$0xff] }
  0xe4   : > { %v391_v13 = vpop.f32.mrf.mxu1 }
  0xe5   : > { %v681_v14 = vadd.f32 %v648_v10, %v543_v9  ;;  %v392_v12 = vadd.f32 %v391_v13, %v2067_v53 }
  0xe6   : > { %v789_v16 = vpop.f32.mrf.mxu0 }
  0xe7   : > { %1643 = vmatmul.msk.bf16.gmra.mxu1 %vm251_vm0, %v2000_v20  ;;  %1669 = vmatmul.msk.bf16.gmra.mxu2 %vm251_vm0, %v2002_v21  ;;  %v2132_v17 = vadd.f32 %v786_v6, %v681_v14  ;;  %v1256_v6 = vld [vmem:[%s1826_s23 + $0x82] sm:$0xff] }
  0xe8   : > { %1695 = vmatmul.msk.bf16.gmra.mxu3 %vm251_vm0, %v1907_v40  ;;  %v1266_v14 = vpack.c.bf16 %v1257_v7, %v1256_v6 }
  0xe9   : > { %1721 = vmatmul.msk.bf16.gmra.mxu0 %vm251_vm0, %v2019_v27 }
  0xea   : > { %v513_v42 = vpop.f32.mrf.mxu2 }
  0xeb   : > { %v544_v19 = vadd.f32 %v513_v42, %v392_v12  ;;  %v651_v59 = vpop.f32.mrf.mxu3 }
  0xec   : > { %v393_v22 = vpop.f32.mrf.mxu1 }
  0xed   : > { %v682_v53 = vadd.f32 %v651_v59, %v544_v19  ;;  %v394_v23 = vadd.f32 %v393_v22, %v2085_v61 }
  0xee   : > { %v791_v60 = vpop.f32.mrf.mxu0 }
  0xef   : > { %v2139_v20 = vadd.f32 %v789_v16, %v682_v53 }
  0xf2   : > { %v515_v24 = vpop.f32.mrf.mxu2 }
  0xf3   : > { %v545_v21 = vadd.f32 %v515_v24, %v394_v23  ;;  %v653_v25 = vpop.f32.mrf.mxu3  ;;  %v1120_v24 = vld [vmem:[%s1826_s23 + $0x91] sm:$0xff] }
  0xf4   : > { %v396_v26 = vpop.f32.mrf.mxu1 }
  0xf5   : > { %v683_v29 = vadd.f32 %v653_v25, %v545_v21  ;;  %v397_v61 = vadd.f32 %v396_v26, %v2049_v37  ;;  %v1121_v25 = vld [vmem:[%s1826_s23 + $0x99] sm:$0xff] }
  0xf6   : > { %v794_v30 = vpop.f32.mrf.mxu0  ;;  %v1259_v26 = vld [vmem:[%s1826_s23 + $0x9a] sm:$0xff] }
  0xf7   : > { %1644 = vmatmul.msk.bf16.gmra.mxu1 %vm251_vm0, %v2019_v27  ;;  %1670 = vmatmul.msk.bf16.gmra.mxu2 %vm251_vm0, %v2021_v28  ;;  %v2145_v40 = vadd.f32 %v791_v60, %v683_v29  ;;  %v983_v60 = vld [vmem:[%s1826_s23 + $0x98] sm:$0xff] }
  0xf8   : > { %1696 = vmatmul.msk.bf16.gmra.mxu3 %vm251_vm0, %v1846_v15 }
  0xf9   : > { %1722 = vmatmul.msk.bf16.gmra.mxu0 %vm251_vm0, %v2035_v33 }
  0xfa   : > { %v518_v31 = vpop.f32.mrf.mxu2 }
  0xfb   : > { %v546_v32 = vadd.f32 %v518_v31, %v397_v61  ;;  %v656_v36 = vpop.f32.mrf.mxu3 }
  0xfc   : > { %v398_v43 = vpop.f32.mrf.mxu1 }
  0xfd   : > { %v684_v2 = vadd.f32 %v656_v36, %v546_v32  ;;  %v399_v28 = vadd.f32 %v398_v43, %v2061_v50  ;;  %v1129_v32 = vpack.c.bf16 %v1121_v25, %v1120_v24 }
  0xfe   : > { %v796_v45 = vpop.f32.mrf.mxu0 }
  0xff   : > { %v2152_v27 = vadd.f32 %v794_v30, %v684_v2 }
 0x102   : > { %v520_v3 = vpop.f32.mrf.mxu2 }
 0x103   : > { %v547_v46 = vadd.f32 %v520_v3, %v399_v28  ;;  %v658_v47 = vpop.f32.mrf.mxu3 }
 0x104   : > { %v401_v48 = vpop.f32.mrf.mxu1 }
 0x105   : > { %v685_v15 = vadd.f32 %v658_v47, %v547_v46  ;;  %v402_v50 = vadd.f32 %v401_v48, %v2081_v57 }
 0x106   : > { %v799_v39 = vpop.f32.mrf.mxu0 }
 0x107   : > { %1645 = vmatmul.msk.bf16.gmra.mxu1 %vm251_vm0, %v2035_v33  ;;  %1671 = vmatmul.msk.bf16.gmra.mxu2 %vm251_vm0, %v2039_v35  ;;  %v2159_v37 = vadd.f32 %v796_v45, %v685_v15 }
 0x108   : > { %1697 = vmatmul.msk.bf16.gmra.mxu3 %vm251_vm0, %v1909_v41 }
 0x109   : > { %1723 = vmatmul.msk.bf16.gmra.mxu0 %vm251_vm0, %v2065_v52 }
 0x10a   : > { %v523_v56 = vpop.f32.mrf.mxu2 }
 0x10b   : > { %v548_v62 = vadd.f32 %v523_v56, %v402_v50  ;;  %v661_v1 = vpop.f32.mrf.mxu3 }
 0x10c   : > { %v403_v4 = vpop.f32.mrf.mxu1 }
 0x10d   : > { %v686_v34 = vadd.f32 %v661_v1, %v548_v62  ;;  %v404_v35 = vadd.f32 %v403_v4, %v2087_v63 }
 0x10e   : > { %v801_v5 = vpop.f32.mrf.mxu0 }
 0x10f   : > { %v2166_v33 = vadd.f32 %v799_v39, %v686_v34 }
 0x112   : > { %v525_v9 = vpop.f32.mrf.mxu2 }
 0x113   : > { %v549_v10 = vadd.f32 %v525_v9, %v404_v35  ;;  %v663_v41 = vpop.f32.mrf.mxu3 }
 0x114   : > { %v406_v13 = vpop.f32.mrf.mxu1 }
 0x115   : > { %v687_v12 = vadd.f32 %v663_v41, %v549_v10  ;;  %v407_v16 = vadd.f32 %v406_v13, %v2051_v38 }
 0x116   : > { %v804_v57 = vpop.f32.mrf.mxu0 }
 0x117   : > { %1646 = vmatmul.msk.bf16.gmra.mxu1 %vm251_vm0, %v2065_v52  ;;  %1672 = vmatmul.msk.bf16.gmra.mxu2 %vm251_vm0, %v2069_v54  ;;  %v2175_v63 = vadd.f32 %v801_v5, %v687_v12  ;;  %v982_v54 = vld [vmem:[%s1826_s23 + $0x90] sm:$0xff] }
 0x118   : > { %1698 = vmatmul.msk.bf16.gmra.mxu3 %vm251_vm0, %v2071_v55  ;;  %v1258_v55 = vld [vmem:[%s1826_s23 + $0x92] sm:$0xff]  ;;  %v991_v38 = vpack.c.bf16 %v983_v60, %v982_v54 }
 0x119   : > { %1724 = vmatmul.msk.bf16.gmra.mxu0 %vm251_vm0, %v1266_v14  ;;  %v1267_v36 = vpack.c.bf16 %v1259_v26, %v1258_v55 }
 0x11a   : > { %v528_v42 = vpop.f32.mrf.mxu2 }
 0x11b   : > { %v550_v19 = vadd.f32 %v528_v42, %v407_v16  ;;  %v666_v59 = vpop.f32.mrf.mxu3 }
 0x11c   : > { %v408_v22 = vpop.f32.mrf.mxu1 }
 0x11d   : > { %v688_v52 = vadd.f32 %v666_v59, %v550_v19  ;;  %v409_v21 = vadd.f32 %v408_v22, %v2063_v51 }
 0x11e   : > { %v806_v53 = vpop.f32.mrf.mxu0 }
 0x11f   : > { %v2181_v23 = vadd.f32 %v804_v57, %v688_v52 }
 0x122   : > { %v530_v29 = vpop.f32.mrf.mxu2 }
 0x123   : > { %v551_v30 = vadd.f32 %v530_v29, %v409_v21  ;;  %v668_v61 = vpop.f32.mrf.mxu3 }
 0x124   : > { %v411_v31 = vpop.f32.mrf.mxu1 }
 0x125   : > { %v689_v43 = vadd.f32 %v668_v61, %v551_v30  ;;  %v412_v51 = vadd.f32 %v411_v31, %v2083_v58 }
 0x126   : > { %v809_v2 = vpop.f32.mrf.mxu0 }
 0x127   : > { %1647 = vmatmul.msk.bf16.gmra.mxu1 %vm251_vm0, %v1266_v14  ;;  %1673 = vmatmul.msk.bf16.gmra.mxu2 %vm251_vm0, %v991_v38  ;;  %v2192_v45 = vadd.f32 %v806_v53, %v689_v43 }
 0x128   : > { %1699 = vmatmul.msk.bf16.gmra.mxu3 %vm251_vm0, %v1129_v32 }
 0x129   : > { %1725 = vmatmul.msk.bf16.gmra.mxu0 %vm251_vm0, %v1267_v36 }
 0x12a   : > { %v533_v28 = vpop.f32.mrf.mxu2 }
 0x12b   : > { %v552_v3 = vadd.f32 %v533_v28, %v412_v51  ;;  %v671_v46 = vpop.f32.mrf.mxu3 }
 0x12c   : > { %v413_v47 = vpop.f32.mrf.mxu1 }
 0x12d   : > { %v690_v48 = vadd.f32 %v671_v46, %v552_v3  ;;  %v414_v50 = vadd.f32 %v413_v47, %v2089_v0  ;;  %v2206_v0 = vld [vmem:[%s2282_s2] ss:$0 sm:$0xff] }
 0x12e   : > { %v811_v15 = vpop.f32.mrf.mxu0 }
 0x12f   : > { %v2197_v39 = vadd.f32 %v809_v2, %v690_v48 }
 0x132   : > { %v535_v56 = vpop.f32.mrf.mxu2 }
 0x133   : > { %v553_v62 = vadd.f32 %v535_v56, %v414_v50  ;;  %v673_v1 = vpop.f32.mrf.mxu3 }
 0x134   : > { %v912_v4 = vpop.f32.mrf.mxu1 }
 0x135   : > { %v691_v34 = vadd.f32 %v673_v1, %v553_v62  ;;  %v952_v58 = vadd.f32 %v912_v4, %v2099_v18 }
 0x136   : > { %v1326_v5 = vpop.f32.mrf.mxu0 }
 0x137   : > { %v2200_v35 = vadd.f32 %v811_v15, %v691_v34 }
 0x13a   : > { %v1050_v6 = vpop.f32.mrf.mxu2 }
 0x13b   : > { %v1090_v7 = vadd.f32 %v1050_v6, %v952_v58  ;;  %v1188_v9 = vpop.f32.mrf.mxu3 }
 0x13c   : > { %v914_v10 = vpop.f32.mrf.mxu1 }
 0x13d   : > { %v1228_v41 = vadd.f32 %v1188_v9, %v1090_v7  ;;  %v953_v57 = vadd.f32 %v914_v10, %v2105_v11 }
 0x13e   : > { %v1328_v13 = vpop.f32.mrf.mxu0 }
 0x13f   : > { %v1366_v14 = vadd.f32 %v1326_v5, %v1228_v41 }
 0x141   : > { %v1386_v12 = vadd.f32 %v2206_v0, %v1366_v14 }
 0x142   : > { %v1052_v18 = vpop.f32.mrf.mxu2 }
 0x143   : > { %v1402_v16 = vmax.f32 %v1386_v12, 0.0  ;;  %v1091_v42 = vadd.f32 %v1052_v18, %v953_v57  ;;  %v1190_v19 = vpop.f32.mrf.mxu3 }
 0x144   : > { %v917_v59 = vpop.f32.mrf.mxu1 }
 0x145   : > { %1419 = vst.msk [vmem:[%s2214_s28] sm:$0xff] %vm1418_vm1, %v1402_v16  ;;  %v1229_v22 = vadd.f32 %v1190_v19, %v1091_v42  ;;  %v954_v54 = vadd.f32 %v917_v59, %v2111_v44 }
 0x146   : > { %v1331_v52 = vpop.f32.mrf.mxu0 }
 0x147   : > { %v1367_v53 = vadd.f32 %v1328_v13, %v1229_v22 }
 0x149   : > { %v1387_v11 = vadd.f32 %v2206_v0, %v1367_v53 }
 0x14a   : > { %v1055_v60 = vpop.f32.mrf.mxu2 }
 0x14b   : > { %v1403_v24 = vmax.f32 %v1387_v11, 0.0  ;;  %v1092_v21 = vadd.f32 %v1055_v60, %v954_v54  ;;  %v1193_v25 = vpop.f32.mrf.mxu3 }
 0x14c   : > { %v919_v55 = vpop.f32.mrf.mxu1 }
 0x14d   : > { %1420 = vst.msk [vmem:[%s2214_s28 + $0x8] sm:$0xff] %vm1418_vm1, %v1403_v24  ;;  %v1230_v26 = vadd.f32 %v1193_v25, %v1092_v21  ;;  %v955_v38 = vadd.f32 %v919_v55, %v2118_v49 }
 0x14e   : > { %v1333_v29 = vpop.f32.mrf.mxu0 }
 0x14f   : > { %v1368_v30 = vadd.f32 %v1331_v52, %v1230_v26 }
 0x151   : > { %v1388_v61 = vadd.f32 %v2206_v0, %v1368_v30 }
 0x152   : > { %v1057_v31 = vpop.f32.mrf.mxu2 }
 0x153   : > { %v1404_v32 = vmax.f32 %v1388_v61, 0.0  ;;  %v1093_v36 = vadd.f32 %v1057_v31, %v955_v38  ;;  %v1195_v44 = vpop.f32.mrf.mxu3 }
 0x154   : > { %v922_v43 = vpop.f32.mrf.mxu1 }
 0x155   : > { %1421 = vst.msk [vmem:[%s2214_s28 + $0x10] sm:$0xff] %vm1418_vm1, %v1404_v32  ;;  %v1231_v2 = vadd.f32 %v1195_v44, %v1093_v36  ;;  %v956_v46 = vadd.f32 %v922_v43, %v2125_v8 }
 0x156   : > { %v1336_v51 = vpop.f32.mrf.mxu0 }
 0x157   : > { %v1369_v28 = vadd.f32 %v1333_v29, %v1231_v2 }
 0x159   : > { %v1389_v3 = vadd.f32 %v2206_v0, %v1369_v28 }
 0x15a   : > { %v1060_v47 = vpop.f32.mrf.mxu2 }
 0x15b   : > { %v1405_v48 = vmax.f32 %v1389_v3, 0.0  ;;  %v1094_v15 = vadd.f32 %v1060_v47, %v956_v46  ;;  %v1198_v49 = vpop.f32.mrf.mxu3 }
 0x15c   : > { %v924_v50 = vpop.f32.mrf.mxu1 }
 0x15d   : > { %1422 = vst.msk [vmem:[%s2214_s28 + $0x18] sm:$0xff] %vm1418_vm1, %v1405_v48  ;;  %v1232_v56 = vadd.f32 %v1198_v49, %v1094_v15  ;;  %v957_v34 = vadd.f32 %v924_v50, %v2132_v17 }
 0x15e   : > { %v1338_v62 = vpop.f32.mrf.mxu0 }
 0x15f   : > { %v1370_v1 = vadd.f32 %v1336_v51, %v1232_v56 }
 0x161   : > { %v1390_v4 = vadd.f32 %v2206_v0, %v1370_v1 }
 0x162   : > { %v1062_v5 = vpop.f32.mrf.mxu2 }
 0x163   : > { %v1406_v58 = vmax.f32 %v1390_v4, 0.0  ;;  %v1095_v6 = vadd.f32 %v1062_v5, %v957_v34  ;;  %v1200_v8 = vpop.f32.mrf.mxu3 }
 0x164   : > { %v927_v7 = vpop.f32.mrf.mxu1 }
 0x165   : > { %1423 = vst.msk [vmem:[%s2214_s28 + $0x20] sm:$0xff] %vm1418_vm1, %v1406_v58  ;;  %v1233_v9 = vadd.f32 %v1200_v8, %v1095_v6  ;;  %v958_v14 = vadd.f32 %v927_v7, %v2139_v20 }
 0x166   : > { %v1341_v10 = vpop.f32.mrf.mxu0 }
 0x167   : > { %v1371_v41 = vadd.f32 %v1338_v62, %v1233_v9 }
 0x169   : > { %v1391_v13 = vadd.f32 %v2206_v0, %v1371_v41 }
 0x16a   : > { %v1065_v12 = vpop.f32.mrf.mxu2 }
 0x16b   : > { %v1407_v57 = vmax.f32 %v1391_v13, 0.0  ;;  %v1096_v18 = vadd.f32 %v1065_v12, %v958_v14  ;;  %v1203_v17 = vpop.f32.mrf.mxu3 }
 0x16c   : > { %v929_v16 = vpop.f32.mrf.mxu1 }
 0x16d   : > { %1424 = vst.msk [vmem:[%s2214_s28 + $0x28] sm:$0xff] %vm1418_vm1, %v1407_v57  ;;  %v1234_v42 = vadd.f32 %v1203_v17, %v1096_v18  ;;  %v959_v52 = vadd.f32 %v929_v16, %v2145_v40 }
 0x16e   : > { %v1343_v19 = vpop.f32.mrf.mxu0 }
 0x16f   : > { %v1372_v59 = vadd.f32 %v1341_v10, %v1234_v42 }
 0x171   : > { %v1392_v22 = vadd.f32 %v2206_v0, %v1372_v59 }
 0x172   : > { %v1067_v53 = vpop.f32.mrf.mxu2 }
 0x173   : > { %v1408_v11 = vmax.f32 %v1392_v22, 0.0  ;;  %v1097_v54 = vadd.f32 %v1067_v53, %v959_v52  ;;  %v1205_v20 = vpop.f32.mrf.mxu3 }
 0x174   : > { %v932_v60 = vpop.f32.mrf.mxu1 }
 0x175   : > { %1425 = vst.msk [vmem:[%s2214_s28 + $0x30] sm:$0xff] %vm1418_vm1, %v1408_v11  ;;  %v1235_v24 = vadd.f32 %v1205_v20, %v1097_v54  ;;  %v960_v26 = vadd.f32 %v932_v60, %v2152_v27 }
 0x176   : > { %v1346_v21 = vpop.f32.mrf.mxu0 }
 0x177   : > { %v1373_v25 = vadd.f32 %v1343_v19, %v1235_v24 }
 0x179   : > { %v1393_v55 = vadd.f32 %v2206_v0, %v1373_v25 }
 0x17a   : > { %v1070_v29 = vpop.f32.mrf.mxu2 }
 0x17b   : > { %v1409_v30 = vmax.f32 %v1393_v55, 0.0  ;;  %v1098_v61 = vadd.f32 %v1070_v29, %v960_v26  ;;  %v1208_v40 = vpop.f32.mrf.mxu3 }
 0x17c   : > { %v934_v38 = vpop.f32.mrf.mxu1 }
 0x17d   : > { %1426 = vst.msk [vmem:[%s2214_s28 + $0x38] sm:$0xff] %vm1418_vm1, %v1409_v30  ;;  %v1236_v31 = vadd.f32 %v1208_v40, %v1098_v61  ;;  %v961_v43 = vadd.f32 %v934_v38, %v2159_v37 }
 0x17e   : > { %v1348_v32 = vpop.f32.mrf.mxu0 }
 0x17f   : > { %v1374_v36 = vadd.f32 %v1346_v21, %v1236_v31 }
 0x181   : > { %v1394_v44 = vadd.f32 %v2206_v0, %v1374_v36 }
 0x182   : > { %v1072_v2 = vpop.f32.mrf.mxu2 }
 0x183   : > { %v1410_v51 = vmax.f32 %v1394_v44, 0.0  ;;  %v1099_v28 = vadd.f32 %v1072_v2, %v961_v43  ;;  %v1210_v27 = vpop.f32.mrf.mxu3 }
 0x184   : > { %v937_v3 = vpop.f32.mrf.mxu1 }
 0x185   : > { %1427 = vst.msk [vmem:[%s2214_s28 + $0x40] sm:$0xff] %vm1418_vm1, %v1410_v51  ;;  %v1237_v46 = vadd.f32 %v1210_v27, %v1099_v28  ;;  %v962_v49 = vadd.f32 %v937_v3, %v2166_v33 }
 0x186   : > { %v1351_v47 = vpop.f32.mrf.mxu0 }
 0x187   : > { %v1375_v48 = vadd.f32 %v1348_v32, %v1237_v46 }
 0x189   : > { %v1395_v15 = vadd.f32 %v2206_v0, %v1375_v48 }
 0x18a   : > { %v1075_v50 = vpop.f32.mrf.mxu2 }
 0x18b   : > { %v1411_v56 = vmax.f32 %v1395_v15, 0.0  ;;  %v1100_v62 = vadd.f32 %v1075_v50, %v962_v49  ;;  %v1213_v37 = vpop.f32.mrf.mxu3 }
 0x18c   : > { %v939_v1 = vpop.f32.mrf.mxu1 }
 0x18d   : > { %1428 = vst.msk [vmem:[%s2214_s28 + $0x48] sm:$0xff] %vm1418_vm1, %v1411_v56  ;;  %v1238_v4 = vadd.f32 %v1213_v37, %v1100_v62  ;;  %v963_v6 = vadd.f32 %v939_v1, %v2175_v63 }
 0x18e   : > { %v1353_v34 = vpop.f32.mrf.mxu0 }
 0x18f   : > { %v1376_v5 = vadd.f32 %v1351_v47, %v1238_v4 }
 0x191   : > { %v1396_v58 = vadd.f32 %v2206_v0, %v1376_v5 }
 0x192   : > { %v1077_v8 = vpop.f32.mrf.mxu2 }
 0x193   : > { %v1412_v7 = vmax.f32 %v1396_v58, 0.0  ;;  %v1101_v9 = vadd.f32 %v1077_v8, %v963_v6  ;;  %v1215_v33 = vpop.f32.mrf.mxu3 }
 0x194   : > { %v942_v10 = vpop.f32.mrf.mxu1 }
 0x195   : > { %1429 = vst.msk [vmem:[%s2214_s28 + $0x50] sm:$0xff] %vm1418_vm1, %v1412_v7  ;;  %v1239_v41 = vadd.f32 %v1215_v33, %v1101_v9  ;;  %v964_v57 = vadd.f32 %v942_v10, %v2181_v23 }
 0x196   : > { %v1356_v14 = vpop.f32.mrf.mxu0 }
 0x197   : > { %v1377_v13 = vadd.f32 %v1353_v34, %v1239_v41 }
 0x199   : > { %v1397_v12 = vadd.f32 %v2206_v0, %v1377_v13 }
 0x19a   : > { %v1080_v18 = vpop.f32.mrf.mxu2 }
 0x19b   : > { %v1413_v17 = vmax.f32 %v1397_v12, 0.0  ;;  %v1102_v16 = vadd.f32 %v1080_v18, %v964_v57  ;;  %v1218_v63 = vpop.f32.mrf.mxu3 }
 0x19c   : > { %v944_v42 = vpop.f32.mrf.mxu1 }
 0x19d   : > { %1430 = vst.msk [vmem:[%s2214_s28 + $0x58] sm:$0xff] %vm1418_vm1, %v1413_v17  ;;  %v1240_v19 = vadd.f32 %v1218_v63, %v1102_v16  ;;  %v965_v52 = vadd.f32 %v944_v42, %v2192_v45 }
 0x19e   : > { %v1358_v53 = vpop.f32.mrf.mxu0 }
 0x19f   : > { %v1378_v59 = vadd.f32 %v1356_v14, %v1240_v19 }
 0x1a1   : > { %v1398_v22 = vadd.f32 %v2206_v0, %v1378_v59 }
 0x1a2   : > { %v1082_v11 = vpop.f32.mrf.mxu2 }
 0x1a3   : > { %v1414_v54 = vmax.f32 %v1398_v22, 0.0  ;;  %v1103_v20 = vadd.f32 %v1082_v11, %v965_v52  ;;  %v1220_v23 = vpop.f32.mrf.mxu3 }
 0x1a4   : > { %v947_v60 = vpop.f32.mrf.mxu1 }
 0x1a5   : > { %1431 = vst.msk [vmem:[%s2214_s28 + $0x60] sm:$0xff] %vm1418_vm1, %v1414_v54  ;;  %v1241_v24 = vadd.f32 %v1220_v23, %v1103_v20  ;;  %v966_v55 = vadd.f32 %v947_v60, %v2197_v39 }
 0x1a6   : > { %v1361_v61 = vpop.f32.mrf.mxu0 }
 0x1a7   : > { %v1379_v21 = vadd.f32 %v1358_v53, %v1241_v24 }
 0x1a9   : > { %v1399_v25 = vadd.f32 %v2206_v0, %v1379_v21 }
 0x1aa   : > { %v1085_v26 = vpop.f32.mrf.mxu2 }
 0x1ab   : > { %v1415_v29 = vmax.f32 %v1399_v25, 0.0  ;;  %v1104_v30 = vadd.f32 %v1085_v26, %v966_v55  ;;  %v1223_v45 = vpop.f32.mrf.mxu3 }
 0x1ac   : > { %v949_v38 = vpop.f32.mrf.mxu1 }
 0x1ad   : > { %1432 = vst.msk [vmem:[%s2214_s28 + $0x68] sm:$0xff] %vm1418_vm1, %v1415_v29  ;;  %v1242_v40 = vadd.f32 %v1223_v45, %v1104_v30  ;;  %v967_v36 = vadd.f32 %v949_v38, %v2200_v35 }
 0x1ae   : > { %v1363_v28 = vpop.f32.mrf.mxu0 }
 0x1af   : > { %v1380_v31 = vadd.f32 %v1361_v61, %v1242_v40 }
 0x1b1   : > { %v1400_v32 = vadd.f32 %v2206_v0, %v1380_v31 }
 0x1b2   : > { %v1087_v44 = vpop.f32.mrf.mxu2 }
 0x1b3   : > { %v1416_v43 = vmax.f32 %v1400_v32, 0.0  ;;  %v1105_v2 = vadd.f32 %v1087_v44, %v967_v36  ;;  %v1225_v39 = vpop.f32.mrf.mxu3 }
 0x1b5   : > { %1433 = vst.msk [vmem:[%s2214_s28 + $0x70] sm:$0xff] %vm1418_vm1, %v1416_v43  ;;  %v1243_v51 = vadd.f32 %v1225_v39, %v1105_v2 }
 0x1b7   : > { %v1381_v27 = vadd.f32 %v1363_v28, %v1243_v51 }
 0x1b9   : > { %v1401_v3 = vadd.f32 %v2206_v0, %v1381_v27 }
 0x1bb   : > { %v1417_v46 = vmax.f32 %v1401_v3, 0.0 }
 0x1bd   : > { %1434 = vst.msk [vmem:[%s2214_s28 + $0x78] sm:$0xff] %vm1418_vm1, %v1417_v46 }
 0x1be PF: > { %s13_s12 = sadd.s32 1, %s1781_s12  }
 0x1bf   : > { %p10_p4 = scmp.ge.s32.totalorder %s13_s12, 4  }
 0x1c1   :  { %12 = sbr.rel (!%p10_p4) target bundleno = 1 (0x1), region = 70 }

// kernel: inception_resnet_a_forward.9
= control target key start
LH: loop header
LB: loop body
LE: loop exit
PB: predicated region body
PF: predicated region fallthrough
CT: control target
= control target key end

     0   :  { %13 = vsyncpa [#allocation3], 0  ;;  %s1962_s0 = inlined_call_operand.vmem [shape: f32[128,32], index: 0, kind: input, shape index: {}]   ;;  %s1963_s1 = inlined_call_operand.vmem [shape: f32[128,32], index: 1, kind: input, shape index: {}]   ;;  %s1964_s2 = inlined_call_operand.vmem [shape: f32[128,64], index: 2, kind: input, shape index: {}]   ;;  %s1965_s3 = inlined_call_operand.vmem [shape: f32[128,320], index: 3, kind: input, shape index: {}]   ;;  %s1966_s4 = inlined_call_operand.vmem [shape: bf16[32,320], index: 4, kind: input, shape index: {}]   ;;  %s1967_s5 = inlined_call_operand.vmem [shape: bf16[32,320], index: 5, kind: input, shape index: {}]   ;;  %s1968_s6 = inlined_call_operand.vmem [shape: bf16[64,320], index: 6, kind: input, shape index: {}]   ;;  %s1969_s7 = inlined_call_operand.vmem [shape: f32[1,320], index: 7, kind: input, shape index: {}]   ;;  %s1970_s8 = inlined_call_operand.hbm [shape: f32[128,320], index: 8, kind: output, shape index: {}]  }
   0x1   :  { %15 = vsyncpa [#allocation3 + $0x1], 0  ;;  %s1473_s27 = smov 0   ;;  %s1475_s28 = smov 0  }
   0x2   :  { %s1477_s29 = smov 0   ;;  %s1479_s30 = smov 0  }
   0x3 LB: > { %s1494_s9 = sadd.s32 4294967295, %s1424_s30   ;;  %s1139_s10 = sadd.s32 4294967294, %s1424_s30   ;;  %s1424_s30 = sphi %s1479_s30, %s1976_s30   ;;  %s1420_s29 = sphi %s1477_s29, %s1975_s29   ;;  %s1416_s28 = sphi %s1475_s28, %s1974_s28   ;;  %s1412_s27 = sphi %s1473_s27, %s1973_s27  }
   0x4   : > { %s1498_s11 = sadd.s32 1, %s1424_s30   ;;  %s216_s12 = sadd.s32 1, %s1420_s29 }
   0x5   : > { %s213_s13 = ssub.s32 %s1424_s30, %s1498_s11  ;;  %p226_p0 = scmp.ne.s32.totalorder %s1420_s29, %s1416_s28 }
   0x6   : > { %p214_p1 = scmp.eq.s32.totalorder %s213_s13, 0  ;;  %p227_p2 = scmp.eq.s32.totalorder %s1494_s9, 1 }
   0x7   : > { %p232_p3 = scmp.ne.s32.totalorder %s1416_s28, %s1412_s27  ;;  %p233_p4 = scmp.eq.s32.totalorder %s1139_s10, 1 }
   0x8   : > { %s1509_s14 = scalar_select %p214_p1, %s1420_s29, %s216_s12  }
   0x9   : > { %p1511_p5 = por %p227_p2, %p226_p0  ;;  %p1515_p6 = por %p233_p4, %p232_p3 }
   0xa   : > { %p1142_p7 = scmp.ge.s32.totalorder %s1424_s30, 1  ;;  %p300_p8 = scmp.lt.s32.totalorder %s1424_s30, 3 }
   0xc   : > { %p301_p9 = pnand %p1142_p7, %p300_p8 }
   0xd   : > { %s1143_s25 = sshll.u32 (!%p301_p9), %s1494_s9, 3  ;;  %s1320_s19 = smul.u32 (!%p301_p9), 192, %s1494_s9 }
   0xe   : > { %304 = sbr.rel (%p301_p9) target bundleno = 314 (0x13a), region = 52  ;;  %p351_p10 = scmp.lt.s32.totalorder (!%p301_p9), %s1143_s25, 15 }
   0xf   : > { %s1037_s21 = scalar_lea.hbm (!%p301_p9), %s1970_s8, %s1320_s19 }
  0x13   : > { %v1165_v0 = vld [vmem:[%s1967_s5 + $0x18] sm:$0xf]  ;;  %v1298_v1 = vld [vmem:[%s1967_s5 + $0x20] sm:$0xf0]  ;;  %v1153_v2 = vld [vmem:[%s1967_s5] sm:$0xf] }
  0x14   : > { %v1166_v3 = vor.u32 %v1298_v1, %v1165_v0  ;;  %v1295_v4 = vld [vmem:[%s1967_s5 + $0x8] sm:$0xf0]  ;;  %v1173_v5 = vld [vmem:[%s1967_s5 + $0x20] sm:$0xf]  ;;  %v1201_v7 = vld [vmem:[%s1966_s4 + $0x18] sm:$0xf] }
  0x15   : > { %v1299_v6 = vld [vmem:[%s1967_s5 + $0x28] sm:$0xf0]  ;;  %v1154_v8 = vor.u32 %v1295_v4, %v1153_v2  ;;  %v1292_v9 = vld [vmem:[%s1966_s4 + $0x20] sm:$0xf0]  ;;  %v1297_v10 = vld [vmem:[%s1967_s5 + $0x1c] sm:$0xf] }
  0x16   : > { %468 = vmatpush.bf16.msra.mxu0 %v1166_v3  ;;  %1312 = vmatpush.bf16.msra.mxu1 %v1166_v3  ;;  %v1167_v11 = vld [vmem:[%s1967_s5 + $0x24] sm:$0xf0]  ;;  %s1978_s25 = smov (!%p351_p10, %s1143_s25), 15  ;;  %v1291_v12 = vld [vmem:[%s1966_s4 + $0x1c] sm:$0xf]  ;;  %v1174_v14 = vor.u32 %v1299_v6, %v1173_v5  ;;  %v1202_v15 = vor.u32 %v1292_v9, %v1201_v7  ;;  %vm449_vm0 = vcmask 261120  }
  0x17   : > { %1313 = vmatpush.bf16.msra.mxu2 %v1166_v3  ;;  %1314 = vmatpush.bf16.msra.mxu3 %v1166_v3  ;;  %v1203_v13 = vld [vmem:[%s1966_s4 + $0x24] sm:$0xf0]  ;;  %v1296_v17 = vld [vmem:[%s1967_s5 + $0x10] sm:$0xf0]  ;;  %v1189_v18 = vld [vmem:[%s1966_s4] sm:$0xf]  ;;  %v1170_v19 = vor.u32 %v1297_v10, %v1167_v11 }
  0x18   : > { %v1161_v16 = vld [vmem:[%s1967_s5 + $0x8] sm:$0xf]  ;;  %s1570_s23 = sshll.u32 %s1978_s25, 3  ;;  %v1206_v20 = vor.u32 %v1291_v12, %v1203_v13  ;;  %v1289_v21 = vld [vmem:[%s1966_s4 + $0x8] sm:$0xf0]  ;;  %vm772_vm1 = vcmask 523264  }
  0x19   : > { %v1294_v22 = vld [vmem:[%s1967_s5 + $0x4] sm:$0xf]  ;;  %s360_s18 = scalar_lea.vmem %s1963_s1, %s1570_s23  ;;  %v1155_v23 = vld [vmem:[%s1967_s5 + $0xc] sm:$0xf0]  ;;  %v1162_v33 = vor.u32 %v1296_v17, %v1161_v16  ;;  %v1190_v34 = vor.u32 %v1289_v21, %v1189_v18  ;;  %v1261_v42 = vld [vmem:[%s1968_s6 + $0x48] sm:$0xf]  ;;  %s1650_s22 = scalar_lea.vmem %s1962_s0, %s1570_s23 }
  0x1a   : > { %469 = vmatpush.bf16.msra.mxu0 %v1154_v8  ;;  %1315 = vmatpush.bf16.msra.mxu1 %v1154_v8  ;;  %v1288_v24 = vld [vmem:[%s1966_s4 + $0x4] sm:$0xf]  ;;  %v1191_v25 = vld [vmem:[%s1966_s4 + $0xc] sm:$0xf0]  ;;  %v398_v27 = vld [vmem:[%s360_s18 + $0x8] sm:$0xff]  ;;  %v1158_v39 = vor.u32 %v1294_v22, %v1155_v23  ;;  %s366_s24 = scalar_lea.vmem %s1964_s2, %s1570_s23  ;;  %s1319_s23 = smul.u32 24, %s1978_s25 }
  0x1b   : > { %1316 = vmatpush.bf16.msra.mxu2 %v1154_v8  ;;  %1317 = vmatpush.bf16.msra.mxu3 %v1154_v8  ;;  %v397_v26 = vld [vmem:[%s360_s18] sm:$0xff]  ;;  %v399_v28 = vld [vmem:[%s360_s18 + $0x10] sm:$0xff]  ;;  %v400_v30 = vld [vmem:[%s360_s18 + $0x18] sm:$0xff]  ;;  %v1194_v41 = vor.u32 %v1288_v24, %v1191_v25  ;;  %s347_s25 = sand.u32 1, %s1416_s28  }
  0x1c   : > { %v405_v29 = vpack.c.bf16 %v398_v27, %v397_v26  ;;  %v401_v31 = vld [vmem:[%s360_s18 + $0x20] sm:$0xff]  ;;  %v402_v32 = vld [vmem:[%s360_s18 + $0x28] sm:$0xff]  ;;  %v1591_v35 = vpack.c.bf16 %v400_v30, %v399_v28  ;;  %v403_v37 = vld [vmem:[%s360_s18 + $0x30] sm:$0xff]  ;;  %s1802_s10 = scalar_lea.vmem %s1965_s3, %s1319_s23  ;;  %s1318_s17 = smul.u32 192, %s347_s25 }
  0x1d   : > { %v1593_v36 = vpack.c.bf16 %v402_v32, %v401_v31  ;;  %v404_v38 = vld [vmem:[%s360_s18 + $0x38] sm:$0xff]  ;;  %v1310_v43 = vld [vmem:[%s1968_s6 + $0x50] sm:$0xf0]  ;;  %v1309_v45 = vld [vmem:[%s1968_s6 + $0x4c] sm:$0xf]  ;;  %s1040_s23 = sshll.u32 %s1037_s21, 4  ;;  %s1041_s23 = int_to_ptr.hbm [resolvable:$true] %s1040_s23 }
  0x1e   : > { %497 = vmatpush.bf16.msrb.mxu1 %v1170_v19  ;;  %628 = vmatpush.bf16.msrb.mxu0 %v1206_v20  ;;  %v1596_v40 = vpack.c.bf16 %v404_v38, %v403_v37  ;;  %v1262_v44 = vor.u32 %v1310_v43, %v1261_v42  ;;  %v1263_v46 = vld [vmem:[%s1968_s6 + $0x54] sm:$0xf0]  ;;  %v1209_v47 = vld [vmem:[%s1966_s4 + $0x20] sm:$0xf]  ;;  %v1293_v49 = vld [vmem:[%s1966_s4 + $0x28] sm:$0xf0] }
  0x1f   : > { %526 = vmatpush.bf16.msrb.mxu2 %v1174_v14  ;;  %599 = vmatpush.bf16.msrb.mxu3 %v1202_v15  ;;  %v1266_v48 = vor.u32 %v1309_v45, %v1263_v46  ;;  %v1269_v50 = vld [vmem:[%s1968_s6 + $0x50] sm:$0xf]  ;;  %v1311_v51 = vld [vmem:[%s1968_s6 + $0x58] sm:$0xf0]  ;;  %v1210_v52 = vor.u32 %v1293_v49, %v1209_v47  ;;  %v1306_v56 = vld [vmem:[%s1968_s6 + $0x34] sm:$0xf] }
  0x20   : > { %1175 = vmatmul.msk.bf16.vlgmr.msra.gmra.mxu0 %vm449_vm0, %v405_v29  ;;  %1176 = vmatmul.msk.bf16.vlgmr.msra.gmra.mxu1 %vm449_vm0, %v1591_v35  ;;  %v1270_v53 = vor.u32 %v1311_v51, %v1269_v50  ;;  %v1249_v54 = vld [vmem:[%s1968_s6 + $0x30] sm:$0xf]  ;;  %v1307_v55 = vld [vmem:[%s1968_s6 + $0x38] sm:$0xf0]  ;;  %v1251_v57 = vld [vmem:[%s1968_s6 + $0x3c] sm:$0xf0] }
  0x21   : > { %1177 = vmatmul.msk.bf16.vlgmr.msra.gmra.mxu2 %vm449_vm0, %v1593_v36  ;;  %1178 = vmatmul.msk.bf16.vlgmr.msra.gmra.mxu3 %vm449_vm0, %v1596_v40  ;;  %v1250_v58 = vor.u32 %v1307_v55, %v1249_v54  ;;  %v1254_v59 = vor.u32 %v1306_v56, %v1251_v57  ;;  %v1257_v60 = vld [vmem:[%s1968_s6 + $0x38] sm:$0xf]  ;;  %v1308_v61 = vld [vmem:[%s1968_s6 + $0x40] sm:$0xf0]  ;;  %v378_v0 = vld [vmem:[%s1650_s22 + $0x8] sm:$0xff]  ;;  %s1824_s18 = scalar_lea.vmem [#allocation2], %s1318_s17 }
  0x22   : > { %498 = vmatpush.bf16.msrb.mxu1 %v1158_v39  ;;  %629 = vmatpush.bf16.msrb.mxu0 %v1194_v41  ;;  %v1258_v62 = vor.u32 %v1308_v61, %v1257_v60  ;;  %v377_v63 = vld [vmem:[%s1650_s22] sm:$0xff]  ;;  %v1237_v2 = vld [vmem:[%s1968_s6 + $0x18] sm:$0xf]  ;;  %v1303_v4 = vld [vmem:[%s1968_s6 + $0x1c] sm:$0xf]  ;;  %s1376_s26 = sshra.s32 %s1041_s23, 4  ;;  %s1377_s26 = int_to_ptr.hbm [resolvable:$true] %s1376_s26 }
  0x23   : > { %527 = vmatpush.bf16.msrb.mxu2 %v1162_v33  ;;  %600 = vmatpush.bf16.msrb.mxu3 %v1190_v34  ;;  %v385_v1 = vpack.c.bf16 %v378_v0, %v377_v63  ;;  %v1304_v3 = vld [vmem:[%s1968_s6 + $0x20] sm:$0xf0]  ;;  %v1239_v6 = vld [vmem:[%s1968_s6 + $0x24] sm:$0xf0]  ;;  %v1290_v8 = vld [vmem:[%s1966_s4 + $0x10] sm:$0xf0]  ;;  %p1383_p0 = scmp.lt.s32.totalorder %s1377_s26, %s1970_s8 }
  0x24   : > { %v1238_v5 = vor.u32 %v1304_v3, %v1237_v2  ;;  %v1197_v7 = vld [vmem:[%s1966_s4 + $0x8] sm:$0xf]  ;;  %v1242_v9 = vor.u32 %v1303_v4, %v1239_v6  ;;  %v1245_v11 = vld [vmem:[%s1968_s6 + $0x20] sm:$0xf]  ;;  %v1305_v12 = vld [vmem:[%s1968_s6 + $0x28] sm:$0xf0] }
  0x25   : > { %v1198_v10 = vor.u32 %v1290_v8, %v1197_v7  ;;  %v1246_v13 = vor.u32 %v1305_v12, %v1245_v11  ;;  %v379_v14 = vld [vmem:[%s1650_s22 + $0x10] sm:$0xff]  ;;  %v380_v15 = vld [vmem:[%s1650_s22 + $0x18] sm:$0xff]  ;;  %v1225_v17 = vld [vmem:[%s1968_s6] sm:$0xf]  ;;  %s1382_s17 = scalar_lea.hbm %s1970_s8, 384 }
  0x26   : > { %657 = vmatpush.bf16.msra.mxu1 %v1210_v52  ;;  %847 = vmatpush.bf16.msra.mxu0 %v1270_v53  ;;  %v386_v16 = vpack.c.bf16 %v380_v15, %v379_v14  ;;  %v1301_v18 = vld [vmem:[%s1968_s6 + $0x8] sm:$0xf0]  ;;  %v1300_v19 = vld [vmem:[%s1968_s6 + $0x4] sm:$0xf]  ;;  %v1227_v21 = vld [vmem:[%s1968_s6 + $0xc] sm:$0xf0] }
  0x27   : > { %789 = vmatpush.bf16.msra.mxu2 %v1262_v44  ;;  %818 = vmatpush.bf16.msra.mxu3 %v1266_v48  ;;  %v1226_v20 = vor.u32 %v1301_v18, %v1225_v17  ;;  %v1233_v22 = vld [vmem:[%s1968_s6 + $0x8] sm:$0xf]  ;;  %v1302_v23 = vld [vmem:[%s1968_s6 + $0x10] sm:$0xf0]  ;;  %v1230_v24 = vor.u32 %v1300_v19, %v1227_v21  ;;  %v381_v26 = vld [vmem:[%s1650_s22 + $0x20] sm:$0xff] }
  0x28   : > { %v1234_v25 = vor.u32 %v1302_v23, %v1233_v22  ;;  %v382_v27 = vld [vmem:[%s1650_s22 + $0x28] sm:$0xff]  ;;  %v384_v30 = vld [vmem:[%s1650_s22 + $0x38] sm:$0xff]  ;;  %v680_v32 = vld [vmem:[%s366_s24] sm:$0xff] }
  0x29   : > { %v387_v28 = vpack.c.bf16 %v382_v27, %v381_v26  ;;  %v681_v33 = vld [vmem:[%s366_s24 + $0x8] sm:$0xff]  ;;  %v684_v38 = vld [vmem:[%s366_s24 + $0x20] sm:$0xff]  ;;  %v686_v41 = vld [vmem:[%s366_s24 + $0x30] sm:$0xff] }
  0x2a   : > { %848 = vmatpush.bf16.msra.mxu0 %v1258_v62  ;;  %658 = vmatpush.bf16.msra.mxu1 %v1198_v10  ;;  %v688_v34 = vpack.c.bf16 %v681_v33, %v680_v32  ;;  %v685_v39 = vld [vmem:[%s366_s24 + $0x28] sm:$0xff]  ;;  %v687_v42 = vld [vmem:[%s366_s24 + $0x38] sm:$0xff]  ;;  %v898_v32 = vld [vmem:[%s1802_s10 + $0x10] sm:$0xff] }
  0x2b   : > { %790 = vmatpush.bf16.msra.mxu2 %v1250_v58  ;;  %819 = vmatpush.bf16.msra.mxu3 %v1254_v59  ;;  %v691_v43 = vpack.c.bf16 %v687_v42, %v686_v41 }
  0x2e   : > { %849 = vmatpush.bf16.msra.mxu0 %v1246_v13 }
  0x2f   : > { %791 = vmatpush.bf16.msra.mxu2 %v1238_v5  ;;  %820 = vmatpush.bf16.msra.mxu3 %v1242_v9 }
  0x30   : > { %1215 = vmatmul.msk.bf16.vlgmr.msrb.gmra.mxu0 %vm449_vm0, %v385_v1  ;;  %1179 = vmatmul.msk.bf16.vlgmr.msrb.gmra.mxu1 %vm449_vm0, %v405_v29 }
  0x31   : > { %1183 = vmatmul.msk.bf16.vlgmr.msrb.gmra.mxu2 %vm449_vm0, %v405_v29  ;;  %1211 = vmatmul.msk.bf16.vlgmr.msrb.gmra.mxu3 %vm449_vm0, %v385_v1  ;;  %v383_v29 = vld [vmem:[%s1650_s22 + $0x30] sm:$0xff]  ;;  %s1025_s22 = scalar_lea.sflag [#allocation3], %s347_s25 }
  0x32   : > { %850 = vmatpush.bf16.msra.mxu0 %v1234_v25  ;;  %v388_v31 = vpack.c.bf16 %v384_v30, %v383_v29  ;;  %v944_v30 = vld [vmem:[%s1969_s7] sm:$0x7] }
  0x33   : > { %792 = vmatpush.bf16.msra.mxu2 %v1226_v20  ;;  %821 = vmatpush.bf16.msra.mxu3 %v1230_v24  ;;  %v1818_v41 = vperm.slane %v944_v30, 0 }
  0x40   : > { %1216 = vmatmul.msk.bf16.gmra.mxu0 %vm449_vm0, %v386_v16  ;;  %1180 = vmatmul.msk.bf16.gmra.mxu1 %vm449_vm0, %v1591_v35 }
  0x41   : > { %1184 = vmatmul.msk.bf16.gmra.mxu2 %vm449_vm0, %v1591_v35  ;;  %1212 = vmatmul.msk.bf16.gmra.mxu3 %vm449_vm0, %v386_v16  ;;  %v682_v35 = vld [vmem:[%s366_s24 + $0x10] sm:$0xff] }
  0x50   : > { %1217 = vmatmul.msk.bf16.gmra.mxu0 %vm449_vm0, %v387_v28  ;;  %1181 = vmatmul.msk.bf16.gmra.mxu1 %vm449_vm0, %v1593_v36 }
  0x51   : > { %1185 = vmatmul.msk.bf16.gmra.mxu2 %vm449_vm0, %v1593_v36  ;;  %1213 = vmatmul.msk.bf16.gmra.mxu3 %vm449_vm0, %v387_v28  ;;  %v683_v36 = vld [vmem:[%s366_s24 + $0x18] sm:$0xff]  ;;  %s1038_s24 = sshll.u32 %s1824_s18, 4  ;;  %s1039_s24 = int_to_ptr.vmem [resolvable:$true] %s1038_s24 }
  0x52   : > { %v689_v37 = vpack.c.bf16 %v683_v36, %v682_v35 }
  0x60   : > { %1218 = vmatmul.msk.bf16.gmra.mxu0 %vm449_vm0, %v388_v31  ;;  %1182 = vmatmul.msk.bf16.gmra.mxu1 %vm449_vm0, %v1596_v40 }
  0x61   : > { %1186 = vmatmul.msk.bf16.gmra.mxu2 %vm449_vm0, %v1596_v40  ;;  %1214 = vmatmul.msk.bf16.gmra.mxu3 %vm449_vm0, %v388_v31  ;;  %v690_v40 = vpack.c.bf16 %v685_v39, %v684_v38  ;;  %v896_v38 = vld [vmem:[%s1802_s10] sm:$0xff] }
  0x70   : > { %1279 = vmatmul.msk.bf16.vlgmr.msra.gmra.mxu0 %vm772_vm1, %v688_v34  ;;  %1219 = vmatmul.msk.bf16.vlgmr.msra.gmra.mxu1 %vm449_vm0, %v385_v1 }
  0x71   : > { %1271 = vmatmul.msk.bf16.vlgmr.msra.gmra.mxu2 %vm772_vm1, %v688_v34  ;;  %1275 = vmatmul.msk.bf16.vlgmr.msra.gmra.mxu3 %vm772_vm1, %v688_v34  ;;  %v1811_v34 = vperm.slane %v944_v30, 2 }
  0x80   : > { %1280 = vmatmul.msk.bf16.gmra.mxu0 %vm772_vm1, %v689_v37  ;;  %1220 = vmatmul.msk.bf16.gmra.mxu1 %vm449_vm0, %v386_v16 }
  0x81   : > { %1272 = vmatmul.msk.bf16.gmra.mxu2 %vm772_vm1, %v689_v37  ;;  %1276 = vmatmul.msk.bf16.gmra.mxu3 %vm772_vm1, %v689_v37 }
  0x90   : > { %1281 = vmatmul.msk.bf16.gmra.mxu0 %vm772_vm1, %v690_v40  ;;  %1221 = vmatmul.msk.bf16.gmra.mxu1 %vm449_vm0, %v387_v28 }
  0x91   : > { %1273 = vmatmul.msk.bf16.gmra.mxu2 %vm772_vm1, %v690_v40  ;;  %1277 = vmatmul.msk.bf16.gmra.mxu3 %vm772_vm1, %v690_v40 }
  0x9d   : > { %v1740_v44 = vpop.f32.mrf.mxu0  ;;  %v1742_v45 = vpop.f32.mrf.mxu1 }
  0xa0   : > { %1282 = vmatmul.msk.bf16.gmra.mxu0 %vm772_vm1, %v691_v43  ;;  %1222 = vmatmul.msk.bf16.gmra.mxu1 %vm449_vm0, %v388_v31 }
  0xa1   : > { %1274 = vmatmul.msk.bf16.gmra.mxu2 %vm772_vm1, %v691_v43  ;;  %1278 = vmatmul.msk.bf16.gmra.mxu3 %vm772_vm1, %v691_v43  ;;  %v897_v43 = vld [vmem:[%s1802_s10 + $0x8] sm:$0xff] }
  0xa4   : > { %v1748_v46 = vpop.f32.mrf.mxu2  ;;  %v1750_v47 = vpop.f32.mrf.mxu3 }
  0xa5   : > { %v1752_v48 = vpop.f32.mrf.mxu0  ;;  %v1754_v49 = vpop.f32.mrf.mxu1 }
  0xac   : > { %v1756_v50 = vpop.f32.mrf.mxu2  ;;  %v1758_v51 = vpop.f32.mrf.mxu3 }
  0xad   : > { %v631_v52 = vpop.f32.mrf.mxu0  ;;  %v500_v53 = vpop.f32.mrf.mxu1 }
  0xae   : > { %v632_v54 = vadd.f32 %v631_v52, %v500_v53 }
  0xb4   : > { %v529_v55 = vpop.f32.mrf.mxu2  ;;  %v602_v56 = vpop.f32.mrf.mxu3 }
  0xb5   : > { %v633_v57 = vpop.f32.mrf.mxu0  ;;  %v502_v58 = vpop.f32.mrf.mxu1  ;;  %v603_v35 = vadd.f32 %v602_v56, %v1740_v44 }
  0xb6   : > { %v1760_v59 = vadd.f32 %v633_v57, %v502_v58 }
  0xbc   : > { %v531_v60 = vpop.f32.mrf.mxu2  ;;  %v1762_v61 = vpop.f32.mrf.mxu3 }
  0xbd   : > { %v636_v62 = vpop.f32.mrf.mxu0  ;;  %v505_v63 = vpop.f32.mrf.mxu1 }
  0xbe   : > { %v1764_v0 = vadd.f32 %v636_v62, %v505_v63  ;;  %v901_v63 = vld [vmem:[%s1802_s10 + $0x28] sm:$0xff] }
  0xc4   : > { %v1766_v1 = vpop.f32.mrf.mxu2  ;;  %v1768_v2 = vpop.f32.mrf.mxu3 }
  0xc5   : > { %v638_v3 = vpop.f32.mrf.mxu0  ;;  %v507_v4 = vpop.f32.mrf.mxu1 }
  0xc6   : > { %v1770_v5 = vadd.f32 %v638_v3, %v507_v4 }
  0xcc   : > { %v1772_v6 = vpop.f32.mrf.mxu2  ;;  %v1774_v7 = vpop.f32.mrf.mxu3 }
  0xcd   : > { %v641_v8 = vpop.f32.mrf.mxu0  ;;  %v510_v9 = vpop.f32.mrf.mxu1 }
  0xce   : > { %v1776_v10 = vadd.f32 %v641_v8, %v510_v9  ;;  %v605_v8 = vadd.f32 %v1762_v61, %v1752_v48 }
  0xd4   : > { %v1778_v11 = vpop.f32.mrf.mxu2  ;;  %v1780_v12 = vpop.f32.mrf.mxu3 }
  0xd5   : > { %v643_v13 = vpop.f32.mrf.mxu0  ;;  %v512_v14 = vpop.f32.mrf.mxu1 }
  0xd6   : > { %v1782_v15 = vadd.f32 %v643_v13, %v512_v14 }
  0xdc   : > { %v1784_v16 = vpop.f32.mrf.mxu2  ;;  %v1786_v17 = vpop.f32.mrf.mxu3 }
  0xdd   : > { %v646_v18 = vpop.f32.mrf.mxu0  ;;  %v515_v19 = vpop.f32.mrf.mxu1 }
  0xde   : > { %v1788_v20 = vadd.f32 %v646_v18, %v515_v19  ;;  %v899_v18 = vld [vmem:[%s1802_s10 + $0x18] sm:$0xff] }
  0xe4   : > { %v1790_v21 = vpop.f32.mrf.mxu2  ;;  %v1792_v22 = vpop.f32.mrf.mxu3 }
  0xe5   : > { %v648_v23 = vpop.f32.mrf.mxu0  ;;  %v517_v24 = vpop.f32.mrf.mxu1 }
  0xe6   : > { %v1794_v25 = vadd.f32 %v648_v23, %v517_v24 }
  0xec   : > { %v1797_v26 = vpop.f32.mrf.mxu2  ;;  %v1804_v27 = vpop.f32.mrf.mxu3 }
  0xed   : > { %v852_v28 = vpop.f32.mrf.mxu0  ;;  %v660_v29 = vpop.f32.mrf.mxu1 }
  0xee   : > { %v661_v31 = vadd.f32 %v660_v29, %v529_v55  ;;  %v1821_v55 = vperm.slane %v944_v30, 1 }
  0xf0   : > { %v874_v33 = vadd.f32 %v852_v28, %v661_v31  ;;  %v900_v28 = vld [vmem:[%s1802_s10 + $0x20] sm:$0xff] }
  0xf2   : > { %v922_v36 = vadd.f32 %v898_v32, %v874_v33 }
  0xf4   : > { %v794_v37 = vpop.f32.mrf.mxu2  ;;  %v954_v39 = vadd.f32 %v1811_v34, %v922_v36  ;;  %v823_v42 = vpop.f32.mrf.mxu3 }
  0xf5   : > { %v872_v40 = vadd.f32 %v794_v37, %v603_v35  ;;  %v854_v52 = vpop.f32.mrf.mxu0  ;;  %v873_v53 = vadd.f32 %v823_v42, %v632_v54  ;;  %v662_v57 = vpop.f32.mrf.mxu1  ;;  %v904_v35 = vld [vmem:[%s1802_s10 + $0x40] sm:$0xff] }
  0xf6   : > { %v978_v58 = vmax.f32 %v954_v39, 0.0  ;;  %v663_v44 = vadd.f32 %v662_v57, %v531_v60 }
  0xf7   : > { %v920_v62 = vadd.f32 %v896_v38, %v872_v40  ;;  %v921_v56 = vadd.f32 %v897_v43, %v873_v53 }
  0xf8   : > { %1002 = vst.msk [vmem:[%s1824_s18 + $0x10] sm:$0xff] %vm772_vm1, %v978_v58  ;;  %v877_v54 = vadd.f32 %v854_v52, %v663_v44  ;;  %v903_v58 = vld [vmem:[%s1802_s10 + $0x38] sm:$0xff] }
  0xf9   : > { %v952_v3 = vadd.f32 %v1818_v41, %v920_v62  ;;  %v953_v4 = vadd.f32 %v1821_v55, %v921_v56 }
  0xfa   : > { %v925_v60 = vadd.f32 %v901_v63, %v877_v54  ;;  %v907_v54 = vld [vmem:[%s1802_s10 + $0x58] sm:$0xff] }
  0xfb   : > { %v976_v9 = vmax.f32 %v952_v3, 0.0  ;;  %v977_v13 = vmax.f32 %v953_v4, 0.0 }
  0xfc   : > { %v796_v14 = vpop.f32.mrf.mxu2  ;;  %v957_v19 = vadd.f32 %v1811_v34, %v925_v60  ;;  %v825_v24 = vpop.f32.mrf.mxu3 }
  0xfd   : > { %1000 = vst [vmem:[%s1824_s18] sm:$0xff] %v976_v9  ;;  %v875_v23 = vadd.f32 %v796_v14, %v605_v8  ;;  %v857_v29 = vpop.f32.mrf.mxu0  ;;  %v876_v30 = vadd.f32 %v825_v24, %v1760_v59  ;;  %v665_v31 = vpop.f32.mrf.mxu1  ;;  %v608_v59 = vadd.f32 %v1768_v2, %v1742_v45 }
  0xfe   : > { %1001 = vst [vmem:[%s1824_s18 + $0x8] sm:$0xff] %v977_v13  ;;  %v981_v48 = vmax.f32 %v957_v19, 0.0  ;;  %v666_v32 = vadd.f32 %v665_v31, %v1766_v1  ;;  %v902_v1 = vld [vmem:[%s1802_s10 + $0x30] sm:$0xff] }
  0xff   : > { %v923_v61 = vadd.f32 %v899_v18, %v875_v23  ;;  %v924_v33 = vadd.f32 %v900_v28, %v876_v30  ;;  %v906_v28 = vld [vmem:[%s1802_s10 + $0x50] sm:$0xff] }
 0x100   : > { %1005 = vst.msk [vmem:[%s1824_s18 + $0x28] sm:$0xff] %vm772_vm1, %v981_v48  ;;  %v880_v37 = vadd.f32 %v857_v29, %v666_v32  ;;  %v910_v32 = vld [vmem:[%s1802_s10 + $0x70] sm:$0xff] }
 0x101   : > { %v955_v36 = vadd.f32 %v1818_v41, %v923_v61  ;;  %v956_v38 = vadd.f32 %v1821_v55, %v924_v33 }
 0x102   : > { %v928_v40 = vadd.f32 %v904_v35, %v880_v37 }
 0x103   : > { %v979_v39 = vmax.f32 %v955_v36, 0.0  ;;  %v980_v42 = vmax.f32 %v956_v38, 0.0 }
 0x104   : > { %v799_v43 = vpop.f32.mrf.mxu2  ;;  %v960_v52 = vadd.f32 %v1811_v34, %v928_v40  ;;  %v828_v57 = vpop.f32.mrf.mxu3 }
 0x105   : > { %1003 = vst [vmem:[%s1824_s18 + $0x18] sm:$0xff] %v979_v39  ;;  %v878_v53 = vadd.f32 %v799_v43, %v608_v59  ;;  %v859_v62 = vpop.f32.mrf.mxu0  ;;  %v879_v44 = vadd.f32 %v828_v57, %v1764_v0  ;;  %v667_v56 = vpop.f32.mrf.mxu1  ;;  %v610_v0 = vadd.f32 %v1774_v7, %v1754_v49 }
 0x106   : > { %1004 = vst [vmem:[%s1824_s18 + $0x20] sm:$0xff] %v980_v42  ;;  %v984_v45 = vmax.f32 %v960_v52, 0.0  ;;  %v668_v63 = vadd.f32 %v667_v56, %v1772_v6  ;;  %v905_v6 = vld [vmem:[%s1802_s10 + $0x48] sm:$0xff] }
 0x107   : > { %v926_v2 = vadd.f32 %v902_v1, %v878_v53  ;;  %v927_v3 = vadd.f32 %v903_v58, %v879_v44  ;;  %v909_v1 = vld [vmem:[%s1802_s10 + $0x68] sm:$0xff] }
 0x108   : > { %1008 = vst.msk [vmem:[%s1824_s18 + $0x40] sm:$0xff] %vm772_vm1, %v984_v45  ;;  %v883_v8 = vadd.f32 %v859_v62, %v668_v63  ;;  %v913_v44 = vld [vmem:[%s1802_s10 + $0x88] sm:$0xff] }
 0x109   : > { %v958_v4 = vadd.f32 %v1818_v41, %v926_v2  ;;  %v959_v9 = vadd.f32 %v1821_v55, %v927_v3 }
 0x10a   : > { %v931_v13 = vadd.f32 %v907_v54, %v883_v8 }
 0x10b   : > { %v982_v60 = vmax.f32 %v958_v4, 0.0  ;;  %v983_v14 = vmax.f32 %v959_v9, 0.0 }
 0x10c   : > { %v801_v18 = vpop.f32.mrf.mxu2  ;;  %v963_v19 = vadd.f32 %v1811_v34, %v931_v13  ;;  %v830_v24 = vpop.f32.mrf.mxu3 }
 0x10d   : > { %1006 = vst [vmem:[%s1824_s18 + $0x30] sm:$0xff] %v982_v60  ;;  %v881_v23 = vadd.f32 %v801_v18, %v610_v0  ;;  %v862_v29 = vpop.f32.mrf.mxu0  ;;  %v882_v30 = vadd.f32 %v830_v24, %v1770_v5  ;;  %v670_v31 = vpop.f32.mrf.mxu1  ;;  %v613_v5 = vadd.f32 %v1780_v12, %v1748_v46  ;;  %v912_v60 = vld [vmem:[%s1802_s10 + $0x80] sm:$0xff] }
 0x10e   : > { %1007 = vst [vmem:[%s1824_s18 + $0x38] sm:$0xff] %v983_v14  ;;  %v987_v49 = vmax.f32 %v963_v19, 0.0  ;;  %v671_v48 = vadd.f32 %v670_v31, %v1778_v11  ;;  %v908_v11 = vld [vmem:[%s1802_s10 + $0x60] sm:$0xff] }
 0x10f   : > { %v929_v7 = vadd.f32 %v905_v6, %v881_v23  ;;  %v930_v61 = vadd.f32 %v906_v28, %v882_v30  ;;  %v916_v23 = vld [vmem:[%s1802_s10 + $0xa0] sm:$0xff] }
 0x110   : > { %1011 = vst.msk [vmem:[%s1824_s18 + $0x58] sm:$0xff] %vm772_vm1, %v987_v49  ;;  %v886_v35 = vadd.f32 %v862_v29, %v671_v48 }
 0x111   : > { %v961_v33 = vadd.f32 %v1818_v41, %v929_v7  ;;  %v962_v36 = vadd.f32 %v1821_v55, %v930_v61 }
 0x112   : > { %v934_v38 = vadd.f32 %v910_v32, %v886_v35 }
 0x113   : > { %v985_v37 = vmax.f32 %v961_v33, 0.0  ;;  %v986_v59 = vmax.f32 %v962_v36, 0.0  ;;  %v915_v33 = vld [vmem:[%s1802_s10 + $0x98] sm:$0xff] }
 0x114   : > { %v804_v39 = vpop.f32.mrf.mxu2  ;;  %v966_v40 = vadd.f32 %v1811_v34, %v934_v38  ;;  %v833_v43 = vpop.f32.mrf.mxu3 }
 0x115   : > { %1009 = vst [vmem:[%s1824_s18 + $0x48] sm:$0xff] %v985_v37  ;;  %v884_v42 = vadd.f32 %v804_v39, %v613_v5  ;;  %v864_v52 = vpop.f32.mrf.mxu0  ;;  %v885_v53 = vadd.f32 %v833_v43, %v1776_v10  ;;  %v672_v57 = vpop.f32.mrf.mxu1  ;;  %v615_v10 = vadd.f32 %v1786_v17, %v1756_v50 }
 0x116   : > { %1010 = vst [vmem:[%s1824_s18 + $0x50] sm:$0xff] %v986_v59  ;;  %v990_v46 = vmax.f32 %v966_v40, 0.0  ;;  %v673_v58 = vadd.f32 %v672_v57, %v1784_v16  ;;  %v911_v16 = vld [vmem:[%s1802_s10 + $0x78] sm:$0xff]  ;;  %v620_v40 = vadd.f32 %v1804_v27, %v1758_v51 }
 0x117   : > { %v932_v12 = vadd.f32 %v908_v11, %v884_v42  ;;  %v933_v62 = vadd.f32 %v909_v1, %v885_v53  ;;  %v919_v59 = vld [vmem:[%s1802_s10 + $0xb8] sm:$0xff] }
 0x118   : > { %1014 = vst.msk [vmem:[%s1824_s18 + $0x70] sm:$0xff] %vm772_vm1, %v990_v46  ;;  %v889_v45 = vadd.f32 %v864_v52, %v673_v58  ;;  %v917_v52 = vld [vmem:[%s1802_s10 + $0xa8] sm:$0xff] }
 0x119   : > { %v964_v56 = vadd.f32 %v1818_v41, %v932_v12  ;;  %v965_v2 = vadd.f32 %v1821_v55, %v933_v62  ;;  %v918_v12 = vld [vmem:[%s1802_s10 + $0xb0] sm:$0xff] }
 0x11a   : > { %v937_v3 = vadd.f32 %v913_v44, %v889_v45 }
 0x11b   : > { %v988_v63 = vmax.f32 %v964_v56, 0.0  ;;  %v989_v54 = vmax.f32 %v965_v2, 0.0 }
 0x11c   : > { %v806_v4 = vpop.f32.mrf.mxu2  ;;  %v969_v8 = vadd.f32 %v1811_v34, %v937_v3  ;;  %v835_v0 = vpop.f32.mrf.mxu3 }
 0x11d   : > { %1012 = vst [vmem:[%s1824_s18 + $0x60] sm:$0xff] %v988_v63  ;;  %v887_v9 = vadd.f32 %v806_v4, %v615_v10  ;;  %v888_v13 = vadd.f32 %v835_v0, %v1782_v15  ;;  %v675_v14 = vpop.f32.mrf.mxu1  ;;  %v867_v18 = vpop.f32.mrf.mxu0  ;;  %v618_v15 = vadd.f32 %v1792_v22, %v1750_v47 }
 0x11e   : > { %1013 = vst [vmem:[%s1824_s18 + $0x68] sm:$0xff] %v989_v54  ;;  %v993_v50 = vmax.f32 %v969_v8, 0.0  ;;  %v676_v6 = vadd.f32 %v675_v14, %v1790_v21  ;;  %v914_v21 = vld [vmem:[%s1802_s10 + $0x90] sm:$0xff]  ;;  %s1378_s10 = scalar_lea.hbm %s1377_s26, 192 }
 0x11f   : > { %v935_v17 = vadd.f32 %v911_v16, %v887_v9  ;;  %v936_v19 = vadd.f32 %v912_v60, %v888_v13  ;;  %p1379_p11 = scmp.ne.s32.totalorder %s1377_s26, %s1378_s10  ;;  %p1384_p1 = scmp.lt.s32.totalorder %s1382_s17, %s1378_s10 }
 0x120   : > { %1017 = vst.msk [vmem:[%s1824_s18 + $0x88] sm:$0xff] %vm772_vm1, %v993_v50  ;;  %v892_v28 = vadd.f32 %v867_v18, %v676_v6 }
 0x121   : > { %v967_v24 = vadd.f32 %v1818_v41, %v935_v17  ;;  %v968_v29 = vadd.f32 %v1821_v55, %v936_v19  ;;  %p1380_p12 = pnand %p1379_p11, %p1511_p5  ;;  %p1385_p2 = por %p1384_p1, %p1383_p0 }
 0x122   : > { %v940_v31 = vadd.f32 %v916_v23, %v892_v28 }
 0x123   : > { %v991_v30 = vmax.f32 %v967_v24, 0.0  ;;  %v992_v49 = vmax.f32 %v968_v29, 0.0  ;;  %p1381_p13 = pneg %p1380_p12 }
 0x124   : > { %v809_v7 = vpop.f32.mrf.mxu2  ;;  %v972_v48 = vadd.f32 %v1811_v34, %v940_v31  ;;  %v838_v32 = vpop.f32.mrf.mxu3 }
 0x125   : > { %1015 = vst [vmem:[%s1824_s18 + $0x78] sm:$0xff] %v991_v30  ;;  %v890_v61 = vadd.f32 %v809_v7, %v618_v15  ;;  %v891_v35 = vadd.f32 %v838_v32, %v1788_v20  ;;  %v677_v36 = vpop.f32.mrf.mxu1  ;;  %v869_v38 = vpop.f32.mrf.mxu0  ;;  %p1386_p3 = pnand %p1385_p2, %p1381_p13 }
 0x126   : > { %1016 = vst [vmem:[%s1824_s18 + $0x80] sm:$0xff] %v992_v49  ;;  %v996_v5 = vmax.f32 %v972_v48, 0.0  ;;  %v678_v22 = vadd.f32 %v677_v36, %v1797_v26 }
 0x127   : > { %v938_v47 = vadd.f32 %v914_v21, %v890_v61  ;;  %v939_v37 = vadd.f32 %v915_v33, %v891_v35 }
 0x128   : > { %1020 = vst.msk [vmem:[%s1824_s18 + $0xa0] sm:$0xff] %vm772_vm1, %v996_v5  ;;  %v895_v11 = vadd.f32 %v869_v38, %v678_v22 }
 0x129   : > { %v970_v39 = vadd.f32 %v1818_v41, %v938_v47  ;;  %v971_v20 = vadd.f32 %v1821_v55, %v939_v37 }
 0x12a   : > { %v943_v43 = vadd.f32 %v919_v59, %v895_v11 }
 0x12b   : > { %v994_v42 = vmax.f32 %v970_v39, 0.0  ;;  %v995_v26 = vmax.f32 %v971_v20, 0.0 }
 0x12c   : > { %v811_v1 = vpop.f32.mrf.mxu2  ;;  %v975_v53 = vadd.f32 %v1811_v34, %v943_v43  ;;  %v840_v46 = vpop.f32.mrf.mxu3 }
 0x12d   : > { %1018 = vst [vmem:[%s1824_s18 + $0x90] sm:$0xff] %v994_v42  ;;  %v893_v57 = vadd.f32 %v811_v1, %v620_v40  ;;  %v894_v51 = vadd.f32 %v840_v46, %v1794_v25 }
 0x12e   : > { %1019 = vst [vmem:[%s1824_s18 + $0x98] sm:$0xff] %v995_v26  ;;  %v999_v27 = vmax.f32 %v975_v53, 0.0 }
 0x12f   : > { %v941_v58 = vadd.f32 %v917_v52, %v893_v57  ;;  %v942_v62 = vadd.f32 %v918_v12, %v894_v51 }
 0x130   : > { %1023 = vst.msk [vmem:[%s1824_s18 + $0xb8] sm:$0xff] %vm772_vm1, %v999_v27 }
 0x131   : > { %v973_v34 = vadd.f32 %v1818_v41, %v941_v58  ;;  %v974_v44 = vadd.f32 %v1821_v55, %v942_v62 }
 0x133   : > { %v997_v56 = vmax.f32 %v973_v34, 0.0  ;;  %v998_v45 = vmax.f32 %v974_v44, 0.0 }
 0x135   : > { %1021 = vst [vmem:[%s1824_s18 + $0xa8] sm:$0xff] %v997_v56 }
 0x136   : > { %1022 = vst [vmem:[%s1824_s18 + $0xb0] sm:$0xff] %v998_v45 }
 0x137   : > { %1389 = shalt.err (!%p1386_p3)
}
 0x138   : > { %s1426_s25 = smov 384   ;;  %s1427_s18 = smov 24  }
 0x139   : > { %1321 = dma.vmem_to_hbm [thread:$0]  (%p1511_p5), %s1039_s24, 3072, %s1041_s23, %s1025_s22, %s1426_s25, %s1426_s25, %s1427_s18  }
 0x13a PF: > { %p1327_p4 = scmp.ge.s32.totalorder %s1424_s30, 2  ;;  %s1055_s9 = sand.u32 1, %s1412_s27  }
 0x13b   : > { %s1056_s21 = scalar_lea.sflag [#allocation3], %s1055_s9 }
 0x13c   : > { %p1324_p7 = pnand %p1327_p4, %p1515_p6 }
 0x13e   : > { %p1325_p8 = pneg %p1324_p7 }
 0x140   : > { %1407 = dma.done.wait (%p1325_p8), %s1056_s21, 3072  }
 0x141   : > { %1409 = vsyncadd (%p1325_p8), %s1056_s21, 4294964224  ;;  %p18_p9 = scmp.ge.s32.totalorder %s1498_s11, 4   ;;  %s1973_s27 = smov %s1416_s28 }
 0x142   : > { %s1974_s28 = smov %s1420_s29  ;;  %s1975_s29 = smov %s1509_s14 }
 0x143   : > { %s1976_s30 = smov %s1498_s11  ;;  %20 = sbr.rel (!%p18_p9) target bundleno = 3 (0x3), region = 96 }
 0x148   :  { %1062 = vsyncpa [#allocation3], 1 }
 0x149   :  { %1064 = vsyncpa [#allocation3 + $0x1], 1 }

</bundles_post_ra>
